<compile_context>
chip_gen: v6e
topology: v6e:2x2x1
jax: 0.10.0
libtpu: 0.0.40
codegen_flags: <defaults>
</compile_context>

<pallas_src>
import functools

import jax
import jax.numpy as jnp
from jax import lax
from jax.experimental import pallas as pl
from jax.experimental.pallas import tpu as pltpu

# Safe on every generation: v5e/v6e physical VMEM = 128 MiB, v7x = 64 MiB/TC.
VMEM_LIMIT_BYTES = 32 * 1024 * 1024

FC1_IN = 3136      # 64 * 7 * 7, hard-coded by nn.Linear(3136, 512)
FC1_HID = 512
CONV3_TAPS = 49    # 7*7 spatial positions feeding fc1
CONV3_OC = 64


def _round_up(x, m):
    return ((x + m - 1) // m) * m


@functools.lru_cache(maxsize=None)
def _tensorcores_per_chip():
    """2 only where a 'parallel' grid axis shards across TensorCores (v7x /
    megacore parts); 1 on single-TC chips (v5e, v6e)."""
    try:
        kind = jax.devices()[0].device_kind.lower()
    except Exception:  # pragma: no cover - defensive default
        return 1
    if any(tag in kind for tag in ("v7", "tpu7", "v5p", "v4")):
        return 2
    return 1


# ----------------------------------------------------------------------------
# Pallas kernel 1: conv GEMM   out = relu(x @ w + b)   (bf16 in, f32 acc)
# ----------------------------------------------------------------------------
def _conv_gemm_kernel(x_ref, w_ref, b_ref, o_ref, *, relu):
    acc = jnp.dot(x_ref[...], w_ref[...], preferred_element_type=jnp.float32)
    acc = acc + b_ref[...]                 # b_ref is (1, N) f32, broadcasts over rows
    if relu:
        acc = jnp.maximum(acc, 0.0)
    o_ref[...] = acc.astype(o_ref.dtype)


def conv_gemm(x, w, b, *, relu=True, n_mblk=1):
    """x: (M, K) bf16, w: (K, N) bf16, b: (1, N) f32 -> (M, N) bf16."""
    M, K = x.shape
    Kw, N = w.shape
    assert K == Kw, (K, Kw)
    # Only split M when it tiles cleanly for bf16 sublane packing (16 rows).
    if n_mblk > 1 and (M % (16 * n_mblk) != 0):
        n_mblk = 1
    mb = M // n_mblk
    kernel = functools.partial(_conv_gemm_kernel, relu=relu)
    cost = pl.CostEstimate(
        flops=2 * M * K * N,
        transcendentals=0,
        bytes_accessed=2 * (M * K + K * N + M * N) + 4 * N,
    )
    return pl.pallas_call(
        kernel,
        out_shape=jax.ShapeDtypeStruct((M, N), jnp.bfloat16),
        grid_spec=pltpu.PrefetchScalarGridSpec(
            num_scalar_prefetch=0,
            grid=(n_mblk,),
            in_specs=[
                pl.BlockSpec((mb, K), lambda i: (i, 0)),
                pl.BlockSpec((K, N), lambda i: (0, 0)),
                pl.BlockSpec((1, N), lambda i: (0, 0)),
            ],
            out_specs=pl.BlockSpec((mb, N), lambda i: (i, 0)),
        ),
        compiler_params=pltpu.CompilerParams(
            dimension_semantics=("parallel",),
            vmem_limit_bytes=VMEM_LIMIT_BYTES,
        ),
        cost_estimate=cost,
    )(x, w, b)


# ----------------------------------------------------------------------------
# Pallas kernel 2: fused head   conv3(3x3/1) + ReLU + fc1 + ReLU + fc2
#
# The conv3 patches arrive spatial-tap major (49, M, 576) and the fc1 weight is
# pre-packed as (49, 64, 512).  The kernel walks the 49 taps with leading-dim
# indexing: per tap it does the conv3 GEMM for that spatial position (M, 576)
# @ (576, 64) and immediately contracts the resulting 64 channels against the
# matching fc1 weight rows into an (M, 512) f32 accumulator.  This realises the
# NCHW flatten without any in-kernel reshape, removes a kernel launch and the
# (M, 3136) HBM round trip between conv3 and fc1.
# ----------------------------------------------------------------------------
def _head_kernel(p3_ref, w3_ref, b3_ref, w1_ref, b1_ref, w2_ref, b2_ref, o_ref):
    n_taps = p3_ref.shape[0]
    m = p3_ref.shape[1]
    hid = w1_ref.shape[2]

    w3 = w3_ref[...]          # (576, 64) bf16, loop-invariant
    b3 = b3_ref[...]          # (1, 64) f32

    def tap(s, acc):
        h = jnp.dot(p3_ref[s], w3, preferred_element_type=jnp.float32)   # (m, 64)
        h = jnp.maximum(h + b3, 0.0).astype(jnp.bfloat16)
        return acc + jnp.dot(h, w1_ref[s], preferred_element_type=jnp.float32)

    acc = lax.fori_loop(0, n_taps, tap, jnp.zeros((m, hid), jnp.float32))
    hidden = jnp.maximum(acc + b1_ref[...], 0.0).astype(jnp.bfloat16)    # (m, 512)
    o_ref[...] = (jnp.dot(hidden, w2_ref[...], preferred_element_type=jnp.float32)
                  + b2_ref[...]).astype(o_ref.dtype)


def fc_head(p3, w3, b3, w1r, b1, w2, b2):
    """p3:(49,M,576) bf16, w3:(576,64) bf16, b3:(1,64) f32, w1r:(49,64,512) bf16,
    b1:(1,512) f32, w2:(512,Np) bf16, b2:(1,Np) f32 -> (M,Np) f32."""
    taps, M, K3 = p3.shape
    assert taps == CONV3_TAPS and K3 == w3.shape[0], (taps, K3)
    H = w1r.shape[2]
    Np = w2.shape[1]
    cost = pl.CostEstimate(
        flops=2 * M * (taps * K3 * CONV3_OC + FC1_IN * H + H * Np),
        transcendentals=0,
        bytes_accessed=2 * (taps * M * K3 + K3 * CONV3_OC
                            + taps * CONV3_OC * H + H * Np)
        + 4 * (CONV3_OC + H + Np + M * Np),
    )
    return pl.pallas_call(
        _head_kernel,
        out_shape=jax.ShapeDtypeStruct((M, Np), jnp.float32),
        grid_spec=pltpu.PrefetchScalarGridSpec(
            num_scalar_prefetch=0,
            grid=(1,),
            in_specs=[
                pl.BlockSpec((taps, M, K3), lambda i: (0, 0, 0)),
                pl.BlockSpec((K3, CONV3_OC), lambda i: (0, 0)),
                pl.BlockSpec((1, CONV3_OC), lambda i: (0, 0)),
                pl.BlockSpec((taps, CONV3_OC, H), lambda i: (0, 0, 0)),
                pl.BlockSpec((1, H), lambda i: (0, 0)),
                pl.BlockSpec((H, Np), lambda i: (0, 0)),
                pl.BlockSpec((1, Np), lambda i: (0, 0)),
            ],
            out_specs=pl.BlockSpec((M, Np), lambda i: (0, 0)),
        ),
        compiler_params=pltpu.CompilerParams(
            dimension_semantics=("arbitrary",),
            vmem_limit_bytes=VMEM_LIMIT_BYTES,
        ),
        cost_estimate=cost,
    )(p3, w3, b3, w1r, b1, w2, b2)


# ----------------------------------------------------------------------------
# im2col in (KH, KW, C) patch order (matches the pre-permuted conv weights).
# ----------------------------------------------------------------------------
def _im2col(x_nhwc, kh, kw, stride):
    """x: (N,H,W,C) -> patches (N*OH*OW, KH*KW*C)."""
    n, h, w, c = x_nhwc.shape
    oh = (h - kh) // stride + 1
    ow = (w - kw) // stride + 1
    slices = []
    for i in range(kh):
        for j in range(kw):
            slices.append(
                x_nhwc[:, i: i + stride * oh: stride,
                          j: j + stride * ow: stride, :]
            )
    p = jnp.stack(slices, axis=3)                 # (N, OH, OW, KH*KW, C)
    return p.reshape(n * oh * ow, kh * kw * c), (n, oh, ow)


def _im2col_taps_major(x_nhwc, kh, kw, stride):
    """x: (N,H,W,C) -> patches (OH*OW, N, KH*KW*C), spatial-tap major (for the
    fused head kernel's leading-dim tap walk)."""
    n, h, w, c = x_nhwc.shape
    oh = (h - kh) // stride + 1
    ow = (w - kw) // stride + 1
    slices = []
    for i in range(kh):
        for j in range(kw):
            slices.append(
                x_nhwc[:, i: i + stride * oh: stride,
                          j: j + stride * ow: stride, :]
            )
    p = jnp.stack(slices, axis=3)                 # (N, OH, OW, KH*KW, C)
    p = jnp.transpose(p, (1, 2, 0, 3, 4))         # (OH, OW, N, KH*KW, C)
    return p.reshape(oh * ow, n, kh * kw * c), (n, oh, ow)


# ----------------------------------------------------------------------------
# Parameter init (deterministic, PyTorch-default-style uniform bounds) + packing
# ----------------------------------------------------------------------------
def _uniform(key, shape, bound):
    return jax.random.uniform(key, shape, jnp.float32, minval=-bound, maxval=bound)


def init_mario_params(key, in_channels, output_dim):
    """PyTorch layouts: conv (OC, C, KH, KW), linear (out, in)."""
    keys = jax.random.split(key, 10)

    def conv_init(kw_, kb_, oc, ci, k):
        bound = 1.0 / float(ci * k * k) ** 0.5
        return (_uniform(kw_, (oc, ci, k, k), bound), _uniform(kb_, (oc,), bound))

    def lin_init(kw_, kb_, out_f, in_f):
        bound = 1.0 / float(in_f) ** 0.5
        return (_uniform(kw_, (out_f, in_f), bound), _uniform(kb_, (out_f,), bound))

    online = {
        "conv1": conv_init(keys[0], keys[1], 32, in_channels, 8),
        "conv2": conv_init(keys[2], keys[3], 64, 32, 4),
        "conv3": conv_init(keys[4], keys[5], 64, 64, 3),
        "fc1": lin_init(keys[6], keys[7], FC1_HID, FC1_IN),
        "fc2": lin_init(keys[8], keys[9], output_dim, FC1_HID),
    }
    # self.target = copy.deepcopy(self.online): identical (frozen) parameters.
    target = jax.tree_util.tree_map(lambda a: a, online)
    return {"online": online, "target": target}


def pack_params(raw_params, output_dim):
    """One-time packing for the Pallas forward path (NOT in the hot loop)."""
    n_pad = _round_up(max(output_dim, 1), 128)

    def pack_one(p):
        packed = {}
        for name in ("conv1", "conv2", "conv3"):
            w, b = p[name]
            oc, ci, kh, kw = w.shape
            # (OC, C, KH, KW) -> (KH, KW, C, OC) -> (KH*KW*C, OC): matches the
            # (KH, KW, C) patch flatten order of the im2col helpers.
            w_mat = jnp.transpose(w, (2, 3, 1, 0)).reshape(kh * kw * ci, oc)
            packed[name] = (w_mat.astype(jnp.bfloat16),
                            b.reshape(1, oc).astype(jnp.float32))
        w1, b1 = p["fc1"]                          # (512, 3136), (512,)
        # PyTorch flattens NCHW: fc1 input column = c*49 + (h*7 + w).  Regroup
        # the weight columns into (tap = h*7+w, channel c, hidden) so the fused
        # head contracts tap-by-tap against the NHWC conv3 output — no runtime
        # activation transpose, no K padding (exact 3136 contraction).
        w1r = (w1.reshape(FC1_HID, CONV3_OC, 7, 7)
                 .transpose(2, 3, 1, 0)                 # (7, 7, 64, 512)
                 .reshape(CONV3_TAPS, CONV3_OC, FC1_HID))
        w2, b2 = p["fc2"]                          # (out, 512), (out,)
        w2m = jnp.pad(w2.T, ((0, 0), (0, n_pad - output_dim)))  # lane-dense N
        b2p = jnp.pad(b2, (0, n_pad - output_dim))
        packed["fc1_w"] = w1r.astype(jnp.bfloat16)
        packed["fc1_b"] = b1.reshape(1, FC1_HID).astype(jnp.float32)
        packed["fc2_w"] = w2m.astype(jnp.bfloat16)
        packed["fc2_b"] = b2p.reshape(1, n_pad).astype(jnp.float32)
        return packed

    return {"online": pack_one(raw_params["online"]),
            "target": pack_one(raw_params["target"])}


# ----------------------------------------------------------------------------
# Forward pass (equivalent of MarioNet.forward(input, model))
# ----------------------------------------------------------------------------
@functools.partial(jax.jit, static_argnames=("model", "output_dim"))
def mario_forward(packed, x_nchw, *, output_dim, model="online"):
    model = model.lower()
    if model not in ("online", "target"):
        raise ValueError(model)
    p = packed[model]

    x = jnp.transpose(x_nchw, (0, 2, 3, 1)).astype(jnp.bfloat16)   # NCHW -> NHWC

    # Conv 8x8/4 + ReLU -> (N, 20, 20, 32).  2-way "parallel" M split only on
    # chips with >1 TensorCore; single full-extent block on v5e/v6e.
    patches, (n, oh, ow) = _im2col(x, 8, 8, 4)
    x = conv_gemm(patches, *p["conv1"],
                  n_mblk=_tensorcores_per_chip()).reshape(n, oh, ow, 32)

    # Conv 4x4/2 + ReLU -> (N, 9, 9, 64)
    patches, (n, oh, ow) = _im2col(x, 4, 4, 2)
    x = conv_gemm(patches, *p["conv2"]).reshape(n, oh, ow, 64)

    # Conv 3x3/1 + ReLU + Linear(3136,512) + ReLU + Linear(512,out): one fused
    # Pallas call operating on tap-major patches (49, N, 576).
    p3, (n, oh, ow) = _im2col_taps_major(x, 3, 3, 1)
    out = fc_head(p3, *p["conv3"], p["fc1_w"], p["fc1_b"], p["fc2_w"], p["fc2_b"])
    return out[:, :output_dim]


# ----------------------------------------------------------------------------
if __name__ == "__main__":
    key = jax.random.PRNGKey(0)
    k_param, k_input = jax.random.split(key)

    batch = 2
    in_channels = 4          # stacked frames
    height = width = 84      # fixed by the hard-coded nn.Linear(3136, 512)
    output_dim = 5           # RIGHT_ONLY action-space size

    raw_params = init_mario_params(k_param, in_channels, output_dim)
    params = pack_params(raw_params, output_dim)

    x = jax.random.normal(k_input, (batch, in_channels, height, width), jnp.float32)

    q_online = mario_forward(params, x, output_dim=output_dim, model="online")
    q_target = mario_forward(params, x, output_dim=output_dim, model="target")
    jax.block_until_ready(q_online)
    jax.block_until_ready(q_target)

    assert q_online.shape == (batch, output_dim), q_online.shape
    assert q_target.shape == (batch, output_dim), q_target.shape
    assert bool(jnp.all(jnp.isfinite(q_online)))
    assert bool(jnp.all(jnp.isfinite(q_target)))
    print("KERNEL_OK")
</pallas_src>

<mosaic_0001>
module attributes {stable_mosaic.version = 11 : i64} {
  func.func @_conv_gemm_kernel(%arg0: i32, %arg1: memref<800x256xbf16, #tpu.memory_space<vmem>>, %arg2: memref<256x32xbf16, #tpu.memory_space<vmem>>, %arg3: memref<1x32xf32, #tpu.memory_space<vmem>>, %arg4: memref<800x32xbf16, #tpu.memory_space<vmem>>) attributes {dimension_semantics = [#tpu.dimension_semantics<parallel>], iteration_bounds = array<i64: 1>, scalar_prefetch = 0 : i64, scratch_operands = 0 : i64, tpu.core_type = #tpu.core_type<tc>, window_params = [{transform_indices = @transform_0, window_bounds = array<i64: 800, 256>}, {pipeline_mode = #tpu.pipeline_mode<synchronous>, transform_indices = @transform_1, window_bounds = array<i64: 256, 32>}, {pipeline_mode = #tpu.pipeline_mode<synchronous>, transform_indices = @transform_2, window_bounds = array<i64: 1, 32>}, {transform_indices = @transform_3, window_bounds = array<i64: 800, 32>}]} {
    %c0 = arith.constant 0 : index
    %c0_0 = arith.constant 0 : index
    %0 = vector.load %arg1[%c0, %c0_0] : memref<800x256xbf16, #tpu.memory_space<vmem>>, vector<800x256xbf16>
    %c0_1 = arith.constant 0 : index
    %c0_2 = arith.constant 0 : index
    %1 = vector.load %arg2[%c0_1, %c0_2] : memref<256x32xbf16, #tpu.memory_space<vmem>>, vector<256x32xbf16>
    %cst = arith.constant dense<0.000000e+00> : vector<800x32xf32>
    %2 = tpu.matmul %0, %1, %cst {dimension_numbers = #tpu.dot_dimension_numbers<[1], [0], [0], [1], [0, 0, 1, 1], [], []>} : vector<800x256xbf16>, vector<256x32xbf16>, vector<800x32xf32> -> vector<800x32xf32>
    %c0_3 = arith.constant 0 : index
    %c0_4 = arith.constant 0 : index
    %3 = vector.load %arg3[%c0_3, %c0_4] : memref<1x32xf32, #tpu.memory_space<vmem>>, vector<1x32xf32>
    %4 = vector.broadcast %3 : vector<1x32xf32> to vector<800x32xf32>
    %5 = arith.addf %2, %4 : vector<800x32xf32>
    %cst_5 = arith.constant 0.000000e+00 : f32
    %6 = vector.broadcast %cst_5 : f32 to vector<800x32xf32>
    %7 = arith.maximumf %5, %6 : vector<800x32xf32>
    %8 = arith.truncf %7 : vector<800x32xf32> to vector<800x32xbf16>
    %c0_6 = arith.constant 0 : index
    %c0_7 = arith.constant 0 : index
    %9 = vector.load %arg4[%c0_6, %c0_7] : memref<800x32xbf16, #tpu.memory_space<vmem>>, vector<800x32xbf16>
    tpu.vector_store %arg4[%c0_6, %c0_7], %8 {strides = array<i32>} : memref<800x32xbf16, #tpu.memory_space<vmem>>, vector<800x32xbf16>,
    return
  }
  func.func @transform_0(%arg0: i32) -> (i32, i32) {
    %c0_i32 = arith.constant 0 : i32
    %c0_i32_0 = arith.constant 0 : i32
    return %arg0, %c0_i32 : i32, i32
  }
  func.func @transform_1(%arg0: i32) -> (i32, i32) {
    %c0_i32 = arith.constant 0 : i32
    %c0_i32_0 = arith.constant 0 : i32
    %c0_i32_1 = arith.constant 0 : i32
    return %c0_i32, %c0_i32_0 : i32, i32
  }
  func.func @transform_2(%arg0: i32) -> (i32, i32) {
    %c0_i32 = arith.constant 0 : i32
    %c0_i32_0 = arith.constant 0 : i32
    %c0_i32_1 = arith.constant 0 : i32
    return %c0_i32, %c0_i32_0 : i32, i32
  }
  func.func @transform_3(%arg0: i32) -> (i32, i32) {
    %c0_i32 = arith.constant 0 : i32
    %c0_i32_0 = arith.constant 0 : i32
    return %arg0, %c0_i32 : i32, i32
  }
}

module attributes {stable_mosaic.version = 11 : i64} {
  func.func @_conv_gemm_kernel(%arg0: i32, %arg1: memref<162x512xbf16, #tpu.memory_space<vmem>>, %arg2: memref<512x64xbf16, #tpu.memory_space<vmem>>, %arg3: memref<1x64xf32, #tpu.memory_space<vmem>>, %arg4: memref<162x64xbf16, #tpu.memory_space<vmem>>) attributes {dimension_semantics = [#tpu.dimension_semantics<parallel>], iteration_bounds = array<i64: 1>, scalar_prefetch = 0 : i64, scratch_operands = 0 : i64, tpu.core_type = #tpu.core_type<tc>, window_params = [{transform_indices = @transform_0, window_bounds = array<i64: 162, 512>}, {pipeline_mode = #tpu.pipeline_mode<synchronous>, transform_indices = @transform_1, window_bounds = array<i64: 512, 64>}, {pipeline_mode = #tpu.pipeline_mode<synchronous>, transform_indices = @transform_2, window_bounds = array<i64: 1, 64>}, {transform_indices = @transform_3, window_bounds = array<i64: 162, 64>}]} {
    %c0 = arith.constant 0 : index
    %c0_0 = arith.constant 0 : index
    %0 = vector.load %arg1[%c0, %c0_0] : memref<162x512xbf16, #tpu.memory_space<vmem>>, vector<162x512xbf16>
    %c0_1 = arith.constant 0 : index
    %c0_2 = arith.constant 0 : index
    %1 = vector.load %arg2[%c0_1, %c0_2] : memref<512x64xbf16, #tpu.memory_space<vmem>>, vector<512x64xbf16>
    %cst = arith.constant dense<0.000000e+00> : vector<162x64xf32>
    %2 = tpu.matmul %0, %1, %cst {dimension_numbers = #tpu.dot_dimension_numbers<[1], [0], [0], [1], [0, 0, 1, 1], [], []>} : vector<162x512xbf16>, vector<512x64xbf16>, vector<162x64xf32> -> vector<162x64xf32>
    %c0_3 = arith.constant 0 : index
    %c0_4 = arith.constant 0 : index
    %3 = vector.load %arg3[%c0_3, %c0_4] : memref<1x64xf32, #tpu.memory_space<vmem>>, vector<1x64xf32>
    %4 = vector.broadcast %3 : vector<1x64xf32> to vector<162x64xf32>
    %5 = arith.addf %2, %4 : vector<162x64xf32>
    %cst_5 = arith.constant 0.000000e+00 : f32
    %6 = vector.broadcast %cst_5 : f32 to vector<162x64xf32>
    %7 = arith.maximumf %5, %6 : vector<162x64xf32>
    %8 = arith.truncf %7 : vector<162x64xf32> to vector<162x64xbf16>
    %c0_6 = arith.constant 0 : index
    %c0_7 = arith.constant 0 : index
    %9 = vector.load %arg4[%c0_6, %c0_7] : memref<162x64xbf16, #tpu.memory_space<vmem>>, vector<162x64xbf16>
    tpu.vector_store %arg4[%c0_6, %c0_7], %8 {strides = array<i32>} : memref<162x64xbf16, #tpu.memory_space<vmem>>, vector<162x64xbf16>,
    return
  }
  func.func @transform_0(%arg0: i32) -> (i32, i32) {
    %c0_i32 = arith.constant 0 : i32
    %c0_i32_0 = arith.constant 0 : i32
    return %arg0, %c0_i32 : i32, i32
  }
  func.func @transform_1(%arg0: i32) -> (i32, i32) {
    %c0_i32 = arith.constant 0 : i32
    %c0_i32_0 = arith.constant 0 : i32
    %c0_i32_1 = arith.constant 0 : i32
    return %c0_i32, %c0_i32_0 : i32, i32
  }
  func.func @transform_2(%arg0: i32) -> (i32, i32) {
    %c0_i32 = arith.constant 0 : i32
    %c0_i32_0 = arith.constant 0 : i32
    %c0_i32_1 = arith.constant 0 : i32
    return %c0_i32, %c0_i32_0 : i32, i32
  }
  func.func @transform_3(%arg0: i32) -> (i32, i32) {
    %c0_i32 = arith.constant 0 : i32
    %c0_i32_0 = arith.constant 0 : i32
    return %arg0, %c0_i32 : i32, i32
  }
}

module attributes {stable_mosaic.version = 11 : i64} {
  func.func @_head_kernel(%arg0: i32, %arg1: memref<49x2x576xbf16, #tpu.memory_space<vmem>>, %arg2: memref<576x64xbf16, #tpu.memory_space<vmem>>, %arg3: memref<1x64xf32, #tpu.memory_space<vmem>>, %arg4: memref<49x64x512xbf16, #tpu.memory_space<vmem>>, %arg5: memref<1x512xf32, #tpu.memory_space<vmem>>, %arg6: memref<512x128xbf16, #tpu.memory_space<vmem>>, %arg7: memref<1x128xf32, #tpu.memory_space<vmem>>, %arg8: memref<2x128xf32, #tpu.memory_space<vmem>>) attributes {dimension_semantics = [#tpu.dimension_semantics<arbitrary>], iteration_bounds = array<i64: 1>, scalar_prefetch = 0 : i64, scratch_operands = 0 : i64, tpu.core_type = #tpu.core_type<tc>, window_params = [{pipeline_mode = #tpu.pipeline_mode<synchronous>, transform_indices = @transform_0, window_bounds = array<i64: 49, 2, 576>}, {pipeline_mode = #tpu.pipeline_mode<synchronous>, transform_indices = @transform_1, window_bounds = array<i64: 576, 64>}, {pipeline_mode = #tpu.pipeline_mode<synchronous>, transform_indices = @transform_2, window_bounds = array<i64: 1, 64>}, {pipeline_mode = #tpu.pipeline_mode<synchronous>, transform_indices = @transform_3, window_bounds = array<i64: 49, 64, 512>}, {pipeline_mode = #tpu.pipeline_mode<synchronous>, transform_indices = @transform_4, window_bounds = array<i64: 1, 512>}, {pipeline_mode = #tpu.pipeline_mode<synchronous>, transform_indices = @transform_5, window_bounds = array<i64: 512, 128>}, {pipeline_mode = #tpu.pipeline_mode<synchronous>, transform_indices = @transform_6, window_bounds = array<i64: 1, 128>}, {pipeline_mode = #tpu.pipeline_mode<synchronous>, transform_indices = @transform_7, window_bounds = array<i64: 2, 128>}]} {
    %c0 = arith.constant 0 : index
    %c0_0 = arith.constant 0 : index
    %0 = vector.load %arg2[%c0, %c0_0] : memref<576x64xbf16, #tpu.memory_space<vmem>>, vector<576x64xbf16>
    %c0_1 = arith.constant 0 : index
    %c0_2 = arith.constant 0 : index
    %1 = vector.load %arg3[%c0_1, %c0_2] : memref<1x64xf32, #tpu.memory_space<vmem>>, vector<1x64xf32>
    %cst = arith.constant 0.000000e+00 : f32
    %2 = vector.broadcast %cst : f32 to vector<2x512xf32>
    %c0_i32 = arith.constant 0 : i32
    %c49_i32 = arith.constant 49 : i32
    %3 = arith.addi %c0_i32, %c49_i32 : i32
    %c1_i32 = arith.constant 1 : i32
    %4 = scf.for %arg9 = %c0_i32 to %3 step %c1_i32 iter_args(%arg10 = %2) -> (vector<2x512xf32>)  : i32 {
      %17 = arith.index_cast %arg9 : i32 to index
      %c0_14 = arith.constant 0 : index
      %c0_15 = arith.constant 0 : index
      %18 = vector.load %arg1[%17, %c0_14, %c0_15] : memref<49x2x576xbf16, #tpu.memory_space<vmem>>, vector<1x2x576xbf16>
      %19 = vector.shape_cast %18 : vector<1x2x576xbf16> to vector<2x576xbf16>
      %cst_16 = arith.constant dense<0.000000e+00> : vector<2x64xf32>
      %20 = tpu.matmul %19, %0, %cst_16 {dimension_numbers = #tpu.dot_dimension_numbers<[1], [0], [0], [1], [0, 0, 1, 1], [], []>} : vector<2x576xbf16>, vector<576x64xbf16>, vector<2x64xf32> -> vector<2x64xf32>
      %21 = vector.broadcast %1 : vector<1x64xf32> to vector<2x64xf32>
      %22 = arith.addf %20, %21 : vector<2x64xf32>
      %cst_17 = arith.constant 0.000000e+00 : f32
      %23 = vector.broadcast %cst_17 : f32 to vector<2x64xf32>
      %24 = arith.maximumf %22, %23 : vector<2x64xf32>
      %25 = arith.truncf %24 : vector<2x64xf32> to vector<2x64xbf16>
      %26 = arith.index_cast %arg9 : i32 to index
      %c0_18 = arith.constant 0 : index
      %c0_19 = arith.constant 0 : index
      %27 = vector.load %arg4[%26, %c0_18, %c0_19] : memref<49x64x512xbf16, #tpu.memory_space<vmem>>, vector<1x64x512xbf16>
      %28 = vector.shape_cast %27 : vector<1x64x512xbf16> to vector<64x512xbf16>
      %cst_20 = arith.constant dense<0.000000e+00> : vector<2x512xf32>
      %29 = tpu.matmul %25, %28, %cst_20 {dimension_numbers = #tpu.dot_dimension_numbers<[1], [0], [0], [1], [0, 0, 1, 1], [], []>} : vector<2x64xbf16>, vector<64x512xbf16>, vector<2x512xf32> -> vector<2x512xf32>
      %30 = arith.addf %arg10, %29 : vector<2x512xf32>
      scf.yield %30 : vector<2x512xf32>
    }
    %c49_i32_3 = arith.constant 49 : i32
    %c0_4 = arith.constant 0 : index
    %c0_5 = arith.constant 0 : index
    %5 = vector.load %arg5[%c0_4, %c0_5] : memref<1x512xf32, #tpu.memory_space<vmem>>, vector<1x512xf32>
    %6 = vector.broadcast %5 : vector<1x512xf32> to vector<2x512xf32>
    %7 = arith.addf %4, %6 : vector<2x512xf32>
    %cst_6 = arith.constant 0.000000e+00 : f32
    %8 = vector.broadcast %cst_6 : f32 to vector<2x512xf32>
    %9 = arith.maximumf %7, %8 : vector<2x512xf32>
    %10 = arith.truncf %9 : vector<2x512xf32> to vector<2x512xbf16>
    %c0_7 = arith.constant 0 : index
    %c0_8 = arith.constant 0 : index
    %11 = vector.load %arg6[%c0_7, %c0_8] : memref<512x128xbf16, #tpu.memory_space<vmem>>, vector<512x128xbf16>
    %cst_9 = arith.constant dense<0.000000e+00> : vector<2x128xf32>
    %12 = tpu.matmul %10, %11, %cst_9 {dimension_numbers = #tpu.dot_dimension_numbers<[1], [0], [0], [1], [0, 0, 1, 1], [], []>} : vector<2x512xbf16>, vector<512x128xbf16>, vector<2x128xf32> -> vector<2x128xf32>
    %c0_10 = arith.constant 0 : index
    %c0_11 = arith.constant 0 : index
    %13 = vector.load %arg7[%c0_10, %c0_11] : memref<1x128xf32, #tpu.memory_space<vmem>>, vector<1x128xf32>
    %14 = vector.broadcast %13 : vector<1x128xf32> to vector<2x128xf32>
    %15 = arith.addf %12, %14 : vector<2x128xf32>
    %c0_12 = arith.constant 0 : index
    %c0_13 = arith.constant 0 : index
    %16 = vector.load %arg8[%c0_12, %c0_13] : memref<2x128xf32, #tpu.memory_space<vmem>>, vector<2x128xf32>
    tpu.vector_store %arg8[%c0_12, %c0_13], %15 {strides = array<i32>} : memref<2x128xf32, #tpu.memory_space<vmem>>, vector<2x128xf32>,
    return
  }
  func.func @transform_0(%arg0: i32) -> (i32, i32, i32) {
    %c0_i32 = arith.constant 0 : i32
    %c0_i32_0 = arith.constant 0 : i32
    %c0_i32_1 = arith.constant 0 : i32
    %c0_i32_2 = arith.constant 0 : i32
    return %c0_i32, %c0_i32_0, %c0_i32_1 : i32, i32, i32
  }
  func.func @transform_1(%arg0: i32) -> (i32, i32) {
    %c0_i32 = arith.constant 0 : i32
    %c0_i32_0 = arith.constant 0 : i32
    %c0_i32_1 = arith.constant 0 : i32
    return %c0_i32, %c0_i32_0 : i32, i32
  }
  func.func @transform_2(%arg0: i32) -> (i32, i32) {
    %c0_i32 = arith.constant 0 : i32
    %c0_i32_0 = arith.constant 0 : i32
    %c0_i32_1 = arith.constant 0 : i32
    return %c0_i32, %c0_i32_0 : i32, i32
  }
  func.func @transform_3(%arg0: i32) -> (i32, i32, i32) {
    %c0_i32 = arith.constant 0 : i32
    %c0_i32_0 = arith.constant 0 : i32
    %c0_i32_1 = arith.constant 0 : i32
    %c0_i32_2 = arith.constant 0 : i32
    return %c0_i32, %c0_i32_0, %c0_i32_1 : i32, i32, i32
  }
  func.func @transform_4(%arg0: i32) -> (i32, i32) {
    %c0_i32 = arith.constant 0 : i32
    %c0_i32_0 = arith.constant 0 : i32
    %c0_i32_1 = arith.constant 0 : i32
    return %c0_i32, %c0_i32_0 : i32, i32
  }
  func.func @transform_5(%arg0: i32) -> (i32, i32) {
    %c0_i32 = arith.constant 0 : i32
    %c0_i32_0 = arith.constant 0 : i32
    %c0_i32_1 = arith.constant 0 : i32
    return %c0_i32, %c0_i32_0 : i32, i32
  }
  func.func @transform_6(%arg0: i32) -> (i32, i32) {
    %c0_i32 = arith.constant 0 : i32
    %c0_i32_0 = arith.constant 0 : i32
    %c0_i32_1 = arith.constant 0 : i32
    return %c0_i32, %c0_i32_0 : i32, i32
  }
  func.func @transform_7(%arg0: i32) -> (i32, i32) {
    %c0_i32 = arith.constant 0 : i32
    %c0_i32_0 = arith.constant 0 : i32
    %c0_i32_1 = arith.constant 0 : i32
    return %c0_i32, %c0_i32_0 : i32, i32
  }
}

</mosaic_0001>

<bundles_post_ra>
// kernel: mario_forward.3
= control target key start
LH: loop header
LB: loop body
LE: loop exit
PB: predicated region body
PF: predicated region fallthrough
CT: control target
= control target key end

     0   :  { %v2303_v0 = vmov 0   ;;  %vm1683_vm0 = vcmask 257024   ;;  %s3220_s1 = inlined_call_operand.vmem [shape: bf16[256,32], index: 1, kind: input, shape index: {}]   ;;  %s3221_s0 = inlined_call_operand.vmem [shape: bf16[800,256], index: 0, kind: input, shape index: {}]   ;;  %s3222_s2 = inlined_call_operand.vmem [shape: f32[1,32], index: 2, kind: input, shape index: {}]   ;;  %s3223_s3 = inlined_call_operand.vmem [shape: bf16[800,32], index: 3, kind: output, shape index: {}]  }
   0x1   :  { %750 = vmatprep.subr.bf16.mxu0 %v2303_v0  ;;  %2105 = vmatprep.subr.bf16.mxu1 %v2303_v0  ;;  %v2138_v1 = vld [vmem:[%s3220_s1 + $0x38] sm:$0xff]   ;;  %v2139_v2 = vld [vmem:[%s3220_s1 + $0x30] sm:$0xff]   ;;  %v2140_v3 = vld [vmem:[%s3220_s1 + $0x28] sm:$0xff]  }
   0x2   :  { %751 = vmatpush1.bf16.msra.mxu0 %v2138_v1  ;;  %2121 = vmatpush1.bf16.msra.mxu1 %v2138_v1  ;;  %v2141_v4 = vld [vmem:[%s3220_s1 + $0x20] sm:$0xff]   ;;  %v2142_v5 = vld [vmem:[%s3220_s1 + $0x18] sm:$0xff]   ;;  %v2143_v7 = vld [vmem:[%s3220_s1 + $0x10] sm:$0xff]  }
   0x3   :  { %752 = vmatprep.subr.bf16.mxu0 %v2303_v0  ;;  %2106 = vmatprep.subr.bf16.mxu1 %v2303_v0  ;;  %v2156_v6 = vld [vmem:[%s3221_s0 + $0x4] ss:$8 sps:$4 sm:$0xff]   ;;  %v2159_v8 = vld [vmem:[%s3221_s0 + $0x194] ss:$8 sps:$4 sm:$0xff]   ;;  %v2154_v19 = vld [vmem:[%s3221_s0] ss:$8 sps:$4 sm:$0xff]  }
   0x4   :  { %782 = vmatprep.mubr.bf16.mxu0 %v2156_v6  ;;  %982 = vmatprep.mubr.bf16.mxu1 %v2159_v8  ;;  %v2144_v9 = vld [vmem:[%s3220_s1 + $0x8] sm:$0xff]   ;;  %v2145_v10 = vld [vmem:[%s3220_s1] sm:$0xff]   ;;  %v2146_v11 = vld [vmem:[%s3220_s1 + $0x78] sm:$0xff]  }
   0x5   :  { %v2147_v12 = vld [vmem:[%s3220_s1 + $0x70] sm:$0xff]   ;;  %v2148_v13 = vld [vmem:[%s3220_s1 + $0x68] sm:$0xff]   ;;  %v2149_v14 = vld [vmem:[%s3220_s1 + $0x60] sm:$0xff]  }
   0x6   :  { %753 = vmatpush1.bf16.msra.mxu0 %v2139_v2  ;;  %2122 = vmatpush1.bf16.msra.mxu1 %v2139_v2  ;;  %v2150_v15 = vld [vmem:[%s3220_s1 + $0x58] sm:$0xff]   ;;  %v2151_v16 = vld [vmem:[%s3220_s1 + $0x50] sm:$0xff]   ;;  %v2152_v17 = vld [vmem:[%s3220_s1 + $0x48] sm:$0xff]  }
   0x7   :  { %754 = vmatprep.subr.bf16.mxu0 %v2303_v0  ;;  %2107 = vmatprep.subr.bf16.mxu1 %v2303_v0  ;;  %v2153_v18 = vld [vmem:[%s3220_s1 + $0x40] sm:$0xff]   ;;  %v2157_v20 = vld [vmem:[%s3221_s0 + $0x190] ss:$8 sps:$4 sm:$0xff]   ;;  %v2160_v21 = vld [vmem:[%s3221_s0 + $0x14] ss:$8 sps:$4 sm:$0xff]  }
   0x8   :  { %v2162_v22 = vld [vmem:[%s3221_s0 + $0x1a4] ss:$8 sps:$4 sm:$0xff]   ;;  %v2164_v23 = vld [vmem:[%s3221_s0 + $0x10] ss:$8 sps:$4 sm:$0xff]   ;;  %v2165_v24 = vld [vmem:[%s3221_s0 + $0x1a0] ss:$8 sps:$4 sm:$0xff]  }
   0x9   :  { %v2166_v25 = vld [vmem:[%s3221_s0 + $0x24] ss:$8 sps:$4 sm:$0xff]   ;;  %v2168_v26 = vld [vmem:[%s3221_s0 + $0x1b4] ss:$8 sps:$4 sm:$0xff]   ;;  %v2170_v27 = vld [vmem:[%s3221_s0 + $0x20] ss:$8 sps:$4 sm:$0xff]  }
   0xa   :  { %755 = vmatpush1.bf16.msra.mxu0 %v2140_v3  ;;  %2123 = vmatpush1.bf16.msra.mxu1 %v2140_v3  ;;  %v2171_v28 = vld [vmem:[%s3221_s0 + $0x1b0] ss:$8 sps:$4 sm:$0xff]   ;;  %v2172_v29 = vld [vmem:[%s3221_s0 + $0x34] ss:$8 sps:$4 sm:$0xff]   ;;  %v2174_v30 = vld [vmem:[%s3221_s0 + $0x1c4] ss:$8 sps:$4 sm:$0xff]  }
   0xb   :  { %756 = vmatprep.subr.bf16.mxu0 %v2303_v0  ;;  %2108 = vmatprep.subr.bf16.mxu1 %v2303_v0  ;;  %v2176_v31 = vld [vmem:[%s3221_s0 + $0x30] ss:$8 sps:$4 sm:$0xff]   ;;  %v2177_v32 = vld [vmem:[%s3221_s0 + $0x1c0] ss:$8 sps:$4 sm:$0xff]   ;;  %v2178_v33 = vld [vmem:[%s3221_s0 + $0x44] ss:$8 sps:$4 sm:$0xff]  }
   0xc   :  { %v2180_v34 = vld [vmem:[%s3221_s0 + $0x1d4] ss:$8 sps:$4 sm:$0xff]   ;;  %v2182_v35 = vld [vmem:[%s3221_s0 + $0x40] ss:$8 sps:$4 sm:$0xff]   ;;  %v2183_v36 = vld [vmem:[%s3221_s0 + $0x1d0] ss:$8 sps:$4 sm:$0xff]  }
   0xd   :  { %v2184_v37 = vld [vmem:[%s3221_s0 + $0x54] ss:$8 sps:$4 sm:$0xff]   ;;  %v2186_v38 = vld [vmem:[%s3221_s0 + $0x1e4] ss:$8 sps:$4 sm:$0xff]   ;;  %v2188_v39 = vld [vmem:[%s3221_s0 + $0x50] ss:$8 sps:$4 sm:$0xff]  }
   0xe   :  { %757 = vmatpush1.bf16.msra.mxu0 %v2141_v4  ;;  %2124 = vmatpush1.bf16.msra.mxu1 %v2141_v4  ;;  %v2189_v40 = vld [vmem:[%s3221_s0 + $0x1e0] ss:$8 sps:$4 sm:$0xff]   ;;  %v2190_v41 = vld [vmem:[%s3221_s0 + $0x64] ss:$8 sps:$4 sm:$0xff]   ;;  %v2192_v42 = vld [vmem:[%s3221_s0 + $0x1f4] ss:$8 sps:$4 sm:$0xff]  }
   0xf   :  { %758 = vmatprep.subr.bf16.mxu0 %v2303_v0  ;;  %2109 = vmatprep.subr.bf16.mxu1 %v2303_v0  ;;  %v2194_v43 = vld [vmem:[%s3221_s0 + $0x60] ss:$8 sps:$4 sm:$0xff]   ;;  %v2195_v44 = vld [vmem:[%s3221_s0 + $0x1f0] ss:$8 sps:$4 sm:$0xff]   ;;  %v2196_v45 = vld [vmem:[%s3221_s0 + $0x74] ss:$8 sps:$4 sm:$0xff]  }
  0x10   :  { %v2198_v46 = vld [vmem:[%s3221_s0 + $0x204] ss:$8 sps:$4 sm:$0xff]   ;;  %v2200_v47 = vld [vmem:[%s3221_s0 + $0x70] ss:$8 sps:$4 sm:$0xff]   ;;  %v2201_v48 = vld [vmem:[%s3221_s0 + $0x200] ss:$8 sps:$4 sm:$0xff]  }
  0x11   :  { %v2202_v49 = vld [vmem:[%s3221_s0 + $0x84] ss:$8 sps:$4 sm:$0xff]   ;;  %v2204_v50 = vld [vmem:[%s3221_s0 + $0x214] ss:$8 sps:$4 sm:$0xff]   ;;  %v2206_v51 = vld [vmem:[%s3221_s0 + $0x80] ss:$8 sps:$4 sm:$0xff]  }
  0x12   :  { %759 = vmatpush1.bf16.msra.mxu0 %v2142_v5  ;;  %2125 = vmatpush1.bf16.msra.mxu1 %v2142_v5  ;;  %v2207_v52 = vld [vmem:[%s3221_s0 + $0x210] ss:$8 sps:$4 sm:$0xff]   ;;  %v2208_v53 = vld [vmem:[%s3221_s0 + $0x94] ss:$8 sps:$4 sm:$0xff]   ;;  %v2210_v54 = vld [vmem:[%s3221_s0 + $0x224] ss:$8 sps:$4 sm:$0xff]  }
  0x13   :  { %760 = vmatprep.subr.bf16.mxu0 %v2303_v0  ;;  %2110 = vmatprep.subr.bf16.mxu1 %v2303_v0  ;;  %v2212_v55 = vld [vmem:[%s3221_s0 + $0x90] ss:$8 sps:$4 sm:$0xff]   ;;  %v2213_v56 = vld [vmem:[%s3221_s0 + $0x220] ss:$8 sps:$4 sm:$0xff]   ;;  %v2214_v57 = vld [vmem:[%s3221_s0 + $0xa4] ss:$8 sps:$4 sm:$0xff]  }
  0x14   :  { %v2216_v58 = vld [vmem:[%s3221_s0 + $0x234] ss:$8 sps:$4 sm:$0xff]   ;;  %v2218_v59 = vld [vmem:[%s3221_s0 + $0xa0] ss:$8 sps:$4 sm:$0xff]   ;;  %v2219_v60 = vld [vmem:[%s3221_s0 + $0x230] ss:$8 sps:$4 sm:$0xff]  }
  0x15   :  { %v2220_v61 = vld [vmem:[%s3221_s0 + $0xb4] ss:$8 sps:$4 sm:$0xff]   ;;  %v2222_v62 = vld [vmem:[%s3221_s0 + $0x244] ss:$8 sps:$4 sm:$0xff]   ;;  %v2224_v63 = vld [vmem:[%s3221_s0 + $0xb0] ss:$8 sps:$4 sm:$0xff]  }
  0x16   :  { %761 = vmatpush1.bf16.msra.mxu0 %v2143_v7  ;;  %2126 = vmatpush1.bf16.msra.mxu1 %v2143_v7  ;;  %v2226_v1 = vld [vmem:[%s3221_s0 + $0xc4] ss:$8 sps:$4 sm:$0xff]   ;;  %v2228_v2 = vld [vmem:[%s3221_s0 + $0x254] ss:$8 sps:$4 sm:$0xff]   ;;  %v2230_v3 = vld [vmem:[%s3221_s0 + $0xc0] ss:$8 sps:$4 sm:$0xff]  }
  0x17   :  { %762 = vmatprep.subr.bf16.mxu0 %v2303_v0  ;;  %2111 = vmatprep.subr.bf16.mxu1 %v2303_v0  ;;  %v2231_v4 = vld [vmem:[%s3221_s0 + $0x250] ss:$8 sps:$4 sm:$0xff]   ;;  %v2232_v5 = vld [vmem:[%s3221_s0 + $0xd4] ss:$8 sps:$4 sm:$0xff]   ;;  %v2234_v6 = vld [vmem:[%s3221_s0 + $0x264] ss:$8 sps:$4 sm:$0xff]  }
  0x18   :  { %v2236_v7 = vld [vmem:[%s3221_s0 + $0xd0] ss:$8 sps:$4 sm:$0xff]   ;;  %v2237_v8 = vld [vmem:[%s3221_s0 + $0x260] ss:$8 sps:$4 sm:$0xff]  }
  0x1a   :  { %763 = vmatpush1.bf16.msra.mxu0 %v2144_v9  ;;  %2127 = vmatpush1.bf16.msra.mxu1 %v2144_v9  ;;  %v2238_v9 = vld [vmem:[%s3221_s0 + $0xe4] ss:$8 sps:$4 sm:$0xff]  }
  0x1b   :  { %764 = vmatprep.subr.bf16.mxu0 %v2303_v0  ;;  %2112 = vmatprep.subr.bf16.mxu1 %v2303_v0 }
  0x1e   :  { %765 = vmatpush1.bf16.msra.mxu0 %v2145_v10  ;;  %2128 = vmatpush1.bf16.msra.mxu1 %v2145_v10  ;;  %v2240_v10 = vld [vmem:[%s3221_s0 + $0x274] ss:$8 sps:$4 sm:$0xff]  }
  0x1f   :  { %766 = vmatprep.subr.bf16.mxu0 %v2303_v0  ;;  %2113 = vmatprep.subr.bf16.mxu1 %v2303_v0 }
  0x22   :  { %767 = vmatpush2.bf16.msra.mxu0 %v2146_v11  ;;  %2129 = vmatpush2.bf16.msra.mxu1 %v2146_v11  ;;  %v2242_v11 = vld [vmem:[%s3221_s0 + $0xe0] ss:$8 sps:$4 sm:$0xff]  }
  0x23   :  { %768 = vmatprep.subr.bf16.mxu0 %v2303_v0  ;;  %2114 = vmatprep.subr.bf16.mxu1 %v2303_v0 }
  0x26   :  { %769 = vmatpush2.bf16.msra.mxu0 %v2147_v12  ;;  %2130 = vmatpush2.bf16.msra.mxu1 %v2147_v12  ;;  %v2243_v12 = vld [vmem:[%s3221_s0 + $0x270] ss:$8 sps:$4 sm:$0xff]  }
  0x27   :  { %770 = vmatprep.subr.bf16.mxu0 %v2303_v0  ;;  %2115 = vmatprep.subr.bf16.mxu1 %v2303_v0 }
  0x2a   :  { %771 = vmatpush2.bf16.msra.mxu0 %v2148_v13  ;;  %2131 = vmatpush2.bf16.msra.mxu1 %v2148_v13  ;;  %v2244_v13 = vld [vmem:[%s3221_s0 + $0xf4] ss:$8 sps:$4 sm:$0xff]  }
  0x2b   :  { %772 = vmatprep.subr.bf16.mxu0 %v2303_v0  ;;  %2116 = vmatprep.subr.bf16.mxu1 %v2303_v0 }
  0x2e   :  { %773 = vmatpush2.bf16.msra.mxu0 %v2149_v14  ;;  %2132 = vmatpush2.bf16.msra.mxu1 %v2149_v14  ;;  %v2246_v14 = vld [vmem:[%s3221_s0 + $0x284] ss:$8 sps:$4 sm:$0xff]  }
  0x2f   :  { %774 = vmatprep.subr.bf16.mxu0 %v2303_v0  ;;  %2117 = vmatprep.subr.bf16.mxu1 %v2303_v0 }
  0x32   :  { %775 = vmatpush2.bf16.msra.mxu0 %v2150_v15  ;;  %2133 = vmatpush2.bf16.msra.mxu1 %v2150_v15  ;;  %v2248_v15 = vld [vmem:[%s3221_s0 + $0xf0] ss:$8 sps:$4 sm:$0xff]  }
  0x33   :  { %776 = vmatprep.subr.bf16.mxu0 %v2303_v0  ;;  %2118 = vmatprep.subr.bf16.mxu1 %v2303_v0 }
  0x36   :  { %777 = vmatpush2.bf16.msra.mxu0 %v2151_v16  ;;  %2134 = vmatpush2.bf16.msra.mxu1 %v2151_v16  ;;  %v2249_v16 = vld [vmem:[%s3221_s0 + $0x280] ss:$8 sps:$4 sm:$0xff]  }
  0x37   :  { %778 = vmatprep.subr.bf16.mxu0 %v2303_v0  ;;  %2119 = vmatprep.subr.bf16.mxu1 %v2303_v0 }
  0x3a   :  { %779 = vmatpush2.bf16.msra.mxu0 %v2152_v17  ;;  %2135 = vmatpush2.bf16.msra.mxu1 %v2152_v17  ;;  %v2250_v17 = vld [vmem:[%s3221_s0 + $0x104] ss:$8 sps:$4 sm:$0xff]  }
  0x3b   :  { %780 = vmatprep.subr.bf16.mxu0 %v2303_v0  ;;  %2120 = vmatprep.subr.bf16.mxu1 %v2303_v0  ;;  %v2225_v0 = vld [vmem:[%s3221_s0 + $0x240] ss:$8 sps:$4 sm:$0xff]  }
  0x3e   :  { %781 = vmatpush2.bf16.msra.mxu0 %v2153_v18  ;;  %2136 = vmatpush2.bf16.msra.mxu1 %v2153_v18  ;;  %v2252_v18 = vld [vmem:[%s3221_s0 + $0x294] ss:$8 sps:$4 sm:$0xff]  }
  0x41   :  { %783 = vmatmul.mubr.bf16.vlgmr.msra.gmra.mxu0 %v2154_v19  ;;  %983 = vmatmul.mubr.bf16.vlgmr.msra.gmra.mxu1 %v2157_v20  ;;  %v2254_v19 = vld [vmem:[%s3221_s0 + $0x100] ss:$8 sps:$4 sm:$0xff]   ;;  %v2255_v20 = vld [vmem:[%s3221_s0 + $0x290] ss:$8 sps:$4 sm:$0xff]  }
  0x42   :  { %790 = vmatprep.mubr.bf16.mxu0 %v2160_v21  ;;  %990 = vmatprep.mubr.bf16.mxu1 %v2162_v22  ;;  %v2256_v21 = vld [vmem:[%s3221_s0 + $0x114] ss:$8 sps:$4 sm:$0xff]   ;;  %v2258_v22 = vld [vmem:[%s3221_s0 + $0x2a4] ss:$8 sps:$4 sm:$0xff]  }
  0x49   :  { %791 = vmatmul.mubr.bf16.gmra.mxu0 %v2164_v23  ;;  %991 = vmatmul.mubr.bf16.gmra.mxu1 %v2165_v24  ;;  %v2260_v23 = vld [vmem:[%s3221_s0 + $0x110] ss:$8 sps:$4 sm:$0xff]   ;;  %v2261_v24 = vld [vmem:[%s3221_s0 + $0x2a0] ss:$8 sps:$4 sm:$0xff]  }
  0x4a   :  { %798 = vmatprep.mubr.bf16.mxu0 %v2166_v25  ;;  %998 = vmatprep.mubr.bf16.mxu1 %v2168_v26  ;;  %v2262_v25 = vld [vmem:[%s3221_s0 + $0x124] ss:$8 sps:$4 sm:$0xff]   ;;  %v2264_v26 = vld [vmem:[%s3221_s0 + $0x2b4] ss:$8 sps:$4 sm:$0xff]  }
  0x51   :  { %799 = vmatmul.mubr.bf16.gmra.mxu0 %v2170_v27  ;;  %999 = vmatmul.mubr.bf16.gmra.mxu1 %v2171_v28  ;;  %v2266_v27 = vld [vmem:[%s3221_s0 + $0x120] ss:$8 sps:$4 sm:$0xff]   ;;  %v2267_v28 = vld [vmem:[%s3221_s0 + $0x2b0] ss:$8 sps:$4 sm:$0xff]  }
  0x52   :  { %806 = vmatprep.mubr.bf16.mxu0 %v2172_v29  ;;  %1006 = vmatprep.mubr.bf16.mxu1 %v2174_v30  ;;  %v2268_v29 = vld [vmem:[%s3221_s0 + $0x134] ss:$8 sps:$4 sm:$0xff]   ;;  %v2270_v30 = vld [vmem:[%s3221_s0 + $0x2c4] ss:$8 sps:$4 sm:$0xff]  }
  0x59   :  { %807 = vmatmul.mubr.bf16.gmra.mxu0 %v2176_v31  ;;  %1007 = vmatmul.mubr.bf16.gmra.mxu1 %v2177_v32  ;;  %v2272_v31 = vld [vmem:[%s3221_s0 + $0x130] ss:$8 sps:$4 sm:$0xff]   ;;  %v2273_v32 = vld [vmem:[%s3221_s0 + $0x2c0] ss:$8 sps:$4 sm:$0xff]  }
  0x5a   :  { %814 = vmatprep.mubr.bf16.mxu0 %v2178_v33  ;;  %1014 = vmatprep.mubr.bf16.mxu1 %v2180_v34  ;;  %v2274_v33 = vld [vmem:[%s3221_s0 + $0x144] ss:$8 sps:$4 sm:$0xff]   ;;  %v2276_v34 = vld [vmem:[%s3221_s0 + $0x2d4] ss:$8 sps:$4 sm:$0xff]  }
  0x61   :  { %815 = vmatmul.mubr.bf16.gmra.mxu0 %v2182_v35  ;;  %1015 = vmatmul.mubr.bf16.gmra.mxu1 %v2183_v36  ;;  %v2278_v35 = vld [vmem:[%s3221_s0 + $0x140] ss:$8 sps:$4 sm:$0xff]   ;;  %v2279_v36 = vld [vmem:[%s3221_s0 + $0x2d0] ss:$8 sps:$4 sm:$0xff]  }
  0x62   :  { %822 = vmatprep.mubr.bf16.mxu0 %v2184_v37  ;;  %1022 = vmatprep.mubr.bf16.mxu1 %v2186_v38  ;;  %v2280_v37 = vld [vmem:[%s3221_s0 + $0x154] ss:$8 sps:$4 sm:$0xff]   ;;  %v2282_v38 = vld [vmem:[%s3221_s0 + $0x2e4] ss:$8 sps:$4 sm:$0xff]  }
  0x69   :  { %823 = vmatmul.mubr.bf16.gmra.mxu0 %v2188_v39  ;;  %1023 = vmatmul.mubr.bf16.gmra.mxu1 %v2189_v40  ;;  %v2284_v39 = vld [vmem:[%s3221_s0 + $0x150] ss:$8 sps:$4 sm:$0xff]   ;;  %v2285_v40 = vld [vmem:[%s3221_s0 + $0x2e0] ss:$8 sps:$4 sm:$0xff]  }
  0x6a   :  { %830 = vmatprep.mubr.bf16.mxu0 %v2190_v41  ;;  %1030 = vmatprep.mubr.bf16.mxu1 %v2192_v42  ;;  %v2286_v41 = vld [vmem:[%s3221_s0 + $0x164] ss:$8 sps:$4 sm:$0xff]   ;;  %v2288_v42 = vld [vmem:[%s3221_s0 + $0x2f4] ss:$8 sps:$4 sm:$0xff]  }
  0x71   :  { %831 = vmatmul.mubr.bf16.gmra.mxu0 %v2194_v43  ;;  %1031 = vmatmul.mubr.bf16.gmra.mxu1 %v2195_v44  ;;  %v2290_v43 = vld [vmem:[%s3221_s0 + $0x160] ss:$8 sps:$4 sm:$0xff]   ;;  %v2291_v44 = vld [vmem:[%s3221_s0 + $0x2f0] ss:$8 sps:$4 sm:$0xff]  }
  0x72   :  { %838 = vmatprep.mubr.bf16.mxu0 %v2196_v45  ;;  %1038 = vmatprep.mubr.bf16.mxu1 %v2198_v46  ;;  %v2292_v45 = vld [vmem:[%s3221_s0 + $0x174] ss:$8 sps:$4 sm:$0xff]   ;;  %v2294_v46 = vld [vmem:[%s3221_s0 + $0x304] ss:$8 sps:$4 sm:$0xff]  }
  0x79   :  { %839 = vmatmul.mubr.bf16.gmra.mxu0 %v2200_v47  ;;  %1039 = vmatmul.mubr.bf16.gmra.mxu1 %v2201_v48  ;;  %v2296_v47 = vld [vmem:[%s3221_s0 + $0x170] ss:$8 sps:$4 sm:$0xff]   ;;  %v2297_v48 = vld [vmem:[%s3221_s0 + $0x300] ss:$8 sps:$4 sm:$0xff]  }
  0x7a   :  { %846 = vmatprep.mubr.bf16.mxu0 %v2202_v49  ;;  %1046 = vmatprep.mubr.bf16.mxu1 %v2204_v50  ;;  %v2298_v49 = vld [vmem:[%s3221_s0 + $0x184] ss:$8 sps:$4 sm:$0xff]   ;;  %v2300_v50 = vld [vmem:[%s3221_s0 + $0x314] ss:$8 sps:$4 sm:$0xff]  }
  0x81   :  { %847 = vmatmul.mubr.bf16.gmra.mxu0 %v2206_v51  ;;  %1047 = vmatmul.mubr.bf16.gmra.mxu1 %v2207_v52  ;;  %v63_v51 = vld [vmem:[%s3221_s0 + $0x180] sm:$0xff]  ;;  %v64_v52 = vld [vmem:[%s3221_s0 + $0x188] sm:$0xff] }
  0x82   :  { %854 = vmatprep.mubr.bf16.mxu0 %v2208_v53  ;;  %1054 = vmatprep.mubr.bf16.mxu1 %v2210_v54  ;;  %v113_v53 = vld [vmem:[%s3221_s0 + $0x310] sm:$0xff]  ;;  %v114_v54 = vld [vmem:[%s3221_s0 + $0x318] sm:$0xff] }
  0x89   :  { %855 = vmatmul.mubr.bf16.gmra.mxu0 %v2212_v55  ;;  %1055 = vmatmul.mubr.bf16.gmra.mxu1 %v2213_v56  ;;  %v1837_v55 = vcombine.low %v63_v51, %v64_v52  ;;  %v1887_v56 = vcombine.low %v113_v53, %v114_v54 }
  0x8a   :  { %862 = vmatprep.mubr.bf16.mxu0 %v2214_v57  ;;  %1062 = vmatprep.mubr.bf16.mxu1 %v2216_v58  ;;  %v2713_v57 = vld [vmem:[%s3222_s2] ss:$0 sm:$0xff] }
  0x91   :  { %863 = vmatmul.mubr.bf16.gmra.mxu0 %v2218_v59  ;;  %1063 = vmatmul.mubr.bf16.gmra.mxu1 %v2219_v60 }
  0x92   :  { %870 = vmatprep.mubr.bf16.mxu0 %v2220_v61  ;;  %1070 = vmatprep.mubr.bf16.mxu1 %v2222_v62 }
  0x99   :  { %871 = vmatmul.mubr.bf16.gmra.mxu0 %v2224_v63  ;;  %1071 = vmatmul.mubr.bf16.gmra.mxu1 %v2225_v0 }
  0x9a   :  { %878 = vmatprep.mubr.bf16.mxu0 %v2226_v1  ;;  %1078 = vmatprep.mubr.bf16.mxu1 %v2228_v2 }
  0xa1   :  { %879 = vmatmul.mubr.bf16.gmra.mxu0 %v2230_v3  ;;  %1079 = vmatmul.mubr.bf16.gmra.mxu1 %v2231_v4 }
  0xa2   :  { %886 = vmatprep.mubr.bf16.mxu0 %v2232_v5  ;;  %1086 = vmatprep.mubr.bf16.mxu1 %v2234_v6 }
  0xa9   :  { %887 = vmatmul.mubr.bf16.gmra.mxu0 %v2236_v7  ;;  %1087 = vmatmul.mubr.bf16.gmra.mxu1 %v2237_v8 }
  0xaa   :  { %894 = vmatprep.mubr.bf16.mxu0 %v2238_v9  ;;  %1094 = vmatprep.mubr.bf16.mxu1 %v2240_v10 }
  0xb1   :  { %895 = vmatmul.mubr.bf16.gmra.mxu0 %v2242_v11  ;;  %1095 = vmatmul.mubr.bf16.gmra.mxu1 %v2243_v12 }
  0xb2   :  { %902 = vmatprep.mubr.bf16.mxu0 %v2244_v13  ;;  %1102 = vmatprep.mubr.bf16.mxu1 %v2246_v14 }
  0xb9   :  { %903 = vmatmul.mubr.bf16.gmra.mxu0 %v2248_v15  ;;  %1103 = vmatmul.mubr.bf16.gmra.mxu1 %v2249_v16 }
  0xba   :  { %910 = vmatprep.mubr.bf16.mxu0 %v2250_v17  ;;  %1110 = vmatprep.mubr.bf16.mxu1 %v2252_v18 }
  0xc1   :  { %911 = vmatmul.mubr.bf16.gmra.mxu0 %v2254_v19  ;;  %1111 = vmatmul.mubr.bf16.gmra.mxu1 %v2255_v20 }
  0xc2   :  { %918 = vmatprep.mubr.bf16.mxu0 %v2256_v21  ;;  %1118 = vmatprep.mubr.bf16.mxu1 %v2258_v22 }
  0xc9   :  { %919 = vmatmul.mubr.bf16.gmra.mxu0 %v2260_v23  ;;  %1119 = vmatmul.mubr.bf16.gmra.mxu1 %v2261_v24 }
  0xca   :  { %926 = vmatprep.mubr.bf16.mxu0 %v2262_v25  ;;  %1126 = vmatprep.mubr.bf16.mxu1 %v2264_v26 }
  0xd1   :  { %927 = vmatmul.mubr.bf16.gmra.mxu0 %v2266_v27  ;;  %1127 = vmatmul.mubr.bf16.gmra.mxu1 %v2267_v28 }
  0xd2   :  { %934 = vmatprep.mubr.bf16.mxu0 %v2268_v29  ;;  %1134 = vmatprep.mubr.bf16.mxu1 %v2270_v30 }
  0xd9   :  { %935 = vmatmul.mubr.bf16.gmra.mxu0 %v2272_v31  ;;  %1135 = vmatmul.mubr.bf16.gmra.mxu1 %v2273_v32 }
  0xda   :  { %942 = vmatprep.mubr.bf16.mxu0 %v2274_v33  ;;  %1142 = vmatprep.mubr.bf16.mxu1 %v2276_v34 }
  0xe1   :  { %943 = vmatmul.mubr.bf16.gmra.mxu0 %v2278_v35  ;;  %1143 = vmatmul.mubr.bf16.gmra.mxu1 %v2279_v36 }
  0xe2   :  { %950 = vmatprep.mubr.bf16.mxu0 %v2280_v37  ;;  %1150 = vmatprep.mubr.bf16.mxu1 %v2282_v38 }
  0xe9   :  { %951 = vmatmul.mubr.bf16.gmra.mxu0 %v2284_v39  ;;  %1151 = vmatmul.mubr.bf16.gmra.mxu1 %v2285_v40 }
  0xea   :  { %958 = vmatprep.mubr.bf16.mxu0 %v2286_v41  ;;  %1158 = vmatprep.mubr.bf16.mxu1 %v2288_v42 }
  0xf1   :  { %959 = vmatmul.mubr.bf16.gmra.mxu0 %v2290_v43  ;;  %1159 = vmatmul.mubr.bf16.gmra.mxu1 %v2291_v44 }
  0xf2   :  { %966 = vmatprep.mubr.bf16.mxu0 %v2292_v45  ;;  %1166 = vmatprep.mubr.bf16.mxu1 %v2294_v46 }
  0xf9   :  { %967 = vmatmul.mubr.bf16.gmra.mxu0 %v2296_v47  ;;  %1167 = vmatmul.mubr.bf16.gmra.mxu1 %v2297_v48 }
  0xfa   :  { %974 = vmatprep.mubr.bf16.mxu0 %v2298_v49  ;;  %1174 = vmatprep.mubr.bf16.mxu1 %v2300_v50 }
 0x101   :  { %v784_v58 = vpop.f32.mrf.mxu0  ;;  %975 = vmatmul.mubr.bf16.gmra.mxu0 %v1837_v55  ;;  %v984_v59 = vpop.f32.mrf.mxu1  ;;  %1175 = vmatmul.mubr.bf16.gmra.mxu1 %v1887_v56 }
 0x102   :  { %v785_v60 = vadd.f32 %v2713_v57, %v784_v58  ;;  %v985_v61 = vadd.f32 %v2713_v57, %v984_v59 }
 0x103   :  { %v786_v62 = vpop.f32.mrf.mxu0  ;;  %v986_v63 = vpop.f32.mrf.mxu1 }
 0x104   :  { %v1183_v0 = vmax.f32 %v785_v60, 0.0  ;;  %v1233_v1 = vmax.f32 %v985_v61, 0.0 }
 0x105   :  { %v787_v2 = vpop.f32.mrf.mxu0  ;;  %v987_v3 = vpop.f32.mrf.mxu1 }
 0x106   :  { %v2005_v4 = vpack.c.bf16 %v1183_v0, %v1183_v0  ;;  %v2055_v5 = vpack.c.bf16 %v1233_v1, %v1233_v1  ;;  %v788_v6 = vadd.f32 %v2713_v57, %v787_v2  ;;  %v988_v7 = vadd.f32 %v2713_v57, %v987_v3 }
 0x107   :  { %v789_v8 = vpop.f32.mrf.mxu0  ;;  %v989_v9 = vpop.f32.mrf.mxu1 }
 0x108   :  { %1684 = vst.msk [vmem:[%s3223_s3] sm:$0xf] %vm1683_vm0, %v2005_v4  ;;  %1734 = vst.msk [vmem:[%s3223_s3 + $0xc8] sm:$0xf] %vm1683_vm0, %v2055_v5  ;;  %v1184_v10 = vmax.f32 %v788_v6, 0.0  ;;  %v1234_v11 = vmax.f32 %v988_v7, 0.0 }
 0x109   :  { %v792_v12 = vpop.f32.mrf.mxu0  ;;  %v992_v13 = vpop.f32.mrf.mxu1 }
 0x10a   :  { %v2006_v14 = vpack.c.bf16 %v1184_v10, %v1184_v10  ;;  %v2056_v15 = vpack.c.bf16 %v1234_v11, %v1234_v11  ;;  %v793_v16 = vadd.f32 %v2713_v57, %v792_v12  ;;  %v993_v17 = vadd.f32 %v2713_v57, %v992_v13 }
 0x10b   :  { %v794_v18 = vpop.f32.mrf.mxu0  ;;  %v994_v19 = vpop.f32.mrf.mxu1 }
 0x10c   :  { %1685 = vst.msk [vmem:[%s3223_s3 + $0x4] sm:$0xf] %vm1683_vm0, %v2006_v14  ;;  %1735 = vst.msk [vmem:[%s3223_s3 + $0xcc] sm:$0xf] %vm1683_vm0, %v2056_v15  ;;  %v1185_v20 = vmax.f32 %v793_v16, 0.0  ;;  %v1235_v21 = vmax.f32 %v993_v17, 0.0 }
 0x10d   :  { %v795_v22 = vpop.f32.mrf.mxu0  ;;  %v995_v23 = vpop.f32.mrf.mxu1 }
 0x10e   :  { %v2007_v24 = vpack.c.bf16 %v1185_v20, %v1185_v20  ;;  %v2057_v25 = vpack.c.bf16 %v1235_v21, %v1235_v21  ;;  %v796_v26 = vadd.f32 %v2713_v57, %v795_v22  ;;  %v996_v27 = vadd.f32 %v2713_v57, %v995_v23 }
 0x10f   :  { %v797_v28 = vpop.f32.mrf.mxu0  ;;  %v997_v29 = vpop.f32.mrf.mxu1 }
 0x110   :  { %1686 = vst.msk [vmem:[%s3223_s3 + $0x8] sm:$0xf] %vm1683_vm0, %v2007_v24  ;;  %1736 = vst.msk [vmem:[%s3223_s3 + $0xd0] sm:$0xf] %vm1683_vm0, %v2057_v25  ;;  %v1186_v30 = vmax.f32 %v796_v26, 0.0  ;;  %v1236_v31 = vmax.f32 %v996_v27, 0.0 }
 0x111   :  { %v800_v32 = vpop.f32.mrf.mxu0  ;;  %v1000_v33 = vpop.f32.mrf.mxu1 }
 0x112   :  { %v2008_v34 = vpack.c.bf16 %v1186_v30, %v1186_v30  ;;  %v2058_v35 = vpack.c.bf16 %v1236_v31, %v1236_v31  ;;  %v801_v36 = vadd.f32 %v2713_v57, %v800_v32  ;;  %v1001_v37 = vadd.f32 %v2713_v57, %v1000_v33 }
 0x113   :  { %v802_v38 = vpop.f32.mrf.mxu0  ;;  %v1002_v39 = vpop.f32.mrf.mxu1 }
 0x114   :  { %1687 = vst.msk [vmem:[%s3223_s3 + $0xc] sm:$0xf] %vm1683_vm0, %v2008_v34  ;;  %1737 = vst.msk [vmem:[%s3223_s3 + $0xd4] sm:$0xf] %vm1683_vm0, %v2058_v35  ;;  %v1187_v40 = vmax.f32 %v801_v36, 0.0  ;;  %v1237_v41 = vmax.f32 %v1001_v37, 0.0 }
 0x115   :  { %v803_v42 = vpop.f32.mrf.mxu0  ;;  %v1003_v43 = vpop.f32.mrf.mxu1 }
 0x116   :  { %v2009_v44 = vpack.c.bf16 %v1187_v40, %v1187_v40  ;;  %v2059_v45 = vpack.c.bf16 %v1237_v41, %v1237_v41  ;;  %v804_v46 = vadd.f32 %v2713_v57, %v803_v42  ;;  %v1004_v47 = vadd.f32 %v2713_v57, %v1003_v43 }
 0x117   :  { %v805_v48 = vpop.f32.mrf.mxu0  ;;  %v1005_v49 = vpop.f32.mrf.mxu1 }
 0x118   :  { %1688 = vst.msk [vmem:[%s3223_s3 + $0x10] sm:$0xf] %vm1683_vm0, %v2009_v44  ;;  %1738 = vst.msk [vmem:[%s3223_s3 + $0xd8] sm:$0xf] %vm1683_vm0, %v2059_v45  ;;  %v1188_v50 = vmax.f32 %v804_v46, 0.0  ;;  %v1238_v51 = vmax.f32 %v1004_v47, 0.0 }
 0x119   :  { %v808_v52 = vpop.f32.mrf.mxu0  ;;  %v1008_v53 = vpop.f32.mrf.mxu1 }
 0x11a   :  { %v2010_v54 = vpack.c.bf16 %v1188_v50, %v1188_v50  ;;  %v2060_v55 = vpack.c.bf16 %v1238_v51, %v1238_v51  ;;  %v809_v56 = vadd.f32 %v2713_v57, %v808_v52  ;;  %v1009_v58 = vadd.f32 %v2713_v57, %v1008_v53 }
 0x11b   :  { %v810_v59 = vpop.f32.mrf.mxu0  ;;  %v1010_v60 = vpop.f32.mrf.mxu1 }
 0x11c   :  { %1689 = vst.msk [vmem:[%s3223_s3 + $0x14] sm:$0xf] %vm1683_vm0, %v2010_v54  ;;  %1739 = vst.msk [vmem:[%s3223_s3 + $0xdc] sm:$0xf] %vm1683_vm0, %v2060_v55  ;;  %v1189_v61 = vmax.f32 %v809_v56, 0.0  ;;  %v1239_v62 = vmax.f32 %v1009_v58, 0.0 }
 0x11d   :  { %v811_v63 = vpop.f32.mrf.mxu0  ;;  %v1011_v0 = vpop.f32.mrf.mxu1 }
 0x11e   :  { %v2011_v1 = vpack.c.bf16 %v1189_v61, %v1189_v61  ;;  %v2061_v2 = vpack.c.bf16 %v1239_v62, %v1239_v62  ;;  %v812_v3 = vadd.f32 %v2713_v57, %v811_v63  ;;  %v1012_v4 = vadd.f32 %v2713_v57, %v1011_v0 }
 0x11f   :  { %v813_v5 = vpop.f32.mrf.mxu0  ;;  %v1013_v6 = vpop.f32.mrf.mxu1 }
 0x120   :  { %1690 = vst.msk [vmem:[%s3223_s3 + $0x18] sm:$0xf] %vm1683_vm0, %v2011_v1  ;;  %1740 = vst.msk [vmem:[%s3223_s3 + $0xe0] sm:$0xf] %vm1683_vm0, %v2061_v2  ;;  %v1190_v7 = vmax.f32 %v812_v3, 0.0  ;;  %v1240_v8 = vmax.f32 %v1012_v4, 0.0 }
 0x121   :  { %v816_v9 = vpop.f32.mrf.mxu0  ;;  %v1016_v10 = vpop.f32.mrf.mxu1 }
 0x122   :  { %v2012_v11 = vpack.c.bf16 %v1190_v7, %v1190_v7  ;;  %v2062_v12 = vpack.c.bf16 %v1240_v8, %v1240_v8  ;;  %v817_v13 = vadd.f32 %v2713_v57, %v816_v9  ;;  %v1017_v14 = vadd.f32 %v2713_v57, %v1016_v10 }
 0x123   :  { %v818_v15 = vpop.f32.mrf.mxu0  ;;  %v1018_v16 = vpop.f32.mrf.mxu1 }
 0x124   :  { %1691 = vst.msk [vmem:[%s3223_s3 + $0x1c] sm:$0xf] %vm1683_vm0, %v2012_v11  ;;  %1741 = vst.msk [vmem:[%s3223_s3 + $0xe4] sm:$0xf] %vm1683_vm0, %v2062_v12  ;;  %v1191_v17 = vmax.f32 %v817_v13, 0.0  ;;  %v1241_v18 = vmax.f32 %v1017_v14, 0.0 }
 0x125   :  { %v819_v19 = vpop.f32.mrf.mxu0  ;;  %v1019_v20 = vpop.f32.mrf.mxu1 }
 0x126   :  { %v2013_v21 = vpack.c.bf16 %v1191_v17, %v1191_v17  ;;  %v2063_v22 = vpack.c.bf16 %v1241_v18, %v1241_v18  ;;  %v820_v23 = vadd.f32 %v2713_v57, %v819_v19  ;;  %v1020_v24 = vadd.f32 %v2713_v57, %v1019_v20 }
 0x127   :  { %v821_v25 = vpop.f32.mrf.mxu0  ;;  %v1021_v26 = vpop.f32.mrf.mxu1 }
 0x128   :  { %1692 = vst.msk [vmem:[%s3223_s3 + $0x20] sm:$0xf] %vm1683_vm0, %v2013_v21  ;;  %1742 = vst.msk [vmem:[%s3223_s3 + $0xe8] sm:$0xf] %vm1683_vm0, %v2063_v22  ;;  %v1192_v27 = vmax.f32 %v820_v23, 0.0  ;;  %v1242_v28 = vmax.f32 %v1020_v24, 0.0 }
 0x129   :  { %v824_v29 = vpop.f32.mrf.mxu0  ;;  %v1024_v30 = vpop.f32.mrf.mxu1 }
 0x12a   :  { %v2014_v31 = vpack.c.bf16 %v1192_v27, %v1192_v27  ;;  %v2064_v32 = vpack.c.bf16 %v1242_v28, %v1242_v28  ;;  %v825_v33 = vadd.f32 %v2713_v57, %v824_v29  ;;  %v1025_v34 = vadd.f32 %v2713_v57, %v1024_v30 }
 0x12b   :  { %v826_v35 = vpop.f32.mrf.mxu0  ;;  %v1026_v36 = vpop.f32.mrf.mxu1 }
 0x12c   :  { %1693 = vst.msk [vmem:[%s3223_s3 + $0x24] sm:$0xf] %vm1683_vm0, %v2014_v31  ;;  %1743 = vst.msk [vmem:[%s3223_s3 + $0xec] sm:$0xf] %vm1683_vm0, %v2064_v32  ;;  %v1193_v37 = vmax.f32 %v825_v33, 0.0  ;;  %v1243_v38 = vmax.f32 %v1025_v34, 0.0 }
 0x12d   :  { %v827_v39 = vpop.f32.mrf.mxu0  ;;  %v1027_v40 = vpop.f32.mrf.mxu1 }
 0x12e   :  { %v2015_v41 = vpack.c.bf16 %v1193_v37, %v1193_v37  ;;  %v2065_v42 = vpack.c.bf16 %v1243_v38, %v1243_v38  ;;  %v828_v43 = vadd.f32 %v2713_v57, %v827_v39  ;;  %v1028_v44 = vadd.f32 %v2713_v57, %v1027_v40 }
 0x12f   :  { %v829_v45 = vpop.f32.mrf.mxu0  ;;  %v1029_v46 = vpop.f32.mrf.mxu1 }
 0x130   :  { %1694 = vst.msk [vmem:[%s3223_s3 + $0x28] sm:$0xf] %vm1683_vm0, %v2015_v41  ;;  %1744 = vst.msk [vmem:[%s3223_s3 + $0xf0] sm:$0xf] %vm1683_vm0, %v2065_v42  ;;  %v1194_v47 = vmax.f32 %v828_v43, 0.0  ;;  %v1244_v48 = vmax.f32 %v1028_v44, 0.0 }
 0x131   :  { %v832_v49 = vpop.f32.mrf.mxu0  ;;  %v1032_v50 = vpop.f32.mrf.mxu1 }
 0x132   :  { %v2016_v51 = vpack.c.bf16 %v1194_v47, %v1194_v47  ;;  %v2066_v52 = vpack.c.bf16 %v1244_v48, %v1244_v48  ;;  %v833_v53 = vadd.f32 %v2713_v57, %v832_v49  ;;  %v1033_v54 = vadd.f32 %v2713_v57, %v1032_v50 }
 0x133   :  { %v834_v55 = vpop.f32.mrf.mxu0  ;;  %v1034_v56 = vpop.f32.mrf.mxu1 }
 0x134   :  { %1695 = vst.msk [vmem:[%s3223_s3 + $0x2c] sm:$0xf] %vm1683_vm0, %v2016_v51  ;;  %1745 = vst.msk [vmem:[%s3223_s3 + $0xf4] sm:$0xf] %vm1683_vm0, %v2066_v52  ;;  %v1195_v58 = vmax.f32 %v833_v53, 0.0  ;;  %v1245_v59 = vmax.f32 %v1033_v54, 0.0 }
 0x135   :  { %v835_v60 = vpop.f32.mrf.mxu0  ;;  %v1035_v61 = vpop.f32.mrf.mxu1 }
 0x136   :  { %v2017_v62 = vpack.c.bf16 %v1195_v58, %v1195_v58  ;;  %v2067_v63 = vpack.c.bf16 %v1245_v59, %v1245_v59  ;;  %v836_v0 = vadd.f32 %v2713_v57, %v835_v60  ;;  %v1036_v1 = vadd.f32 %v2713_v57, %v1035_v61 }
 0x137   :  { %v837_v2 = vpop.f32.mrf.mxu0  ;;  %v1037_v3 = vpop.f32.mrf.mxu1 }
 0x138   :  { %1696 = vst.msk [vmem:[%s3223_s3 + $0x30] sm:$0xf] %vm1683_vm0, %v2017_v62  ;;  %1746 = vst.msk [vmem:[%s3223_s3 + $0xf8] sm:$0xf] %vm1683_vm0, %v2067_v63  ;;  %v1196_v4 = vmax.f32 %v836_v0, 0.0  ;;  %v1246_v5 = vmax.f32 %v1036_v1, 0.0 }
 0x139   :  { %v840_v6 = vpop.f32.mrf.mxu0  ;;  %v1040_v7 = vpop.f32.mrf.mxu1 }
 0x13a   :  { %v2018_v8 = vpack.c.bf16 %v1196_v4, %v1196_v4  ;;  %v2068_v9 = vpack.c.bf16 %v1246_v5, %v1246_v5  ;;  %v841_v10 = vadd.f32 %v2713_v57, %v840_v6  ;;  %v1041_v11 = vadd.f32 %v2713_v57, %v1040_v7 }
 0x13b   :  { %v842_v12 = vpop.f32.mrf.mxu0  ;;  %v1042_v13 = vpop.f32.mrf.mxu1 }
 0x13c   :  { %1697 = vst.msk [vmem:[%s3223_s3 + $0x34] sm:$0xf] %vm1683_vm0, %v2018_v8  ;;  %1747 = vst.msk [vmem:[%s3223_s3 + $0xfc] sm:$0xf] %vm1683_vm0, %v2068_v9  ;;  %v1197_v14 = vmax.f32 %v841_v10, 0.0  ;;  %v1247_v15 = vmax.f32 %v1041_v11, 0.0 }
 0x13d   :  { %v843_v16 = vpop.f32.mrf.mxu0  ;;  %v1043_v17 = vpop.f32.mrf.mxu1 }
 0x13e   :  { %v2019_v18 = vpack.c.bf16 %v1197_v14, %v1197_v14  ;;  %v2069_v19 = vpack.c.bf16 %v1247_v15, %v1247_v15  ;;  %v844_v20 = vadd.f32 %v2713_v57, %v843_v16  ;;  %v1044_v21 = vadd.f32 %v2713_v57, %v1043_v17 }
 0x13f   :  { %v845_v22 = vpop.f32.mrf.mxu0  ;;  %v1045_v23 = vpop.f32.mrf.mxu1 }
 0x140   :  { %1698 = vst.msk [vmem:[%s3223_s3 + $0x38] sm:$0xf] %vm1683_vm0, %v2019_v18  ;;  %1748 = vst.msk [vmem:[%s3223_s3 + $0x100] sm:$0xf] %vm1683_vm0, %v2069_v19  ;;  %v1198_v24 = vmax.f32 %v844_v20, 0.0  ;;  %v1248_v25 = vmax.f32 %v1044_v21, 0.0 }
 0x141   :  { %v848_v26 = vpop.f32.mrf.mxu0  ;;  %v1048_v27 = vpop.f32.mrf.mxu1 }
 0x142   :  { %v2020_v28 = vpack.c.bf16 %v1198_v24, %v1198_v24  ;;  %v2070_v29 = vpack.c.bf16 %v1248_v25, %v1248_v25  ;;  %v849_v30 = vadd.f32 %v2713_v57, %v848_v26  ;;  %v1049_v31 = vadd.f32 %v2713_v57, %v1048_v27 }
 0x143   :  { %v850_v32 = vpop.f32.mrf.mxu0  ;;  %v1050_v33 = vpop.f32.mrf.mxu1 }
 0x144   :  { %1699 = vst.msk [vmem:[%s3223_s3 + $0x3c] sm:$0xf] %vm1683_vm0, %v2020_v28  ;;  %1749 = vst.msk [vmem:[%s3223_s3 + $0x104] sm:$0xf] %vm1683_vm0, %v2070_v29  ;;  %v1199_v34 = vmax.f32 %v849_v30, 0.0  ;;  %v1249_v35 = vmax.f32 %v1049_v31, 0.0 }
 0x145   :  { %v851_v36 = vpop.f32.mrf.mxu0  ;;  %v1051_v37 = vpop.f32.mrf.mxu1 }
 0x146   :  { %v2021_v38 = vpack.c.bf16 %v1199_v34, %v1199_v34  ;;  %v2071_v39 = vpack.c.bf16 %v1249_v35, %v1249_v35  ;;  %v852_v40 = vadd.f32 %v2713_v57, %v851_v36  ;;  %v1052_v41 = vadd.f32 %v2713_v57, %v1051_v37 }
 0x147   :  { %v853_v42 = vpop.f32.mrf.mxu0  ;;  %v1053_v43 = vpop.f32.mrf.mxu1 }
 0x148   :  { %1700 = vst.msk [vmem:[%s3223_s3 + $0x40] sm:$0xf] %vm1683_vm0, %v2021_v38  ;;  %1750 = vst.msk [vmem:[%s3223_s3 + $0x108] sm:$0xf] %vm1683_vm0, %v2071_v39  ;;  %v1200_v44 = vmax.f32 %v852_v40, 0.0  ;;  %v1250_v45 = vmax.f32 %v1052_v41, 0.0 }
 0x149   :  { %v856_v46 = vpop.f32.mrf.mxu0  ;;  %v1056_v47 = vpop.f32.mrf.mxu1 }
 0x14a   :  { %v2022_v48 = vpack.c.bf16 %v1200_v44, %v1200_v44  ;;  %v2072_v49 = vpack.c.bf16 %v1250_v45, %v1250_v45  ;;  %v857_v50 = vadd.f32 %v2713_v57, %v856_v46  ;;  %v1057_v51 = vadd.f32 %v2713_v57, %v1056_v47 }
 0x14b   :  { %v858_v52 = vpop.f32.mrf.mxu0  ;;  %v1058_v53 = vpop.f32.mrf.mxu1 }
 0x14c   :  { %1701 = vst.msk [vmem:[%s3223_s3 + $0x44] sm:$0xf] %vm1683_vm0, %v2022_v48  ;;  %1751 = vst.msk [vmem:[%s3223_s3 + $0x10c] sm:$0xf] %vm1683_vm0, %v2072_v49  ;;  %v1201_v54 = vmax.f32 %v857_v50, 0.0  ;;  %v1251_v55 = vmax.f32 %v1057_v51, 0.0 }
 0x14d   :  { %v859_v56 = vpop.f32.mrf.mxu0  ;;  %v1059_v58 = vpop.f32.mrf.mxu1 }
 0x14e   :  { %v2023_v59 = vpack.c.bf16 %v1201_v54, %v1201_v54  ;;  %v2073_v60 = vpack.c.bf16 %v1251_v55, %v1251_v55  ;;  %v860_v61 = vadd.f32 %v2713_v57, %v859_v56  ;;  %v1060_v62 = vadd.f32 %v2713_v57, %v1059_v58 }
 0x14f   :  { %v861_v63 = vpop.f32.mrf.mxu0  ;;  %v1061_v0 = vpop.f32.mrf.mxu1 }
 0x150   :  { %1702 = vst.msk [vmem:[%s3223_s3 + $0x48] sm:$0xf] %vm1683_vm0, %v2023_v59  ;;  %1752 = vst.msk [vmem:[%s3223_s3 + $0x110] sm:$0xf] %vm1683_vm0, %v2073_v60  ;;  %v1202_v1 = vmax.f32 %v860_v61, 0.0  ;;  %v1252_v2 = vmax.f32 %v1060_v62, 0.0 }
 0x151   :  { %v864_v3 = vpop.f32.mrf.mxu0  ;;  %v1064_v4 = vpop.f32.mrf.mxu1 }
 0x152   :  { %v2024_v5 = vpack.c.bf16 %v1202_v1, %v1202_v1  ;;  %v2074_v6 = vpack.c.bf16 %v1252_v2, %v1252_v2  ;;  %v865_v7 = vadd.f32 %v2713_v57, %v864_v3  ;;  %v1065_v8 = vadd.f32 %v2713_v57, %v1064_v4 }
 0x153   :  { %v866_v9 = vpop.f32.mrf.mxu0  ;;  %v1066_v10 = vpop.f32.mrf.mxu1 }
 0x154   :  { %1703 = vst.msk [vmem:[%s3223_s3 + $0x4c] sm:$0xf] %vm1683_vm0, %v2024_v5  ;;  %1753 = vst.msk [vmem:[%s3223_s3 + $0x114] sm:$0xf] %vm1683_vm0, %v2074_v6  ;;  %v1203_v11 = vmax.f32 %v865_v7, 0.0  ;;  %v1253_v12 = vmax.f32 %v1065_v8, 0.0 }
 0x155   :  { %v867_v13 = vpop.f32.mrf.mxu0  ;;  %v1067_v14 = vpop.f32.mrf.mxu1 }
 0x156   :  { %v2025_v15 = vpack.c.bf16 %v1203_v11, %v1203_v11  ;;  %v2075_v16 = vpack.c.bf16 %v1253_v12, %v1253_v12  ;;  %v868_v17 = vadd.f32 %v2713_v57, %v867_v13  ;;  %v1068_v18 = vadd.f32 %v2713_v57, %v1067_v14 }
 0x157   :  { %v869_v19 = vpop.f32.mrf.mxu0  ;;  %v1069_v20 = vpop.f32.mrf.mxu1 }
 0x158   :  { %1704 = vst.msk [vmem:[%s3223_s3 + $0x50] sm:$0xf] %vm1683_vm0, %v2025_v15  ;;  %1754 = vst.msk [vmem:[%s3223_s3 + $0x118] sm:$0xf] %vm1683_vm0, %v2075_v16  ;;  %v1204_v21 = vmax.f32 %v868_v17, 0.0  ;;  %v1254_v22 = vmax.f32 %v1068_v18, 0.0 }
 0x159   :  { %v872_v23 = vpop.f32.mrf.mxu0  ;;  %v1072_v24 = vpop.f32.mrf.mxu1 }
 0x15a   :  { %v2026_v25 = vpack.c.bf16 %v1204_v21, %v1204_v21  ;;  %v2076_v26 = vpack.c.bf16 %v1254_v22, %v1254_v22  ;;  %v873_v27 = vadd.f32 %v2713_v57, %v872_v23  ;;  %v1073_v28 = vadd.f32 %v2713_v57, %v1072_v24 }
 0x15b   :  { %v874_v29 = vpop.f32.mrf.mxu0  ;;  %v1074_v30 = vpop.f32.mrf.mxu1 }
 0x15c   :  { %1705 = vst.msk [vmem:[%s3223_s3 + $0x54] sm:$0xf] %vm1683_vm0, %v2026_v25  ;;  %1755 = vst.msk [vmem:[%s3223_s3 + $0x11c] sm:$0xf] %vm1683_vm0, %v2076_v26  ;;  %v1205_v31 = vmax.f32 %v873_v27, 0.0  ;;  %v1255_v32 = vmax.f32 %v1073_v28, 0.0 }
 0x15d   :  { %v875_v33 = vpop.f32.mrf.mxu0  ;;  %v1075_v34 = vpop.f32.mrf.mxu1 }
 0x15e   :  { %v2027_v35 = vpack.c.bf16 %v1205_v31, %v1205_v31  ;;  %v2077_v36 = vpack.c.bf16 %v1255_v32, %v1255_v32  ;;  %v876_v37 = vadd.f32 %v2713_v57, %v875_v33  ;;  %v1076_v38 = vadd.f32 %v2713_v57, %v1075_v34 }
 0x15f   :  { %v877_v39 = vpop.f32.mrf.mxu0  ;;  %v1077_v40 = vpop.f32.mrf.mxu1 }
 0x160   :  { %1706 = vst.msk [vmem:[%s3223_s3 + $0x58] sm:$0xf] %vm1683_vm0, %v2027_v35  ;;  %1756 = vst.msk [vmem:[%s3223_s3 + $0x120] sm:$0xf] %vm1683_vm0, %v2077_v36  ;;  %v1206_v41 = vmax.f32 %v876_v37, 0.0  ;;  %v1256_v42 = vmax.f32 %v1076_v38, 0.0 }
 0x161   :  { %v880_v43 = vpop.f32.mrf.mxu0  ;;  %v1080_v44 = vpop.f32.mrf.mxu1 }
 0x162   :  { %v2028_v45 = vpack.c.bf16 %v1206_v41, %v1206_v41  ;;  %v2078_v46 = vpack.c.bf16 %v1256_v42, %v1256_v42  ;;  %v881_v47 = vadd.f32 %v2713_v57, %v880_v43  ;;  %v1081_v48 = vadd.f32 %v2713_v57, %v1080_v44 }
 0x163   :  { %v882_v49 = vpop.f32.mrf.mxu0  ;;  %v1082_v50 = vpop.f32.mrf.mxu1 }
 0x164   :  { %1707 = vst.msk [vmem:[%s3223_s3 + $0x5c] sm:$0xf] %vm1683_vm0, %v2028_v45  ;;  %1757 = vst.msk [vmem:[%s3223_s3 + $0x124] sm:$0xf] %vm1683_vm0, %v2078_v46  ;;  %v1207_v51 = vmax.f32 %v881_v47, 0.0  ;;  %v1257_v52 = vmax.f32 %v1081_v48, 0.0 }
 0x165   :  { %v883_v53 = vpop.f32.mrf.mxu0  ;;  %v1083_v54 = vpop.f32.mrf.mxu1 }
 0x166   :  { %v2029_v55 = vpack.c.bf16 %v1207_v51, %v1207_v51  ;;  %v2079_v56 = vpack.c.bf16 %v1257_v52, %v1257_v52  ;;  %v884_v58 = vadd.f32 %v2713_v57, %v883_v53  ;;  %v1084_v59 = vadd.f32 %v2713_v57, %v1083_v54 }
 0x167   :  { %v885_v60 = vpop.f32.mrf.mxu0  ;;  %v1085_v61 = vpop.f32.mrf.mxu1 }
 0x168   :  { %1708 = vst.msk [vmem:[%s3223_s3 + $0x60] sm:$0xf] %vm1683_vm0, %v2029_v55  ;;  %1758 = vst.msk [vmem:[%s3223_s3 + $0x128] sm:$0xf] %vm1683_vm0, %v2079_v56  ;;  %v1208_v62 = vmax.f32 %v884_v58, 0.0  ;;  %v1258_v63 = vmax.f32 %v1084_v59, 0.0 }
 0x169   :  { %v888_v0 = vpop.f32.mrf.mxu0  ;;  %v1088_v1 = vpop.f32.mrf.mxu1 }
 0x16a   :  { %v2030_v2 = vpack.c.bf16 %v1208_v62, %v1208_v62  ;;  %v2080_v3 = vpack.c.bf16 %v1258_v63, %v1258_v63  ;;  %v889_v4 = vadd.f32 %v2713_v57, %v888_v0  ;;  %v1089_v5 = vadd.f32 %v2713_v57, %v1088_v1 }
 0x16b   :  { %v890_v6 = vpop.f32.mrf.mxu0  ;;  %v1090_v7 = vpop.f32.mrf.mxu1 }
 0x16c   :  { %1709 = vst.msk [vmem:[%s3223_s3 + $0x64] sm:$0xf] %vm1683_vm0, %v2030_v2  ;;  %1759 = vst.msk [vmem:[%s3223_s3 + $0x12c] sm:$0xf] %vm1683_vm0, %v2080_v3  ;;  %v1209_v8 = vmax.f32 %v889_v4, 0.0  ;;  %v1259_v9 = vmax.f32 %v1089_v5, 0.0 }
 0x16d   :  { %v891_v10 = vpop.f32.mrf.mxu0  ;;  %v1091_v11 = vpop.f32.mrf.mxu1 }
 0x16e   :  { %v2031_v12 = vpack.c.bf16 %v1209_v8, %v1209_v8  ;;  %v2081_v13 = vpack.c.bf16 %v1259_v9, %v1259_v9  ;;  %v892_v14 = vadd.f32 %v2713_v57, %v891_v10  ;;  %v1092_v15 = vadd.f32 %v2713_v57, %v1091_v11 }
 0x16f   :  { %v893_v16 = vpop.f32.mrf.mxu0  ;;  %v1093_v17 = vpop.f32.mrf.mxu1 }
 0x170   :  { %1710 = vst.msk [vmem:[%s3223_s3 + $0x68] sm:$0xf] %vm1683_vm0, %v2031_v12  ;;  %1760 = vst.msk [vmem:[%s3223_s3 + $0x130] sm:$0xf] %vm1683_vm0, %v2081_v13  ;;  %v1210_v18 = vmax.f32 %v892_v14, 0.0  ;;  %v1260_v19 = vmax.f32 %v1092_v15, 0.0 }
 0x171   :  { %v896_v20 = vpop.f32.mrf.mxu0  ;;  %v1096_v21 = vpop.f32.mrf.mxu1 }
 0x172   :  { %v2032_v22 = vpack.c.bf16 %v1210_v18, %v1210_v18  ;;  %v2082_v23 = vpack.c.bf16 %v1260_v19, %v1260_v19  ;;  %v897_v24 = vadd.f32 %v2713_v57, %v896_v20  ;;  %v1097_v25 = vadd.f32 %v2713_v57, %v1096_v21 }
 0x173   :  { %v898_v26 = vpop.f32.mrf.mxu0  ;;  %v1098_v27 = vpop.f32.mrf.mxu1 }
 0x174   :  { %1711 = vst.msk [vmem:[%s3223_s3 + $0x6c] sm:$0xf] %vm1683_vm0, %v2032_v22  ;;  %1761 = vst.msk [vmem:[%s3223_s3 + $0x134] sm:$0xf] %vm1683_vm0, %v2082_v23  ;;  %v1211_v28 = vmax.f32 %v897_v24, 0.0  ;;  %v1261_v29 = vmax.f32 %v1097_v25, 0.0 }
 0x175   :  { %v899_v30 = vpop.f32.mrf.mxu0  ;;  %v1099_v31 = vpop.f32.mrf.mxu1 }
 0x176   :  { %v2033_v32 = vpack.c.bf16 %v1211_v28, %v1211_v28  ;;  %v2083_v33 = vpack.c.bf16 %v1261_v29, %v1261_v29  ;;  %v900_v34 = vadd.f32 %v2713_v57, %v899_v30  ;;  %v1100_v35 = vadd.f32 %v2713_v57, %v1099_v31 }
 0x177   :  { %v901_v36 = vpop.f32.mrf.mxu0  ;;  %v1101_v37 = vpop.f32.mrf.mxu1 }
 0x178   :  { %1712 = vst.msk [vmem:[%s3223_s3 + $0x70] sm:$0xf] %vm1683_vm0, %v2033_v32  ;;  %1762 = vst.msk [vmem:[%s3223_s3 + $0x138] sm:$0xf] %vm1683_vm0, %v2083_v33  ;;  %v1212_v38 = vmax.f32 %v900_v34, 0.0  ;;  %v1262_v39 = vmax.f32 %v1100_v35, 0.0 }
 0x179   :  { %v904_v40 = vpop.f32.mrf.mxu0  ;;  %v1104_v41 = vpop.f32.mrf.mxu1 }
 0x17a   :  { %v2034_v42 = vpack.c.bf16 %v1212_v38, %v1212_v38  ;;  %v2084_v43 = vpack.c.bf16 %v1262_v39, %v1262_v39  ;;  %v905_v44 = vadd.f32 %v2713_v57, %v904_v40  ;;  %v1105_v45 = vadd.f32 %v2713_v57, %v1104_v41 }
 0x17b   :  { %v906_v46 = vpop.f32.mrf.mxu0  ;;  %v1106_v47 = vpop.f32.mrf.mxu1 }
 0x17c   :  { %1713 = vst.msk [vmem:[%s3223_s3 + $0x74] sm:$0xf] %vm1683_vm0, %v2034_v42  ;;  %1763 = vst.msk [vmem:[%s3223_s3 + $0x13c] sm:$0xf] %vm1683_vm0, %v2084_v43  ;;  %v1213_v48 = vmax.f32 %v905_v44, 0.0  ;;  %v1263_v49 = vmax.f32 %v1105_v45, 0.0 }
 0x17d   :  { %v907_v50 = vpop.f32.mrf.mxu0  ;;  %v1107_v51 = vpop.f32.mrf.mxu1 }
 0x17e   :  { %v2035_v52 = vpack.c.bf16 %v1213_v48, %v1213_v48  ;;  %v2085_v53 = vpack.c.bf16 %v1263_v49, %v1263_v49  ;;  %v908_v54 = vadd.f32 %v2713_v57, %v907_v50  ;;  %v1108_v55 = vadd.f32 %v2713_v57, %v1107_v51 }
 0x17f   :  { %v909_v56 = vpop.f32.mrf.mxu0  ;;  %v1109_v58 = vpop.f32.mrf.mxu1 }
 0x180   :  { %1714 = vst.msk [vmem:[%s3223_s3 + $0x78] sm:$0xf] %vm1683_vm0, %v2035_v52  ;;  %1764 = vst.msk [vmem:[%s3223_s3 + $0x140] sm:$0xf] %vm1683_vm0, %v2085_v53  ;;  %v1214_v59 = vmax.f32 %v908_v54, 0.0  ;;  %v1264_v60 = vmax.f32 %v1108_v55, 0.0 }
 0x181   :  { %v912_v61 = vpop.f32.mrf.mxu0  ;;  %v1112_v62 = vpop.f32.mrf.mxu1 }
 0x182   :  { %v2036_v63 = vpack.c.bf16 %v1214_v59, %v1214_v59  ;;  %v2086_v0 = vpack.c.bf16 %v1264_v60, %v1264_v60  ;;  %v913_v1 = vadd.f32 %v2713_v57, %v912_v61  ;;  %v1113_v2 = vadd.f32 %v2713_v57, %v1112_v62 }
 0x183   :  { %v914_v3 = vpop.f32.mrf.mxu0  ;;  %v1114_v4 = vpop.f32.mrf.mxu1 }
 0x184   :  { %1715 = vst.msk [vmem:[%s3223_s3 + $0x7c] sm:$0xf] %vm1683_vm0, %v2036_v63  ;;  %1765 = vst.msk [vmem:[%s3223_s3 + $0x144] sm:$0xf] %vm1683_vm0, %v2086_v0  ;;  %v1215_v5 = vmax.f32 %v913_v1, 0.0  ;;  %v1265_v6 = vmax.f32 %v1113_v2, 0.0 }
 0x185   :  { %v915_v7 = vpop.f32.mrf.mxu0  ;;  %v1115_v8 = vpop.f32.mrf.mxu1 }
 0x186   :  { %v2037_v9 = vpack.c.bf16 %v1215_v5, %v1215_v5  ;;  %v2087_v10 = vpack.c.bf16 %v1265_v6, %v1265_v6  ;;  %v916_v11 = vadd.f32 %v2713_v57, %v915_v7  ;;  %v1116_v12 = vadd.f32 %v2713_v57, %v1115_v8 }
 0x187   :  { %v917_v13 = vpop.f32.mrf.mxu0  ;;  %v1117_v14 = vpop.f32.mrf.mxu1 }
 0x188   :  { %1716 = vst.msk [vmem:[%s3223_s3 + $0x80] sm:$0xf] %vm1683_vm0, %v2037_v9  ;;  %1766 = vst.msk [vmem:[%s3223_s3 + $0x148] sm:$0xf] %vm1683_vm0, %v2087_v10  ;;  %v1216_v15 = vmax.f32 %v916_v11, 0.0  ;;  %v1266_v16 = vmax.f32 %v1116_v12, 0.0 }
 0x189   :  { %v920_v17 = vpop.f32.mrf.mxu0  ;;  %v1120_v18 = vpop.f32.mrf.mxu1 }
 0x18a   :  { %v2038_v19 = vpack.c.bf16 %v1216_v15, %v1216_v15  ;;  %v2088_v20 = vpack.c.bf16 %v1266_v16, %v1266_v16  ;;  %v921_v21 = vadd.f32 %v2713_v57, %v920_v17  ;;  %v1121_v22 = vadd.f32 %v2713_v57, %v1120_v18 }
 0x18b   :  { %v922_v23 = vpop.f32.mrf.mxu0  ;;  %v1122_v24 = vpop.f32.mrf.mxu1 }
 0x18c   :  { %1717 = vst.msk [vmem:[%s3223_s3 + $0x84] sm:$0xf] %vm1683_vm0, %v2038_v19  ;;  %1767 = vst.msk [vmem:[%s3223_s3 + $0x14c] sm:$0xf] %vm1683_vm0, %v2088_v20  ;;  %v1217_v25 = vmax.f32 %v921_v21, 0.0  ;;  %v1267_v26 = vmax.f32 %v1121_v22, 0.0 }
 0x18d   :  { %v923_v27 = vpop.f32.mrf.mxu0  ;;  %v1123_v28 = vpop.f32.mrf.mxu1 }
 0x18e   :  { %v2039_v29 = vpack.c.bf16 %v1217_v25, %v1217_v25  ;;  %v2089_v30 = vpack.c.bf16 %v1267_v26, %v1267_v26  ;;  %v924_v31 = vadd.f32 %v2713_v57, %v923_v27  ;;  %v1124_v32 = vadd.f32 %v2713_v57, %v1123_v28 }
 0x18f   :  { %v925_v33 = vpop.f32.mrf.mxu0  ;;  %v1125_v34 = vpop.f32.mrf.mxu1 }
 0x190   :  { %1718 = vst.msk [vmem:[%s3223_s3 + $0x88] sm:$0xf] %vm1683_vm0, %v2039_v29  ;;  %1768 = vst.msk [vmem:[%s3223_s3 + $0x150] sm:$0xf] %vm1683_vm0, %v2089_v30  ;;  %v1218_v35 = vmax.f32 %v924_v31, 0.0  ;;  %v1268_v36 = vmax.f32 %v1124_v32, 0.0 }
 0x191   :  { %v928_v37 = vpop.f32.mrf.mxu0  ;;  %v1128_v38 = vpop.f32.mrf.mxu1 }
 0x192   :  { %v2040_v39 = vpack.c.bf16 %v1218_v35, %v1218_v35  ;;  %v2090_v40 = vpack.c.bf16 %v1268_v36, %v1268_v36  ;;  %v929_v41 = vadd.f32 %v2713_v57, %v928_v37  ;;  %v1129_v42 = vadd.f32 %v2713_v57, %v1128_v38 }
 0x193   :  { %v930_v43 = vpop.f32.mrf.mxu0  ;;  %v1130_v44 = vpop.f32.mrf.mxu1 }
 0x194   :  { %1719 = vst.msk [vmem:[%s3223_s3 + $0x8c] sm:$0xf] %vm1683_vm0, %v2040_v39  ;;  %1769 = vst.msk [vmem:[%s3223_s3 + $0x154] sm:$0xf] %vm1683_vm0, %v2090_v40  ;;  %v1219_v45 = vmax.f32 %v929_v41, 0.0  ;;  %v1269_v46 = vmax.f32 %v1129_v42, 0.0 }
 0x195   :  { %v931_v47 = vpop.f32.mrf.mxu0  ;;  %v1131_v48 = vpop.f32.mrf.mxu1 }
 0x196   :  { %v2041_v49 = vpack.c.bf16 %v1219_v45, %v1219_v45  ;;  %v2091_v50 = vpack.c.bf16 %v1269_v46, %v1269_v46  ;;  %v932_v51 = vadd.f32 %v2713_v57, %v931_v47  ;;  %v1132_v52 = vadd.f32 %v2713_v57, %v1131_v48 }
 0x197   :  { %v933_v53 = vpop.f32.mrf.mxu0  ;;  %v1133_v54 = vpop.f32.mrf.mxu1 }
 0x198   :  { %1720 = vst.msk [vmem:[%s3223_s3 + $0x90] sm:$0xf] %vm1683_vm0, %v2041_v49  ;;  %1770 = vst.msk [vmem:[%s3223_s3 + $0x158] sm:$0xf] %vm1683_vm0, %v2091_v50  ;;  %v1220_v55 = vmax.f32 %v932_v51, 0.0  ;;  %v1270_v56 = vmax.f32 %v1132_v52, 0.0 }
 0x199   :  { %v936_v58 = vpop.f32.mrf.mxu0  ;;  %v1136_v59 = vpop.f32.mrf.mxu1 }
 0x19a   :  { %v2042_v60 = vpack.c.bf16 %v1220_v55, %v1220_v55  ;;  %v2092_v61 = vpack.c.bf16 %v1270_v56, %v1270_v56  ;;  %v937_v62 = vadd.f32 %v2713_v57, %v936_v58  ;;  %v1137_v63 = vadd.f32 %v2713_v57, %v1136_v59 }
 0x19b   :  { %v938_v0 = vpop.f32.mrf.mxu0  ;;  %v1138_v1 = vpop.f32.mrf.mxu1 }
 0x19c   :  { %1721 = vst.msk [vmem:[%s3223_s3 + $0x94] sm:$0xf] %vm1683_vm0, %v2042_v60  ;;  %1771 = vst.msk [vmem:[%s3223_s3 + $0x15c] sm:$0xf] %vm1683_vm0, %v2092_v61  ;;  %v1221_v2 = vmax.f32 %v937_v62, 0.0  ;;  %v1271_v3 = vmax.f32 %v1137_v63, 0.0 }
 0x19d   :  { %v939_v4 = vpop.f32.mrf.mxu0  ;;  %v1139_v5 = vpop.f32.mrf.mxu1 }
 0x19e   :  { %v2043_v6 = vpack.c.bf16 %v1221_v2, %v1221_v2  ;;  %v2093_v7 = vpack.c.bf16 %v1271_v3, %v1271_v3  ;;  %v940_v8 = vadd.f32 %v2713_v57, %v939_v4  ;;  %v1140_v9 = vadd.f32 %v2713_v57, %v1139_v5 }
 0x19f   :  { %v941_v10 = vpop.f32.mrf.mxu0  ;;  %v1141_v11 = vpop.f32.mrf.mxu1 }
 0x1a0   :  { %1722 = vst.msk [vmem:[%s3223_s3 + $0x98] sm:$0xf] %vm1683_vm0, %v2043_v6  ;;  %1772 = vst.msk [vmem:[%s3223_s3 + $0x160] sm:$0xf] %vm1683_vm0, %v2093_v7  ;;  %v1222_v12 = vmax.f32 %v940_v8, 0.0  ;;  %v1272_v13 = vmax.f32 %v1140_v9, 0.0 }
 0x1a1   :  { %v944_v14 = vpop.f32.mrf.mxu0  ;;  %v1144_v15 = vpop.f32.mrf.mxu1 }
 0x1a2   :  { %v2044_v16 = vpack.c.bf16 %v1222_v12, %v1222_v12  ;;  %v2094_v17 = vpack.c.bf16 %v1272_v13, %v1272_v13  ;;  %v945_v18 = vadd.f32 %v2713_v57, %v944_v14  ;;  %v1145_v19 = vadd.f32 %v2713_v57, %v1144_v15 }
 0x1a3   :  { %v946_v20 = vpop.f32.mrf.mxu0  ;;  %v1146_v21 = vpop.f32.mrf.mxu1 }
 0x1a4   :  { %1723 = vst.msk [vmem:[%s3223_s3 + $0x9c] sm:$0xf] %vm1683_vm0, %v2044_v16  ;;  %1773 = vst.msk [vmem:[%s3223_s3 + $0x164] sm:$0xf] %vm1683_vm0, %v2094_v17  ;;  %v1223_v22 = vmax.f32 %v945_v18, 0.0  ;;  %v1273_v23 = vmax.f32 %v1145_v19, 0.0 }
 0x1a5   :  { %v947_v24 = vpop.f32.mrf.mxu0  ;;  %v1147_v25 = vpop.f32.mrf.mxu1 }
 0x1a6   :  { %v2045_v26 = vpack.c.bf16 %v1223_v22, %v1223_v22  ;;  %v2095_v27 = vpack.c.bf16 %v1273_v23, %v1273_v23  ;;  %v948_v28 = vadd.f32 %v2713_v57, %v947_v24  ;;  %v1148_v29 = vadd.f32 %v2713_v57, %v1147_v25 }
 0x1a7   :  { %v949_v30 = vpop.f32.mrf.mxu0  ;;  %v1149_v31 = vpop.f32.mrf.mxu1 }
 0x1a8   :  { %1724 = vst.msk [vmem:[%s3223_s3 + $0xa0] sm:$0xf] %vm1683_vm0, %v2045_v26  ;;  %1774 = vst.msk [vmem:[%s3223_s3 + $0x168] sm:$0xf] %vm1683_vm0, %v2095_v27  ;;  %v1224_v32 = vmax.f32 %v948_v28, 0.0  ;;  %v1274_v33 = vmax.f32 %v1148_v29, 0.0 }
 0x1a9   :  { %v952_v34 = vpop.f32.mrf.mxu0  ;;  %v1152_v35 = vpop.f32.mrf.mxu1 }
 0x1aa   :  { %v2046_v36 = vpack.c.bf16 %v1224_v32, %v1224_v32  ;;  %v2096_v37 = vpack.c.bf16 %v1274_v33, %v1274_v33  ;;  %v953_v38 = vadd.f32 %v2713_v57, %v952_v34  ;;  %v1153_v39 = vadd.f32 %v2713_v57, %v1152_v35  ;;  %v3140_v57 = vld [vmem:[%s3222_s2] ss:$0 sm:$0xff] }
 0x1ab   :  { %v954_v40 = vpop.f32.mrf.mxu0  ;;  %v1154_v41 = vpop.f32.mrf.mxu1 }
 0x1ac   :  { %1725 = vst.msk [vmem:[%s3223_s3 + $0xa4] sm:$0xf] %vm1683_vm0, %v2046_v36  ;;  %1775 = vst.msk [vmem:[%s3223_s3 + $0x16c] sm:$0xf] %vm1683_vm0, %v2096_v37  ;;  %v1225_v42 = vmax.f32 %v953_v38, 0.0  ;;  %v1275_v43 = vmax.f32 %v1153_v39, 0.0 }
 0x1ad   :  { %v955_v44 = vpop.f32.mrf.mxu0  ;;  %v1155_v45 = vpop.f32.mrf.mxu1 }
 0x1ae   :  { %v2047_v46 = vpack.c.bf16 %v1225_v42, %v1225_v42  ;;  %v2097_v47 = vpack.c.bf16 %v1275_v43, %v1275_v43  ;;  %v956_v48 = vadd.f32 %v3140_v57, %v955_v44  ;;  %v1156_v49 = vadd.f32 %v3140_v57, %v1155_v45 }
 0x1af   :  { %v957_v50 = vpop.f32.mrf.mxu0  ;;  %v1157_v51 = vpop.f32.mrf.mxu1 }
 0x1b0   :  { %1726 = vst.msk [vmem:[%s3223_s3 + $0xa8] sm:$0xf] %vm1683_vm0, %v2047_v46  ;;  %1776 = vst.msk [vmem:[%s3223_s3 + $0x170] sm:$0xf] %vm1683_vm0, %v2097_v47  ;;  %v1226_v52 = vmax.f32 %v956_v48, 0.0  ;;  %v1276_v53 = vmax.f32 %v1156_v49, 0.0 }
 0x1b1   :  { %v960_v54 = vpop.f32.mrf.mxu0  ;;  %v1160_v55 = vpop.f32.mrf.mxu1 }
 0x1b2   :  { %v2048_v56 = vpack.c.bf16 %v1226_v52, %v1226_v52  ;;  %v2098_v58 = vpack.c.bf16 %v1276_v53, %v1276_v53  ;;  %v961_v59 = vadd.f32 %v3140_v57, %v960_v54  ;;  %v1161_v60 = vadd.f32 %v3140_v57, %v1160_v55 }
 0x1b3   :  { %v962_v61 = vpop.f32.mrf.mxu0  ;;  %v1162_v62 = vpop.f32.mrf.mxu1 }
 0x1b4   :  { %1727 = vst.msk [vmem:[%s3223_s3 + $0xac] sm:$0xf] %vm1683_vm0, %v2048_v56  ;;  %1777 = vst.msk [vmem:[%s3223_s3 + $0x174] sm:$0xf] %vm1683_vm0, %v2098_v58  ;;  %v1227_v63 = vmax.f32 %v961_v59, 0.0  ;;  %v1277_v0 = vmax.f32 %v1161_v60, 0.0 }
 0x1b5   :  { %v963_v1 = vpop.f32.mrf.mxu0  ;;  %v1163_v2 = vpop.f32.mrf.mxu1 }
 0x1b6   :  { %v2049_v3 = vpack.c.bf16 %v1227_v63, %v1227_v63  ;;  %v2099_v4 = vpack.c.bf16 %v1277_v0, %v1277_v0  ;;  %v964_v5 = vadd.f32 %v3140_v57, %v963_v1  ;;  %v1164_v6 = vadd.f32 %v3140_v57, %v1163_v2 }
 0x1b7   :  { %v965_v7 = vpop.f32.mrf.mxu0  ;;  %v1165_v8 = vpop.f32.mrf.mxu1 }
 0x1b8   :  { %1728 = vst.msk [vmem:[%s3223_s3 + $0xb0] sm:$0xf] %vm1683_vm0, %v2049_v3  ;;  %1778 = vst.msk [vmem:[%s3223_s3 + $0x178] sm:$0xf] %vm1683_vm0, %v2099_v4  ;;  %v1228_v9 = vmax.f32 %v964_v5, 0.0  ;;  %v1278_v10 = vmax.f32 %v1164_v6, 0.0 }
 0x1b9   :  { %v968_v11 = vpop.f32.mrf.mxu0  ;;  %v1168_v12 = vpop.f32.mrf.mxu1 }
 0x1ba   :  { %v2050_v13 = vpack.c.bf16 %v1228_v9, %v1228_v9  ;;  %v2100_v14 = vpack.c.bf16 %v1278_v10, %v1278_v10  ;;  %v969_v15 = vadd.f32 %v3140_v57, %v968_v11  ;;  %v1169_v16 = vadd.f32 %v3140_v57, %v1168_v12 }
 0x1bb   :  { %v970_v17 = vpop.f32.mrf.mxu0  ;;  %v1170_v18 = vpop.f32.mrf.mxu1 }
 0x1bc   :  { %1729 = vst.msk [vmem:[%s3223_s3 + $0xb4] sm:$0xf] %vm1683_vm0, %v2050_v13  ;;  %1779 = vst.msk [vmem:[%s3223_s3 + $0x17c] sm:$0xf] %vm1683_vm0, %v2100_v14  ;;  %v1229_v19 = vmax.f32 %v969_v15, 0.0  ;;  %v1279_v20 = vmax.f32 %v1169_v16, 0.0 }
 0x1bd   :  { %v971_v21 = vpop.f32.mrf.mxu0  ;;  %v1171_v22 = vpop.f32.mrf.mxu1 }
 0x1be   :  { %v2051_v23 = vpack.c.bf16 %v1229_v19, %v1229_v19  ;;  %v2101_v24 = vpack.c.bf16 %v1279_v20, %v1279_v20  ;;  %v972_v25 = vadd.f32 %v3140_v57, %v971_v21  ;;  %v1172_v26 = vadd.f32 %v3140_v57, %v1171_v22 }
 0x1bf   :  { %v973_v27 = vpop.f32.mrf.mxu0  ;;  %v1173_v28 = vpop.f32.mrf.mxu1 }
 0x1c0   :  { %1730 = vst.msk [vmem:[%s3223_s3 + $0xb8] sm:$0xf] %vm1683_vm0, %v2051_v23  ;;  %1780 = vst.msk [vmem:[%s3223_s3 + $0x180] sm:$0xf] %vm1683_vm0, %v2101_v24  ;;  %v1230_v29 = vmax.f32 %v972_v25, 0.0  ;;  %v1280_v30 = vmax.f32 %v1172_v26, 0.0 }
 0x1c1   :  { %v976_v31 = vpop.f32.mrf.mxu0  ;;  %v1176_v32 = vpop.f32.mrf.mxu1 }
 0x1c2   :  { %v2052_v33 = vpack.c.bf16 %v1230_v29, %v1230_v29  ;;  %v2102_v34 = vpack.c.bf16 %v1280_v30, %v1280_v30  ;;  %v977_v35 = vadd.f32 %v3140_v57, %v976_v31  ;;  %v1177_v36 = vadd.f32 %v3140_v57, %v1176_v32 }
 0x1c3   :  { %v978_v37 = vpop.f32.mrf.mxu0  ;;  %v1178_v38 = vpop.f32.mrf.mxu1 }
 0x1c4   :  { %1731 = vst.msk [vmem:[%s3223_s3 + $0xbc] sm:$0xf] %vm1683_vm0, %v2052_v33  ;;  %1781 = vst.msk [vmem:[%s3223_s3 + $0x184] sm:$0xf] %vm1683_vm0, %v2102_v34  ;;  %v1231_v39 = vmax.f32 %v977_v35, 0.0  ;;  %v1281_v40 = vmax.f32 %v1177_v36, 0.0 }
 0x1c5   :  { %v979_v41 = vpop.f32.mrf.mxu0  ;;  %v1179_v42 = vpop.f32.mrf.mxu1 }
 0x1c6   :  { %v2053_v43 = vpack.c.bf16 %v1231_v39, %v1231_v39  ;;  %v2103_v44 = vpack.c.bf16 %v1281_v40, %v1281_v40  ;;  %v980_v45 = vadd.f32 %v3140_v57, %v979_v41  ;;  %v1180_v46 = vadd.f32 %v3140_v57, %v1179_v42 }
 0x1c7   :  { %v981_v47 = vpop.f32.mrf.mxu0  ;;  %v1181_v48 = vpop.f32.mrf.mxu1 }
 0x1c8   :  { %1732 = vst.msk [vmem:[%s3223_s3 + $0xc0] sm:$0xf] %vm1683_vm0, %v2053_v43  ;;  %1782 = vst.msk [vmem:[%s3223_s3 + $0x188] sm:$0xf] %vm1683_vm0, %v2103_v44  ;;  %v1232_v49 = vmax.f32 %v980_v45, 0.0  ;;  %v1282_v50 = vmax.f32 %v1180_v46, 0.0 }
 0x1ca   :  { %v2054_v51 = vpack.c.bf16 %v1232_v49, %v1232_v49  ;;  %v2104_v52 = vpack.c.bf16 %v1282_v50, %v1282_v50 }
 0x1cc   :  { %1733 = vst.msk [vmem:[%s3223_s3 + $0xc4] sm:$0xf] %vm1683_vm0, %v2054_v51  ;;  %1783 = vst.msk [vmem:[%s3223_s3 + $0x18c] sm:$0xf] %vm1683_vm0, %v2104_v52 }

// kernel: mario_forward.4
= control target key start
LH: loop header
LB: loop body
LE: loop exit
PB: predicated region body
PF: predicated region fallthrough
CT: control target
= control target key end

     0   :  { %vm880_vm0 = vcmask 519168   ;;  %vm901_vm1 = vcmask 516096   ;;  %s1637_s1 = inlined_call_operand.vmem [shape: bf16[512,64], index: 1, kind: input, shape index: {}]   ;;  %s1638_s0 = inlined_call_operand.vmem [shape: bf16[162,512], index: 0, kind: input, shape index: {}]   ;;  %s1639_s2 = inlined_call_operand.vmem [shape: f32[1,64], index: 2, kind: input, shape index: {}]   ;;  %s1640_s3 = inlined_call_operand.vmem [shape: bf16[162,64], index: 3, kind: output, shape index: {}]  }
   0x1   :  { %v1190_v0 = vld [vmem:[%s1637_s1 + $0x78] sm:$0xff]   ;;  %v1194_v4 = vld [vmem:[%s1637_s1 + $0x70] sm:$0xff]   ;;  %v1198_v8 = vld [vmem:[%s1637_s1 + $0x68] sm:$0xff]  }
   0x2   :  { %v1191_v1 = vld [vmem:[%s1637_s1 + $0xf8] sm:$0xff]   ;;  %1026 = vmatprep.subr.bf16.mxu0 %v1190_v0  ;;  %v1195_v5 = vld [vmem:[%s1637_s1 + $0xf0] sm:$0xff]   ;;  %v1199_v9 = vld [vmem:[%s1637_s1 + $0xe8] sm:$0xff]  }
   0x3   :  { %v1192_v2 = vld [vmem:[%s1637_s1 + $0x38] sm:$0xff]   ;;  %1108 = vmatprep.subr.bf16.mxu1 %v1191_v1  ;;  %v1196_v6 = vld [vmem:[%s1637_s1 + $0x30] sm:$0xff]   ;;  %v1200_v10 = vld [vmem:[%s1637_s1 + $0x28] sm:$0xff]  }
   0x4   :  { %v1193_v3 = vld [vmem:[%s1637_s1 + $0xb8] sm:$0xff]   ;;  %1027 = vmatpush3.bf16.msra.mxu0 %v1192_v2  ;;  %v1197_v7 = vld [vmem:[%s1637_s1 + $0xb0] sm:$0xff]   ;;  %v1201_v11 = vld [vmem:[%s1637_s1 + $0xa8] sm:$0xff]  }
   0x5   :  { %1109 = vmatpush3.bf16.msra.mxu1 %v1193_v3  ;;  %1028 = vmatprep.subr.bf16.mxu0 %v1194_v4  ;;  %v1202_v12 = vld [vmem:[%s1637_s1 + $0x60] sm:$0xff]   ;;  %v1206_v16 = vld [vmem:[%s1637_s1 + $0x58] sm:$0xff]   ;;  %v1210_v20 = vld [vmem:[%s1637_s1 + $0x50] sm:$0xff]  }
   0x6   :  { %1110 = vmatprep.subr.bf16.mxu1 %v1195_v5  ;;  %v1203_v13 = vld [vmem:[%s1637_s1 + $0xe0] sm:$0xff]   ;;  %v1207_v17 = vld [vmem:[%s1637_s1 + $0xd8] sm:$0xff]   ;;  %v1211_v21 = vld [vmem:[%s1637_s1 + $0xd0] sm:$0xff]  }
   0x7   :  { %v1204_v14 = vld [vmem:[%s1637_s1 + $0x20] sm:$0xff]   ;;  %v1208_v18 = vld [vmem:[%s1637_s1 + $0x18] sm:$0xff]   ;;  %v1212_v22 = vld [vmem:[%s1637_s1 + $0x10] sm:$0xff]  }
   0x8   :  { %1029 = vmatpush3.bf16.msra.mxu0 %v1196_v6  ;;  %v1205_v15 = vld [vmem:[%s1637_s1 + $0xa0] sm:$0xff]   ;;  %v1209_v19 = vld [vmem:[%s1637_s1 + $0x98] sm:$0xff]   ;;  %v1213_v23 = vld [vmem:[%s1637_s1 + $0x90] sm:$0xff]  }
   0x9   :  { %1111 = vmatpush3.bf16.msra.mxu1 %v1197_v7  ;;  %1030 = vmatprep.subr.bf16.mxu0 %v1198_v8  ;;  %v1214_v24 = vld [vmem:[%s1637_s1 + $0x48] sm:$0xff]   ;;  %v1218_v28 = vld [vmem:[%s1637_s1 + $0x40] sm:$0xff]  }
   0xa   :  { %1112 = vmatprep.subr.bf16.mxu1 %v1199_v9  ;;  %v1215_v25 = vld [vmem:[%s1637_s1 + $0xc8] sm:$0xff]   ;;  %v1219_v29 = vld [vmem:[%s1637_s1 + $0xc0] sm:$0xff]  }
   0xb   :  { %v1216_v26 = vld [vmem:[%s1637_s1 + $0x8] sm:$0xff]   ;;  %v1220_v30 = vld [vmem:[%s1637_s1] sm:$0xff]  }
   0xc   :  { %1031 = vmatpush3.bf16.msra.mxu0 %v1200_v10  ;;  %v1217_v27 = vld [vmem:[%s1637_s1 + $0x88] sm:$0xff]   ;;  %v1221_v31 = vld [vmem:[%s1637_s1 + $0x80] sm:$0xff]  }
   0xd   :  { %1113 = vmatpush3.bf16.msra.mxu1 %v1201_v11  ;;  %1032 = vmatprep.subr.bf16.mxu0 %v1202_v12  ;;  %v1222_v32 = vld [vmem:[%s1638_s0] ss:$16 sps:$4 sm:$0xff]   ;;  %v1224_v33 = vld [vmem:[%s1638_s0 + $0x4] ss:$16 sps:$4 sm:$0xff]   ;;  %v1225_v34 = vld [vmem:[%s1638_s0 + $0x8] ss:$16 sps:$4 sm:$0xff]  }
   0xe   :  { %1114 = vmatprep.subr.bf16.mxu1 %v1203_v13  ;;  %v1227_v35 = vld [vmem:[%s1638_s0 + $0xc] ss:$16 sps:$4 sm:$0xff]   ;;  %566 = vmatprep.mubr.bf16.mxu0 %v1224_v33  ;;  %v1228_v36 = vld [vmem:[%s1638_s0 + $0x24] ss:$16 sps:$4 sm:$0xff]   ;;  %v1232_v38 = vld [vmem:[%s1638_s0 + $0x20] ss:$16 sps:$4 sm:$0xff]  }
   0xf   :  { %686 = vmatprep.mubr.bf16.mxu1 %v1227_v35  ;;  %v1230_v37 = vld [vmem:[%s1638_s0 + $0x2c] ss:$16 sps:$4 sm:$0xff]   ;;  %v1233_v39 = vld [vmem:[%s1638_s0 + $0x28] ss:$16 sps:$4 sm:$0xff]   ;;  %v1234_v40 = vld [vmem:[%s1638_s0 + $0x44] ss:$16 sps:$4 sm:$0xff]  }
  0x10   :  { %1033 = vmatpush3.bf16.msra.mxu0 %v1204_v14  ;;  %v1236_v41 = vld [vmem:[%s1638_s0 + $0x4c] ss:$16 sps:$4 sm:$0xff]   ;;  %v1238_v42 = vld [vmem:[%s1638_s0 + $0x40] ss:$16 sps:$4 sm:$0xff]   ;;  %v1239_v43 = vld [vmem:[%s1638_s0 + $0x48] ss:$16 sps:$4 sm:$0xff]  }
  0x11   :  { %1115 = vmatpush3.bf16.msra.mxu1 %v1205_v15  ;;  %1034 = vmatprep.subr.bf16.mxu0 %v1206_v16  ;;  %v1240_v44 = vld [vmem:[%s1638_s0 + $0x64] ss:$16 sps:$4 sm:$0xff]   ;;  %v1242_v45 = vld [vmem:[%s1638_s0 + $0x6c] ss:$16 sps:$4 sm:$0xff]   ;;  %v1244_v46 = vld [vmem:[%s1638_s0 + $0x60] ss:$16 sps:$4 sm:$0xff]  }
  0x12   :  { %1116 = vmatprep.subr.bf16.mxu1 %v1207_v17  ;;  %v1245_v47 = vld [vmem:[%s1638_s0 + $0x68] ss:$16 sps:$4 sm:$0xff]   ;;  %v1246_v48 = vld [vmem:[%s1638_s0 + $0x84] ss:$16 sps:$4 sm:$0xff]   ;;  %v1248_v49 = vld [vmem:[%s1638_s0 + $0x8c] ss:$16 sps:$4 sm:$0xff]  }
  0x13   :  { %v1250_v50 = vld [vmem:[%s1638_s0 + $0x80] ss:$16 sps:$4 sm:$0xff]   ;;  %v1251_v51 = vld [vmem:[%s1638_s0 + $0x88] ss:$16 sps:$4 sm:$0xff]   ;;  %v1252_v52 = vld [vmem:[%s1638_s0 + $0xa4] ss:$16 sps:$4 sm:$0xff]  }
  0x14   :  { %1035 = vmatpush3.bf16.msra.mxu0 %v1208_v18  ;;  %v1254_v53 = vld [vmem:[%s1638_s0 + $0xac] ss:$16 sps:$4 sm:$0xff]   ;;  %v1256_v54 = vld [vmem:[%s1638_s0 + $0xa0] ss:$16 sps:$4 sm:$0xff]   ;;  %v1257_v55 = vld [vmem:[%s1638_s0 + $0xa8] ss:$16 sps:$4 sm:$0xff]  }
  0x15   :  { %1117 = vmatpush3.bf16.msra.mxu1 %v1209_v19  ;;  %1036 = vmatprep.subr.bf16.mxu0 %v1210_v20  ;;  %v1258_v56 = vld [vmem:[%s1638_s0 + $0xc4] ss:$16 sps:$4 sm:$0xff]   ;;  %v1260_v57 = vld [vmem:[%s1638_s0 + $0xcc] ss:$16 sps:$4 sm:$0xff]   ;;  %v1262_v58 = vld [vmem:[%s1638_s0 + $0xc0] ss:$16 sps:$4 sm:$0xff]  }
  0x16   :  { %1118 = vmatprep.subr.bf16.mxu1 %v1211_v21  ;;  %v1263_v59 = vld [vmem:[%s1638_s0 + $0xc8] ss:$16 sps:$4 sm:$0xff]   ;;  %v1264_v60 = vld [vmem:[%s1638_s0 + $0xe4] ss:$16 sps:$4 sm:$0xff]   ;;  %v1266_v61 = vld [vmem:[%s1638_s0 + $0xec] ss:$16 sps:$4 sm:$0xff]  }
  0x17   :  { %v1268_v62 = vld [vmem:[%s1638_s0 + $0xe0] ss:$16 sps:$4 sm:$0xff]   ;;  %v1269_v63 = vld [vmem:[%s1638_s0 + $0xe8] ss:$16 sps:$4 sm:$0xff]   ;;  %v1270_v0 = vld [vmem:[%s1638_s0 + $0x104] ss:$16 sps:$4 sm:$0xff]  }
  0x18   :  { %1037 = vmatpush3.bf16.msra.mxu0 %v1212_v22  ;;  %v1272_v1 = vld [vmem:[%s1638_s0 + $0x10c] ss:$16 sps:$4 sm:$0xff]   ;;  %v1274_v2 = vld [vmem:[%s1638_s0 + $0x100] ss:$16 sps:$4 sm:$0xff]   ;;  %v1275_v3 = vld [vmem:[%s1638_s0 + $0x108] ss:$16 sps:$4 sm:$0xff]  }
  0x19   :  { %1119 = vmatpush3.bf16.msra.mxu1 %v1213_v23  ;;  %1038 = vmatprep.subr.bf16.mxu0 %v1214_v24  ;;  %v1276_v4 = vld [vmem:[%s1638_s0 + $0x124] ss:$16 sps:$4 sm:$0xff]   ;;  %v1278_v5 = vld [vmem:[%s1638_s0 + $0x12c] ss:$16 sps:$4 sm:$0xff]   ;;  %v1280_v8 = vld [vmem:[%s1638_s0 + $0x120] ss:$16 sps:$4 sm:$0xff]  }
  0x1a   :  { %1120 = vmatprep.subr.bf16.mxu1 %v1215_v25  ;;  %v55_v6 = vld [vmem:[%s1638_s0 + $0x140] sm:$0x11]  ;;  %v56_v7 = vld [vmem:[%s1638_s0 + $0x148] sm:$0x11] }
  0x1b   :  { %v1281_v9 = vld [vmem:[%s1638_s0 + $0x128] ss:$16 sps:$4 sm:$0xff]   ;;  %v949_v10 = vcombine.high %v55_v6, %v55_v6  ;;  %v951_v11 = vcombine.high %v56_v7, %v56_v7  ;;  %v948_v12 = vcombine.low %v55_v6, %v55_v6  ;;  %v950_v13 = vcombine.low %v56_v7, %v56_v7  ;;  %v1531_v16 = vld [vmem:[%s1639_s2] ss:$0 sm:$0xff] }
  0x1c   :  { %1039 = vmatpush3.bf16.msra.mxu0 %v1216_v26 }
  0x1d   :  { %1121 = vmatpush3.bf16.msra.mxu1 %v1217_v27  ;;  %1040 = vmatprep.subr.bf16.mxu0 %v1218_v28 }
  0x1e   :  { %1122 = vmatprep.subr.bf16.mxu1 %v1219_v29 }
  0x20   :  { %1041 = vmatpush3.bf16.msra.mxu0 %v1220_v30 }
  0x21   :  { %1123 = vmatpush3.bf16.msra.mxu1 %v1221_v31 }
  0x23   :  { %567 = vmatmul.mubr.bf16.vlgmr.msra.gmra.mxu0 %v1222_v32 }
  0x24   :  { %687 = vmatmul.mubr.bf16.vlgmr.msra.gmra.mxu1 %v1225_v34  ;;  %574 = vmatprep.mubr.bf16.mxu0 %v1228_v36 }
  0x25   :  { %694 = vmatprep.mubr.bf16.mxu1 %v1230_v37 }
  0x2b   :  { %575 = vmatmul.mubr.bf16.gmra.mxu0 %v1232_v38 }
  0x2c   :  { %695 = vmatmul.mubr.bf16.gmra.mxu1 %v1233_v39  ;;  %582 = vmatprep.mubr.bf16.mxu0 %v1234_v40 }
  0x2d   :  { %702 = vmatprep.mubr.bf16.mxu1 %v1236_v41 }
  0x33   :  { %583 = vmatmul.mubr.bf16.gmra.mxu0 %v1238_v42 }
  0x34   :  { %703 = vmatmul.mubr.bf16.gmra.mxu1 %v1239_v43  ;;  %590 = vmatprep.mubr.bf16.mxu0 %v1240_v44 }
  0x35   :  { %710 = vmatprep.mubr.bf16.mxu1 %v1242_v45 }
  0x3b   :  { %591 = vmatmul.mubr.bf16.gmra.mxu0 %v1244_v46 }
  0x3c   :  { %711 = vmatmul.mubr.bf16.gmra.mxu1 %v1245_v47  ;;  %598 = vmatprep.mubr.bf16.mxu0 %v1246_v48 }
  0x3d   :  { %718 = vmatprep.mubr.bf16.mxu1 %v1248_v49 }
  0x43   :  { %599 = vmatmul.mubr.bf16.gmra.mxu0 %v1250_v50 }
  0x44   :  { %719 = vmatmul.mubr.bf16.gmra.mxu1 %v1251_v51  ;;  %606 = vmatprep.mubr.bf16.mxu0 %v1252_v52 }
  0x45   :  { %726 = vmatprep.mubr.bf16.mxu1 %v1254_v53 }
  0x4b   :  { %607 = vmatmul.mubr.bf16.gmra.mxu0 %v1256_v54 }
  0x4c   :  { %727 = vmatmul.mubr.bf16.gmra.mxu1 %v1257_v55  ;;  %614 = vmatprep.mubr.bf16.mxu0 %v1258_v56 }
  0x4d   :  { %734 = vmatprep.mubr.bf16.mxu1 %v1260_v57 }
  0x53   :  { %615 = vmatmul.mubr.bf16.gmra.mxu0 %v1262_v58 }
  0x54   :  { %735 = vmatmul.mubr.bf16.gmra.mxu1 %v1263_v59  ;;  %622 = vmatprep.mubr.bf16.mxu0 %v1264_v60 }
  0x55   :  { %742 = vmatprep.mubr.bf16.mxu1 %v1266_v61 }
  0x5b   :  { %623 = vmatmul.mubr.bf16.gmra.mxu0 %v1268_v62 }
  0x5c   :  { %743 = vmatmul.mubr.bf16.gmra.mxu1 %v1269_v63  ;;  %630 = vmatprep.mubr.bf16.mxu0 %v1270_v0 }
  0x5d   :  { %750 = vmatprep.mubr.bf16.mxu1 %v1272_v1 }
  0x63   :  { %631 = vmatmul.mubr.bf16.gmra.mxu0 %v1274_v2 }
  0x64   :  { %751 = vmatmul.mubr.bf16.gmra.mxu1 %v1275_v3  ;;  %638 = vmatprep.mubr.bf16.mxu0 %v1276_v4 }
  0x65   :  { %758 = vmatprep.mubr.bf16.mxu1 %v1278_v5 }
  0x6b   :  { %639 = vmatmul.mubr.bf16.gmra.mxu0 %v1280_v8 }
  0x6c   :  { %759 = vmatmul.mubr.bf16.gmra.mxu1 %v1281_v9  ;;  %646 = vmatprep.mubr.bf16.mxu0 %v949_v10 }
  0x6d   :  { %766 = vmatprep.mubr.bf16.mxu1 %v951_v11 }
  0x73   :  { %647 = vmatmul.mubr.bf16.gmra.mxu0 %v948_v12 }
  0x74   :  { %767 = vmatmul.mubr.bf16.gmra.mxu1 %v950_v13 }
  0xe3   :  { %v1042_v14 = vpop.f32.mrf.mxu0 }
  0xe4   :  { %v1124_v15 = vpop.f32.mrf.mxu1 }
  0xe5   :  { %v1043_v17 = vpop.f32.mrf.mxu0 }
  0xe6   :  { %v1044_v18 = vadd.f32 %v1043_v17, %v1042_v14  ;;  %v1125_v19 = vpop.f32.mrf.mxu1 }
  0xe7   :  { %v1045_v20 = vpop.f32.mrf.mxu0  ;;  %v1126_v22 = vadd.f32 %v1125_v19, %v1124_v15 }
  0xe8   :  { %v569_v21 = vadd.f32 %v1044_v18, %v1531_v16  ;;  %v1127_v23 = vpop.f32.mrf.mxu1 }
  0xe9   :  { %v1046_v24 = vpop.f32.mrf.mxu0 }
  0xea   :  { %v689_v25 = vadd.f32 %v1126_v22, %v569_v21  ;;  %v1047_v26 = vadd.f32 %v1046_v24, %v1045_v20  ;;  %v1128_v27 = vpop.f32.mrf.mxu1 }
  0xeb   :  { %v1048_v28 = vpop.f32.mrf.mxu0  ;;  %v1129_v31 = vadd.f32 %v1128_v27, %v1127_v23 }
  0xec   :  { %v774_v29 = vmax.f32 %v689_v25, 0.0  ;;  %v572_v30 = vadd.f32 %v1047_v26, %v1531_v16  ;;  %v1130_v32 = vpop.f32.mrf.mxu1 }
  0xed   :  { %v1049_v33 = vpop.f32.mrf.mxu0 }
  0xee   :  { %v1005_v34 = vpack.c.bf16 %v774_v29, %v774_v29  ;;  %v692_v35 = vadd.f32 %v1129_v31, %v572_v30  ;;  %v1050_v36 = vadd.f32 %v1049_v33, %v1048_v28  ;;  %v1131_v37 = vpop.f32.mrf.mxu1 }
  0xef   :  { %v1051_v38 = vpop.f32.mrf.mxu0  ;;  %v1132_v41 = vadd.f32 %v1131_v37, %v1130_v32 }
  0xf0   :  { %881 = vst.msk [vmem:[%s1640_s3] sm:$0xf] %vm880_vm0, %v1005_v34  ;;  %v775_v39 = vmax.f32 %v692_v35, 0.0  ;;  %v577_v40 = vadd.f32 %v1050_v36, %v1531_v16  ;;  %v1133_v42 = vpop.f32.mrf.mxu1 }
  0xf1   :  { %v1052_v43 = vpop.f32.mrf.mxu0 }
  0xf2   :  { %v1006_v44 = vpack.c.bf16 %v775_v39, %v775_v39  ;;  %v697_v45 = vadd.f32 %v1132_v41, %v577_v40  ;;  %v1053_v46 = vadd.f32 %v1052_v43, %v1051_v38  ;;  %v1134_v47 = vpop.f32.mrf.mxu1 }
  0xf3   :  { %v1054_v48 = vpop.f32.mrf.mxu0  ;;  %v1135_v51 = vadd.f32 %v1134_v47, %v1133_v42 }
  0xf4   :  { %882 = vst.msk [vmem:[%s1640_s3 + $0x4] sm:$0xf] %vm880_vm0, %v1006_v44  ;;  %v776_v49 = vmax.f32 %v697_v45, 0.0  ;;  %v580_v50 = vadd.f32 %v1053_v46, %v1531_v16  ;;  %v1136_v52 = vpop.f32.mrf.mxu1 }
  0xf5   :  { %v1055_v53 = vpop.f32.mrf.mxu0 }
  0xf6   :  { %v1007_v54 = vpack.c.bf16 %v776_v49, %v776_v49  ;;  %v700_v55 = vadd.f32 %v1135_v51, %v580_v50  ;;  %v1056_v56 = vadd.f32 %v1055_v53, %v1054_v48  ;;  %v1137_v57 = vpop.f32.mrf.mxu1 }
  0xf7   :  { %v1057_v58 = vpop.f32.mrf.mxu0  ;;  %v1138_v61 = vadd.f32 %v1137_v57, %v1136_v52 }
  0xf8   :  { %883 = vst.msk [vmem:[%s1640_s3 + $0x8] sm:$0xf] %vm880_vm0, %v1007_v54  ;;  %v777_v59 = vmax.f32 %v700_v55, 0.0  ;;  %v585_v60 = vadd.f32 %v1056_v56, %v1531_v16  ;;  %v1139_v62 = vpop.f32.mrf.mxu1 }
  0xf9   :  { %v1058_v63 = vpop.f32.mrf.mxu0 }
  0xfa   :  { %v1008_v0 = vpack.c.bf16 %v777_v59, %v777_v59  ;;  %v705_v1 = vadd.f32 %v1138_v61, %v585_v60  ;;  %v1059_v2 = vadd.f32 %v1058_v63, %v1057_v58  ;;  %v1140_v3 = vpop.f32.mrf.mxu1 }
  0xfb   :  { %v1060_v4 = vpop.f32.mrf.mxu0  ;;  %v1141_v7 = vadd.f32 %v1140_v3, %v1139_v62 }
  0xfc   :  { %884 = vst.msk [vmem:[%s1640_s3 + $0xc] sm:$0xf] %vm880_vm0, %v1008_v0  ;;  %v778_v5 = vmax.f32 %v705_v1, 0.0  ;;  %v588_v6 = vadd.f32 %v1059_v2, %v1531_v16  ;;  %v1142_v8 = vpop.f32.mrf.mxu1 }
  0xfd   :  { %v1061_v9 = vpop.f32.mrf.mxu0 }
  0xfe   :  { %v1009_v10 = vpack.c.bf16 %v778_v5, %v778_v5  ;;  %v708_v11 = vadd.f32 %v1141_v7, %v588_v6  ;;  %v1062_v12 = vadd.f32 %v1061_v9, %v1060_v4  ;;  %v1143_v13 = vpop.f32.mrf.mxu1 }
  0xff   :  { %v1063_v14 = vpop.f32.mrf.mxu0  ;;  %v1144_v18 = vadd.f32 %v1143_v13, %v1142_v8 }
 0x100   :  { %885 = vst.msk [vmem:[%s1640_s3 + $0x10] sm:$0xf] %vm880_vm0, %v1009_v10  ;;  %v779_v15 = vmax.f32 %v708_v11, 0.0  ;;  %v593_v17 = vadd.f32 %v1062_v12, %v1531_v16  ;;  %v1145_v19 = vpop.f32.mrf.mxu1 }
 0x101   :  { %v1064_v20 = vpop.f32.mrf.mxu0 }
 0x102   :  { %v1010_v21 = vpack.c.bf16 %v779_v15, %v779_v15  ;;  %v713_v22 = vadd.f32 %v1144_v18, %v593_v17  ;;  %v1065_v23 = vadd.f32 %v1064_v20, %v1063_v14  ;;  %v1146_v24 = vpop.f32.mrf.mxu1 }
 0x103   :  { %v1066_v25 = vpop.f32.mrf.mxu0  ;;  %v1147_v28 = vadd.f32 %v1146_v24, %v1145_v19 }
 0x104   :  { %886 = vst.msk [vmem:[%s1640_s3 + $0x14] sm:$0xf] %vm880_vm0, %v1010_v21  ;;  %v780_v26 = vmax.f32 %v713_v22, 0.0  ;;  %v596_v27 = vadd.f32 %v1065_v23, %v1531_v16  ;;  %v1148_v29 = vpop.f32.mrf.mxu1 }
 0x105   :  { %v1067_v30 = vpop.f32.mrf.mxu0 }
 0x106   :  { %v1011_v31 = vpack.c.bf16 %v780_v26, %v780_v26  ;;  %v716_v32 = vadd.f32 %v1147_v28, %v596_v27  ;;  %v1068_v33 = vadd.f32 %v1067_v30, %v1066_v25  ;;  %v1149_v34 = vpop.f32.mrf.mxu1 }
 0x107   :  { %v1069_v35 = vpop.f32.mrf.mxu0  ;;  %v1150_v38 = vadd.f32 %v1149_v34, %v1148_v29 }
 0x108   :  { %887 = vst.msk [vmem:[%s1640_s3 + $0x18] sm:$0xf] %vm880_vm0, %v1011_v31  ;;  %v781_v36 = vmax.f32 %v716_v32, 0.0  ;;  %v601_v37 = vadd.f32 %v1068_v33, %v1531_v16  ;;  %v1151_v39 = vpop.f32.mrf.mxu1 }
 0x109   :  { %v1070_v40 = vpop.f32.mrf.mxu0 }
 0x10a   :  { %v1012_v41 = vpack.c.bf16 %v781_v36, %v781_v36  ;;  %v721_v42 = vadd.f32 %v1150_v38, %v601_v37  ;;  %v1071_v43 = vadd.f32 %v1070_v40, %v1069_v35  ;;  %v1152_v44 = vpop.f32.mrf.mxu1 }
 0x10b   :  { %v1072_v45 = vpop.f32.mrf.mxu0  ;;  %v1153_v48 = vadd.f32 %v1152_v44, %v1151_v39 }
 0x10c   :  { %888 = vst.msk [vmem:[%s1640_s3 + $0x1c] sm:$0xf] %vm880_vm0, %v1012_v41  ;;  %v782_v46 = vmax.f32 %v721_v42, 0.0  ;;  %v604_v47 = vadd.f32 %v1071_v43, %v1531_v16  ;;  %v1154_v49 = vpop.f32.mrf.mxu1 }
 0x10d   :  { %v1073_v50 = vpop.f32.mrf.mxu0 }
 0x10e   :  { %v1013_v51 = vpack.c.bf16 %v782_v46, %v782_v46  ;;  %v724_v52 = vadd.f32 %v1153_v48, %v604_v47  ;;  %v1074_v53 = vadd.f32 %v1073_v50, %v1072_v45  ;;  %v1155_v54 = vpop.f32.mrf.mxu1 }
 0x10f   :  { %v1075_v55 = vpop.f32.mrf.mxu0  ;;  %v1156_v58 = vadd.f32 %v1155_v54, %v1154_v49 }
 0x110   :  { %889 = vst.msk [vmem:[%s1640_s3 + $0x20] sm:$0xf] %vm880_vm0, %v1013_v51  ;;  %v783_v56 = vmax.f32 %v724_v52, 0.0  ;;  %v609_v57 = vadd.f32 %v1074_v53, %v1531_v16  ;;  %v1157_v59 = vpop.f32.mrf.mxu1 }
 0x111   :  { %v1076_v60 = vpop.f32.mrf.mxu0 }
 0x112   :  { %v1014_v61 = vpack.c.bf16 %v783_v56, %v783_v56  ;;  %v729_v62 = vadd.f32 %v1156_v58, %v609_v57  ;;  %v1077_v63 = vadd.f32 %v1076_v60, %v1075_v55  ;;  %v1158_v0 = vpop.f32.mrf.mxu1 }
 0x113   :  { %v1078_v1 = vpop.f32.mrf.mxu0  ;;  %v1159_v4 = vadd.f32 %v1158_v0, %v1157_v59 }
 0x114   :  { %890 = vst.msk [vmem:[%s1640_s3 + $0x24] sm:$0xf] %vm880_vm0, %v1014_v61  ;;  %v784_v2 = vmax.f32 %v729_v62, 0.0  ;;  %v612_v3 = vadd.f32 %v1077_v63, %v1531_v16  ;;  %v1160_v5 = vpop.f32.mrf.mxu1 }
 0x115   :  { %v1079_v6 = vpop.f32.mrf.mxu0 }
 0x116   :  { %v1015_v7 = vpack.c.bf16 %v784_v2, %v784_v2  ;;  %v732_v8 = vadd.f32 %v1159_v4, %v612_v3  ;;  %v1080_v9 = vadd.f32 %v1079_v6, %v1078_v1  ;;  %v1161_v10 = vpop.f32.mrf.mxu1 }
 0x117   :  { %v1081_v11 = vpop.f32.mrf.mxu0  ;;  %v1162_v14 = vadd.f32 %v1161_v10, %v1160_v5 }
 0x118   :  { %891 = vst.msk [vmem:[%s1640_s3 + $0x28] sm:$0xf] %vm880_vm0, %v1015_v7  ;;  %v785_v12 = vmax.f32 %v732_v8, 0.0  ;;  %v617_v13 = vadd.f32 %v1080_v9, %v1531_v16  ;;  %v1163_v15 = vpop.f32.mrf.mxu1 }
 0x119   :  { %v1082_v17 = vpop.f32.mrf.mxu0 }
 0x11a   :  { %v1016_v18 = vpack.c.bf16 %v785_v12, %v785_v12  ;;  %v737_v19 = vadd.f32 %v1162_v14, %v617_v13  ;;  %v1083_v20 = vadd.f32 %v1082_v17, %v1081_v11  ;;  %v1164_v21 = vpop.f32.mrf.mxu1 }
 0x11b   :  { %v1084_v22 = vpop.f32.mrf.mxu0  ;;  %v1165_v25 = vadd.f32 %v1164_v21, %v1163_v15 }
 0x11c   :  { %892 = vst.msk [vmem:[%s1640_s3 + $0x2c] sm:$0xf] %vm880_vm0, %v1016_v18  ;;  %v786_v23 = vmax.f32 %v737_v19, 0.0  ;;  %v620_v24 = vadd.f32 %v1083_v20, %v1531_v16  ;;  %v1166_v26 = vpop.f32.mrf.mxu1 }
 0x11d   :  { %v1085_v27 = vpop.f32.mrf.mxu0 }
 0x11e   :  { %v1017_v28 = vpack.c.bf16 %v786_v23, %v786_v23  ;;  %v740_v29 = vadd.f32 %v1165_v25, %v620_v24  ;;  %v1086_v30 = vadd.f32 %v1085_v27, %v1084_v22  ;;  %v1167_v31 = vpop.f32.mrf.mxu1 }
 0x11f   :  { %v1087_v32 = vpop.f32.mrf.mxu0  ;;  %v1168_v35 = vadd.f32 %v1167_v31, %v1166_v26 }
 0x120   :  { %893 = vst.msk [vmem:[%s1640_s3 + $0x30] sm:$0xf] %vm880_vm0, %v1017_v28  ;;  %v787_v33 = vmax.f32 %v740_v29, 0.0  ;;  %v625_v34 = vadd.f32 %v1086_v30, %v1531_v16  ;;  %v1169_v36 = vpop.f32.mrf.mxu1 }
 0x121   :  { %v1088_v37 = vpop.f32.mrf.mxu0 }
 0x122   :  { %v1018_v38 = vpack.c.bf16 %v787_v33, %v787_v33  ;;  %v745_v39 = vadd.f32 %v1168_v35, %v625_v34  ;;  %v1089_v40 = vadd.f32 %v1088_v37, %v1087_v32  ;;  %v1170_v41 = vpop.f32.mrf.mxu1 }
 0x123   :  { %v1090_v42 = vpop.f32.mrf.mxu0  ;;  %v1171_v45 = vadd.f32 %v1170_v41, %v1169_v36 }
 0x124   :  { %894 = vst.msk [vmem:[%s1640_s3 + $0x34] sm:$0xf] %vm880_vm0, %v1018_v38  ;;  %v788_v43 = vmax.f32 %v745_v39, 0.0  ;;  %v628_v44 = vadd.f32 %v1089_v40, %v1531_v16  ;;  %v1172_v46 = vpop.f32.mrf.mxu1 }
 0x125   :  { %v1091_v47 = vpop.f32.mrf.mxu0 }
 0x126   :  { %v1019_v48 = vpack.c.bf16 %v788_v43, %v788_v43  ;;  %v748_v49 = vadd.f32 %v1171_v45, %v628_v44  ;;  %v1092_v50 = vadd.f32 %v1091_v47, %v1090_v42  ;;  %v1173_v51 = vpop.f32.mrf.mxu1 }
 0x127   :  { %v1093_v52 = vpop.f32.mrf.mxu0  ;;  %v1174_v55 = vadd.f32 %v1173_v51, %v1172_v46 }
 0x128   :  { %895 = vst.msk [vmem:[%s1640_s3 + $0x38] sm:$0xf] %vm880_vm0, %v1019_v48  ;;  %v789_v53 = vmax.f32 %v748_v49, 0.0  ;;  %v633_v54 = vadd.f32 %v1092_v50, %v1531_v16  ;;  %v1175_v56 = vpop.f32.mrf.mxu1 }
 0x129   :  { %v1094_v57 = vpop.f32.mrf.mxu0 }
 0x12a   :  { %v1020_v58 = vpack.c.bf16 %v789_v53, %v789_v53  ;;  %v753_v59 = vadd.f32 %v1174_v55, %v633_v54  ;;  %v1095_v60 = vadd.f32 %v1094_v57, %v1093_v52  ;;  %v1176_v61 = vpop.f32.mrf.mxu1 }
 0x12b   :  { %v1096_v62 = vpop.f32.mrf.mxu0  ;;  %v1177_v1 = vadd.f32 %v1176_v61, %v1175_v56 }
 0x12c   :  { %896 = vst.msk [vmem:[%s1640_s3 + $0x3c] sm:$0xf] %vm880_vm0, %v1020_v58  ;;  %v790_v63 = vmax.f32 %v753_v59, 0.0  ;;  %v636_v0 = vadd.f32 %v1095_v60, %v1531_v16  ;;  %v1178_v2 = vpop.f32.mrf.mxu1 }
 0x12d   :  { %v1097_v3 = vpop.f32.mrf.mxu0 }
 0x12e   :  { %v1021_v4 = vpack.c.bf16 %v790_v63, %v790_v63  ;;  %v756_v5 = vadd.f32 %v1177_v1, %v636_v0  ;;  %v1098_v6 = vadd.f32 %v1097_v3, %v1096_v62  ;;  %v1179_v7 = vpop.f32.mrf.mxu1 }
 0x12f   :  { %v1099_v8 = vpop.f32.mrf.mxu0  ;;  %v1180_v11 = vadd.f32 %v1179_v7, %v1178_v2 }
 0x130   :  { %897 = vst.msk [vmem:[%s1640_s3 + $0x40] sm:$0xf] %vm880_vm0, %v1021_v4  ;;  %v791_v9 = vmax.f32 %v756_v5, 0.0  ;;  %v641_v10 = vadd.f32 %v1098_v6, %v1531_v16  ;;  %v1181_v12 = vpop.f32.mrf.mxu1 }
 0x131   :  { %v1100_v13 = vpop.f32.mrf.mxu0 }
 0x132   :  { %v1022_v14 = vpack.c.bf16 %v791_v9, %v791_v9  ;;  %v761_v15 = vadd.f32 %v1180_v11, %v641_v10  ;;  %v1101_v17 = vadd.f32 %v1100_v13, %v1099_v8  ;;  %v1182_v18 = vpop.f32.mrf.mxu1 }
 0x133   :  { %v1102_v19 = vpop.f32.mrf.mxu0  ;;  %v1183_v22 = vadd.f32 %v1182_v18, %v1181_v12 }
 0x134   :  { %898 = vst.msk [vmem:[%s1640_s3 + $0x44] sm:$0xf] %vm880_vm0, %v1022_v14  ;;  %v792_v20 = vmax.f32 %v761_v15, 0.0  ;;  %v644_v21 = vadd.f32 %v1101_v17, %v1531_v16  ;;  %v1184_v23 = vpop.f32.mrf.mxu1 }
 0x135   :  { %v1103_v24 = vpop.f32.mrf.mxu0 }
 0x136   :  { %v1023_v25 = vpack.c.bf16 %v792_v20, %v792_v20  ;;  %v764_v26 = vadd.f32 %v1183_v22, %v644_v21  ;;  %v1104_v27 = vadd.f32 %v1103_v24, %v1102_v19  ;;  %v1185_v28 = vpop.f32.mrf.mxu1 }
 0x137   :  { %v1105_v29 = vpop.f32.mrf.mxu0  ;;  %v1186_v32 = vadd.f32 %v1185_v28, %v1184_v23 }
 0x138   :  { %899 = vst.msk [vmem:[%s1640_s3 + $0x48] sm:$0xf] %vm880_vm0, %v1023_v25  ;;  %v793_v30 = vmax.f32 %v764_v26, 0.0  ;;  %v649_v31 = vadd.f32 %v1104_v27, %v1531_v16  ;;  %v1187_v33 = vpop.f32.mrf.mxu1 }
 0x139   :  { %v1106_v34 = vpop.f32.mrf.mxu0 }
 0x13a   :  { %v1024_v35 = vpack.c.bf16 %v793_v30, %v793_v30  ;;  %v769_v36 = vadd.f32 %v1186_v32, %v649_v31  ;;  %v1188_v37 = vpop.f32.mrf.mxu1 }
 0x13c   :  { %900 = vst.msk [vmem:[%s1640_s3 + $0x4c] sm:$0xf] %vm880_vm0, %v1024_v35  ;;  %v794_v38 = vmax.f32 %v769_v36, 0.0 }
 0x13e   :  { %v1025_v39 = vpack.c.bf16 %v794_v38, %v794_v38 }
 0x140   :  { %902 = vst.msk [vmem:[%s1640_s3 + $0x50] sm:$0x1] %vm901_vm1, %v1025_v39 }

// kernel: mario_forward.5
= control target key start
LH: loop header
LB: loop body
LE: loop exit
PB: predicated region body
PF: predicated region fallthrough
CT: control target
= control target key end

     0   :  { %12 = vsyncpa [#allocation3], 0  ;;  %s1886_s9 = smov 0   ;;  %s2160_s0 = inlined_call_operand.vmem [shape: bf16[49,2,576], index: 0, kind: input, shape index: {}]   ;;  %s2161_s1 = inlined_call_operand.vmem [shape: bf16[576,64], index: 1, kind: input, shape index: {}]   ;;  %s2162_s2 = inlined_call_operand.vmem [shape: f32[1,64], index: 2, kind: input, shape index: {}]   ;;  %s2163_s3 = inlined_call_operand.vmem [shape: bf16[49,64,512], index: 3, kind: input, shape index: {}]   ;;  %s2164_s4 = inlined_call_operand.vmem [shape: f32[1,512], index: 4, kind: input, shape index: {}]   ;;  %s2165_s5 = inlined_call_operand.vmem [shape: bf16[512,128], index: 5, kind: input, shape index: {}]   ;;  %s2166_s6 = inlined_call_operand.vmem [shape: f32[1,128], index: 6, kind: input, shape index: {}]   ;;  %s2167_s7 = inlined_call_operand.hbm [shape: f32[2,128], index: 7, kind: output, shape index: {}]  }
   0x1   :  { %v1516_v0 = vld [vmem:[%s2161_s1] sm:$0xf]  ;;  %v1521_v1 = vld [vmem:[%s2161_s1 + $0x4] sm:$0xf]  ;;  %v1526_v2 = vld [vmem:[%s2161_s1 + $0x8] sm:$0xf] }
   0x2   :  { %2168 = vst [vmem:[#allocation5_spill] sm:$0xff] %v1516_v0  ;;  %2169 = vst [vmem:[#allocation6_spill] sm:$0xff] %v1521_v1  ;;  %v1531_v3 = vld [vmem:[%s2161_s1 + $0xc] sm:$0xf]  ;;  %v1536_v4 = vld [vmem:[%s2161_s1 + $0x10] sm:$0xf] }
   0x3   :  { %2170 = vst [vmem:[#allocation7_spill] sm:$0xff] %v1526_v2  ;;  %2171 = vst [vmem:[#allocation8_spill] sm:$0xff] %v1531_v3  ;;  %v1541_v5 = vld [vmem:[%s2161_s1 + $0x14] sm:$0xf]  ;;  %v1546_v6 = vld [vmem:[%s2161_s1 + $0x18] sm:$0xf] }
   0x4   :  { %2172 = vst [vmem:[#allocation9_spill] sm:$0xff] %v1536_v4  ;;  %2173 = vst [vmem:[#allocation10_spill] sm:$0xff] %v1541_v5  ;;  %v1551_v7 = vld [vmem:[%s2161_s1 + $0x1c] sm:$0xf]  ;;  %v1556_v8 = vld [vmem:[%s2161_s1 + $0x20] sm:$0xf] }
   0x5   :  { %2174 = vst [vmem:[#allocation11_spill] sm:$0xff] %v1546_v6  ;;  %2175 = vst [vmem:[#allocation12_spill] sm:$0xff] %v1551_v7  ;;  %v1561_v9 = vld [vmem:[%s2161_s1 + $0x24] sm:$0xf]  ;;  %v1566_v10 = vld [vmem:[%s2161_s1 + $0x28] sm:$0xf] }
   0x6   :  { %2176 = vst [vmem:[#allocation13_spill] sm:$0xff] %v1556_v8  ;;  %2177 = vst [vmem:[#allocation14_spill] sm:$0xff] %v1561_v9  ;;  %v1571_v11 = vld [vmem:[%s2161_s1 + $0x2c] sm:$0xf]  ;;  %v1576_v12 = vld [vmem:[%s2161_s1 + $0x30] sm:$0xf] }
   0x7   :  { %2178 = vst [vmem:[#allocation15_spill] sm:$0xff] %v1576_v12  ;;  %v1581_v13 = vld [vmem:[%s2161_s1 + $0x34] sm:$0xf]  ;;  %v1586_v14 = vld [vmem:[%s2161_s1 + $0x38] sm:$0xf] }
   0x8   :  { %2179 = vst [vmem:[#allocation16_spill] sm:$0xff] %v1581_v13  ;;  %2180 = vst [vmem:[#allocation17_spill] sm:$0xff] %v1586_v14  ;;  %v1591_v15 = vld [vmem:[%s2161_s1 + $0x3c] sm:$0xf]  ;;  %v1596_v16 = vld [vmem:[%s2161_s1 + $0x40] sm:$0xf] }
   0x9   :  { %2181 = vst [vmem:[#allocation18_spill] sm:$0xff] %v1591_v15  ;;  %2182 = vst [vmem:[#allocation19_spill] sm:$0xff] %v1596_v16  ;;  %v1601_v17 = vld [vmem:[%s2161_s1 + $0x44] sm:$0xf]  ;;  %v1606_v18 = vld [vmem:[%s2161_s1 + $0x48] sm:$0xf] }
   0xa   :  { %v1611_v19 = vld [vmem:[%s2161_s1 + $0x4c] sm:$0xf]  ;;  %v1616_v20 = vld [vmem:[%s2161_s1 + $0x50] sm:$0xf]  ;;  %v1621_v21 = vld [vmem:[%s2161_s1 + $0x54] sm:$0xf] }
   0xb   :  { %v1626_v22 = vld [vmem:[%s2161_s1 + $0x58] sm:$0xf]  ;;  %v1631_v23 = vld [vmem:[%s2161_s1 + $0x5c] sm:$0xf]  ;;  %v1636_v24 = vld [vmem:[%s2161_s1 + $0x60] sm:$0xf] }
   0xc   :  { %v1641_v25 = vld [vmem:[%s2161_s1 + $0x64] sm:$0xf]  ;;  %v1646_v26 = vld [vmem:[%s2161_s1 + $0x68] sm:$0xf]  ;;  %v1651_v27 = vld [vmem:[%s2161_s1 + $0x6c] sm:$0xf] }
   0xd   :  { %2183 = vst [vmem:[#allocation20_spill] sm:$0xff] %v1646_v26  ;;  %v1656_v28 = vld [vmem:[%s2161_s1 + $0x70] sm:$0xf]  ;;  %v1661_v29 = vld [vmem:[%s2161_s1 + $0x74] sm:$0xf]  ;;  %v1884_v16 = vmov 0.0  }
   0xe   :  { %v1666_v30 = vld [vmem:[%s2161_s1 + $0x78] sm:$0xf]  ;;  %v1671_v31 = vld [vmem:[%s2161_s1 + $0x7c] sm:$0xf]  ;;  %v1676_v32 = vld [vmem:[%s2161_s1 + $0x80] sm:$0xf] }
   0xf   :  { %2184 = vst [vmem:[#allocation21_spill] sm:$0xff] %v1666_v30  ;;  %2185 = vst [vmem:[#allocation22_spill] sm:$0xff] %v1671_v31  ;;  %v1681_v33 = vld [vmem:[%s2161_s1 + $0x84] sm:$0xf]  ;;  %v1686_v34 = vld [vmem:[%s2161_s1 + $0x88] sm:$0xf] }
  0x10   :  { %2186 = vst [vmem:[#allocation23_spill] sm:$0xff] %v1676_v32  ;;  %2187 = vst [vmem:[#allocation24_spill] sm:$0xff] %v1681_v33  ;;  %v1691_v35 = vld [vmem:[%s2161_s1 + $0x8c] sm:$0xf]  ;;  %v1696_v36 = vld [vmem:[%s2161_s1 + $0x90] sm:$0xf] }
  0x11   :  { %v1701_v37 = vld [vmem:[%s2161_s1 + $0x94] sm:$0xf]  ;;  %v1706_v38 = vld [vmem:[%s2161_s1 + $0x98] sm:$0xf]  ;;  %v1711_v39 = vld [vmem:[%s2161_s1 + $0x9c] sm:$0xf] }
  0x12   :  { %v1716_v40 = vld [vmem:[%s2161_s1 + $0xa0] sm:$0xf]  ;;  %v1721_v41 = vld [vmem:[%s2161_s1 + $0xa4] sm:$0xf]  ;;  %v1726_v42 = vld [vmem:[%s2161_s1 + $0xa8] sm:$0xf] }
  0x13   :  { %v1731_v43 = vld [vmem:[%s2161_s1 + $0xac] sm:$0xf]  ;;  %v1736_v44 = vld [vmem:[%s2161_s1 + $0xb0] sm:$0xf]  ;;  %v1741_v45 = vld [vmem:[%s2161_s1 + $0xb4] sm:$0xf] }
  0x14   :  { %v1746_v46 = vld [vmem:[%s2161_s1 + $0xb8] sm:$0xf]  ;;  %v1751_v47 = vld [vmem:[%s2161_s1 + $0xbc] sm:$0xf]  ;;  %v1756_v48 = vld [vmem:[%s2161_s1 + $0xc0] sm:$0xf] }
  0x15   :  { %2188 = vst [vmem:[#allocation25_spill] sm:$0xff] %v1756_v48  ;;  %v1761_v49 = vld [vmem:[%s2161_s1 + $0xc4] sm:$0xf]  ;;  %v1766_v50 = vld [vmem:[%s2161_s1 + $0xc8] sm:$0xf] }
  0x16   :  { %2189 = vst [vmem:[#allocation26_spill] sm:$0xff] %v1761_v49  ;;  %v1771_v51 = vld [vmem:[%s2161_s1 + $0xcc] sm:$0xf]  ;;  %v1776_v52 = vld [vmem:[%s2161_s1 + $0xd0] sm:$0xf]  ;;  %v1880_v49 = vmov 0.0  }
  0x17   :  { %v1781_v53 = vld [vmem:[%s2161_s1 + $0xd4] sm:$0xf]  ;;  %v1786_v54 = vld [vmem:[%s2161_s1 + $0xd8] sm:$0xf]  ;;  %v1791_v55 = vld [vmem:[%s2161_s1 + $0xdc] sm:$0xf] }
  0x18   :  { %v1796_v56 = vld [vmem:[%s2161_s1 + $0xe0] sm:$0xf]  ;;  %v1801_v57 = vld [vmem:[%s2161_s1 + $0xe4] sm:$0xf]  ;;  %v1806_v58 = vld [vmem:[%s2161_s1 + $0xe8] sm:$0xf] }
  0x19   :  { %v1811_v59 = vld [vmem:[%s2161_s1 + $0xec] sm:$0xf]  ;;  %v1816_v60 = vld [vmem:[%s2161_s1 + $0xf0] sm:$0xf]  ;;  %v1821_v61 = vld [vmem:[%s2161_s1 + $0xf4] sm:$0xf] }
  0x1a   :  { %v1826_v62 = vld [vmem:[%s2161_s1 + $0xf8] sm:$0xf]  ;;  %v1831_v63 = vld [vmem:[%s2161_s1 + $0xfc] sm:$0xf]  ;;  %v1836_v32 = vld [vmem:[%s2161_s1 + $0x100] sm:$0xf] }
  0x1b   :  { %2190 = vst [vmem:[#allocation27_spill] sm:$0xff] %v1836_v32  ;;  %v1841_v33 = vld [vmem:[%s2161_s1 + $0x104] sm:$0xf]  ;;  %v1846_v0 = vld [vmem:[%s2161_s1 + $0x108] sm:$0xf] }
  0x1c   :  { %2191 = vst [vmem:[#allocation28_spill] sm:$0xff] %v1841_v33  ;;  %2192 = vst [vmem:[#allocation29_spill] sm:$0xff] %v1846_v0  ;;  %v1851_v1 = vld [vmem:[%s2161_s1 + $0x10c] sm:$0xf]  ;;  %v1856_v48 = vld [vmem:[%s2161_s1 + $0x110] sm:$0xf] }
  0x1d   :  { %2193 = vst [vmem:[#allocation30_spill] sm:$0xff] %v1851_v1  ;;  %2194 = vst [vmem:[#allocation31_spill] sm:$0xff] %v1856_v48  ;;  %v1861_v32 = vld [vmem:[%s2161_s1 + $0x114] sm:$0xf]  ;;  %v1866_v33 = vld [vmem:[%s2161_s1 + $0x118] sm:$0xf] }
  0x1e   :  { %2195 = vst [vmem:[#allocation32_spill] sm:$0xff] %v1861_v32  ;;  %2196 = vst [vmem:[#allocation33_spill] sm:$0xff] %v1866_v33  ;;  %v1871_v0 = vld [vmem:[%s2161_s1 + $0x11c] sm:$0xf]  ;;  %v1876_v1 = vld [vmem:[%s2162_s2] ss:$0 sm:$0xff] }
  0x1f   :  { %2197 = vst [vmem:[#allocation34_spill] sm:$0xff] %v1876_v1  ;;  %v1878_v48 = vmov 0.0   ;;  %v1882_v32 = vmov 0.0  }
  0x20 LB: > { %2198 = vst [vmem:[#allocation35_spill] sm:$0xff] %v1450_v48  ;;  %2199 = vst [vmem:[#allocation36_spill] sm:$0xff] %v1454_v49  ;;  %v2202_v31 = vld [vmem:[#allocation22_spill] sm:$0xff]  ;;  %v2203_v30 = vld [vmem:[#allocation21_spill] sm:$0xff]  ;;  %v1139_v48 = vcombine.low %v1826_v62, %v1831_v63  ;;  %v1131_v49 = vcombine.low %v1746_v46, %v1751_v47  ;;  %s111_s1 = smul.u32 5, %s1466_s9  ;;  %s1198_s2 = sshll.u32 %s1466_s9, 7  ;;  %s1466_s9 = sphi %s1886_s9, %s106_s9   ;;  %v1462_v16 = vphi %v1884_v16, %v2243_v16   ;;  %v1458_v32 = vphi %v1882_v32, %v2242_v32   ;;  %v1454_v49 = vphi %v1880_v49, %v2241_v49   ;;  %v1450_v48 = vphi %v1878_v48, %v2240_v48  }
  0x21   : > { %2200 = vst [vmem:[#allocation37_spill] sm:$0xff] %v1458_v32  ;;  %2201 = vst [vmem:[#allocation38_spill] sm:$0xff] %v1462_v16  ;;  %v1123_v1 = vcombine.low %v2203_v30, %v2202_v31  ;;  %v2204_v15 = vld [vmem:[#allocation18_spill] sm:$0xff]  ;;  %v2205_v14 = vld [vmem:[#allocation17_spill] sm:$0xff]  ;;  %v1122_v32 = vcombine.low %v1656_v28, %v1661_v29  ;;  %v1138_v16 = vcombine.low %v1816_v60, %v1821_v61  ;;  %v1468_v30 = vmov 1966171168   ;;  %s1924_s12 = scalar_lea.vmem %s2163_s3, %s1198_s2 }
  0x22   : > { %v1115_v33 = vcombine.low %v2205_v14, %v2204_v15  ;;  %1221 = vmatprep.subr.bf16.mxu1 %v1139_v48  ;;  %v2206_v13 = vld [vmem:[#allocation16_spill] sm:$0xff]  ;;  %v2207_v12 = vld [vmem:[#allocation15_spill] sm:$0xff]  ;;  %v1130_v15 = vcombine.low %v1736_v44, %v1741_v45  ;;  %v123_v31 = vunpack.c.l.s4 %v1468_v30  ;;  %v125_v48 = vlaneseq  ;;  %s112_s15 = scalar_lea.vmem %s2160_s0, %s111_s1  ;;  %v2209_v9 = vld [vmem:[#allocation14_spill] sm:$0xff]  ;;  %s106_s9 = sadd.s32 1, %s1466_s9  }
  0x23   : > { %1199 = vmatprep.subr.bf16.mxu0 %v1123_v1  ;;  %1222 = vmatpush3.bf16.msra.mxu1 %v1131_v49  ;;  %v1114_v14 = vcombine.low %v2207_v12, %v2206_v13  ;;  %v2208_v26 = vld [vmem:[#allocation20_spill] sm:$0xff]  ;;  %v1113_v30 = vcombine.low %v1566_v10, %v1571_v11  ;;  %v1120_v49 = vcombine.low %v1636_v24, %v1641_v25  ;;  %v2210_v8 = vld [vmem:[#allocation13_spill] sm:$0xff]  ;;  %v2212_v6 = vld [vmem:[#allocation11_spill] sm:$0xff]  ;;  %vm1470_vm0 = vmmov 0   ;;  %p103_p0 = scmp.ge.s32.totalorder %s106_s9, 49  }
  0x24   : > { %1200 = vmatpush3.bf16.msra.mxu0 %v1115_v33  ;;  %1223 = vmatprep.subr.bf16.mxu1 %v1138_v16  ;;  %v1121_v1 = vcombine.low %v2208_v26, %v1651_v27  ;;  %v1137_v33 = vcombine.low %v1806_v58, %v1811_v59  ;;  %v124_v16 = vunpack.c.0.s8 %v123_v31  ;;  %v1136_v12 = vcombine.low %v1796_v56, %v1801_v57  ;;  %v1943_v26 = vld [vmem:[%s112_s15] sm:$0x1f]  ;;  %v2213_v5 = vld [vmem:[#allocation10_spill] sm:$0xff]  ;;  %v2216_v2 = vld [vmem:[#allocation7_spill] sm:$0xff]  ;;  %s1472_s26 = smov (%p103_p0), [#allocation2]  }
  0x25   : > { %1201 = vmatprep.subr.bf16.mxu0 %v1122_v32  ;;  %v1129_v32 = vcombine.low %v1726_v42, %v1731_v43  ;;  %v1941_v13 = vshrl.u32 %v125_v48, 7  ;;  %v1128_v31 = vcombine.low %v1716_v40, %v1721_v41  ;;  %v2211_v7 = vld [vmem:[#allocation12_spill] sm:$0xff]  ;;  %v2214_v4 = vld [vmem:[#allocation9_spill] sm:$0xff]  ;;  %vm380_vm1 = vcmask 523264   ;;  %v1379_v10 = vld [vmem:[%s2165_s5 + $0xf0] sm:$0xff] (%p103_p0)   ;;  %s1078_s27 = sshll.u32 (%p103_p0), %s1472_s26, 4  ;;  %s1079_s27 = int_to_ptr.vmem [resolvable:$true] %s1078_s27 }
  0x26   : > { %v2215_v3 = vld [vmem:[#allocation8_spill] sm:$0xff]  ;;  %v1380_v11 = vld [vmem:[%s2165_s5 + $0x30] sm:$0xff] (%p103_p0)   ;;  %v1399_v40 = vld [vmem:[%s2165_s5 + $0xc8] sm:$0xff] (%p103_p0)   ;;  %s1406_s28 = scalar_lea.vmem (%p103_p0), %s1079_s27, 32  ;;  %p1411_p2 = scmp.lt.s32.totalorder (%p103_p0), %s1079_s27, %s1079_s27 }
  0x27   : > { %1224 = vmatpush3.bf16.msra.mxu1 %v1130_v15  ;;  %v1112_v15 = vcombine.low %v2210_v8, %v2209_v9  ;;  %v1388_v24 = vld [vmem:[%s2165_s5 + $0x20] sm:$0xff] (%p103_p0)   ;;  %v1390_v27 = vld [vmem:[%s2165_s5 + $0x58] sm:$0xff] (%p103_p0)   ;;  %v1400_v41 = vld [vmem:[%s2165_s5 + $0x8] sm:$0xff] (%p103_p0)   ;;  %v702_v42 = vsub.s32 (%p103_p0), 1, %v1941_v13  ;;  %v710_v44 = vsub.s32 (%p103_p0), 3, %v1941_v13  ;;  %v698_v46 = vsub.s32 (%p103_p0), 0, %v1941_v13  ;;  %p1407_p1 = scmp.ne.s32.totalorder (%p103_p0), %s1079_s27, %s1406_s28  ;;  %p1412_p3 = scmp.lt.s32.totalorder (%p103_p0), %s1406_s28, %s1406_s28 }
  0x28   : > { %1202 = vmatpush3.bf16.msra.mxu0 %v1114_v14  ;;  %1225 = vmatprep.subr.bf16.mxu1 %v1137_v33  ;;  %v1946_v14 = vsub.s32 %v124_v16, %v1941_v13  ;;  %v1135_v33 = vcombine.low %v1786_v54, %v1791_v55  ;;  %v1389_v25 = vld [vmem:[%s2165_s5 + $0xa0] sm:$0xff] (%p103_p0)   ;;  %v1391_v28 = vld [vmem:[%s2165_s5 + $0xd8] sm:$0xff] (%p103_p0)   ;;  %v1401_v43 = vld [vmem:[%s2165_s5 + $0x88] sm:$0xff] (%p103_p0)  }
  0x29   : > { %1203 = vmatprep.subr.bf16.mxu0 %v1121_v1  ;;  %v1119_v1 = vcombine.low %v1626_v22, %v1631_v23  ;;  %v1386_v22 = vld [vmem:[%s2165_s5 + $0x60] sm:$0xff] (%p103_p0)   ;;  %v1392_v29 = vld [vmem:[%s2165_s5 + $0x18] sm:$0xff] (%p103_p0)   ;;  %p1413_p4 = por (%p103_p0), %p1412_p3, %p1411_p2 }
  0x2a   : > { %v128_v48 = vrot.slane %v1943_v26, %v1946_v14  ;;  %v1387_v23 = vld [vmem:[%s2165_s5 + $0xe0] sm:$0xff] (%p103_p0)  }
  0x2b   : > { %1226 = vmatpush3.bf16.msra.mxu1 %v1129_v32  ;;  %v1127_v32 = vcombine.low %v1706_v38, %v1711_v39  ;;  %v1397_v38 = vld [vmem:[%s2165_s5 + $0x90] sm:$0xff] (%p103_p0)   ;;  %v1398_v39 = vld [vmem:[%s2165_s5 + $0x48] sm:$0xff] (%p103_p0)   ;;  %v1402_v45 = vld [vmem:[%s2165_s5 + $0x40] sm:$0xff] (%p103_p0)   ;;  %p1414_p5 = pnand (%p103_p0), %p1413_p4, %p1407_p1 }
  0x2c   : > { %1204 = vmatpush3.bf16.msra.mxu0 %v1113_v30  ;;  %1227 = vmatprep.subr.bf16.mxu1 %v1136_v12  ;;  %v136_v16 = vcombine.high %v128_v48, %v128_v48  ;;  %v1111_v30 = vcombine.low %v2212_v6, %v2211_v7  ;;  %v1118_v12 = vcombine.low %v1616_v20, %v1621_v21  ;;  %v2222_v6 = vld [vmem:[#allocation24_spill] sm:$0xff]  ;;  %v1469_v7 = vmov 0.0   ;;  %v1384_v20 = vld [vmem:[%s2165_s5 + $0x28] sm:$0xff] (%p103_p0)  }
  0x2d   : > { %1205 = vmatprep.subr.bf16.mxu0 %v1120_v49  ;;  %v1134_v49 = vcombine.low %v1776_v52, %v1781_v53  ;;  %v1385_v21 = vld [vmem:[%s2165_s5 + $0xa8] sm:$0xff] (%p103_p0)   ;;  %v1403_v47 = vld [vmem:[%s2165_s5 + $0xc0] sm:$0xff] (%p103_p0)  }
  0x2e   : > { %v157_v8 = vrot.slane %v136_v16, %v1946_v14  ;;  %v1125_v16 = vcombine.low %v1686_v34, %v1691_v35  ;;  %v1393_v34 = vld [vmem:[%s2165_s5 + $0x98] sm:$0xff] (%p103_p0)   ;;  %v1394_v35 = vld [vmem:[%s2165_s5 + $0x50] sm:$0xff] (%p103_p0)   ;;  %v1405_v52 = vld [vmem:[%s2165_s5 + $0x80] sm:$0xff] (%p103_p0)  }
  0x2f   : > { %1228 = vmatpush3.bf16.msra.mxu1 %v1128_v31  ;;  %v1126_v31 = vcombine.low %v1696_v36, %v1701_v37  ;;  %v1395_v36 = vld [vmem:[%s2165_s5 + $0xd0] sm:$0xff] (%p103_p0)   ;;  %v694_v53 = vld [vmem:[%s2164_s4] sm:$0xf] (%p103_p0) }
  0x30   : > { %1206 = vmatpush3.bf16.msra.mxu0 %v1112_v15  ;;  %1229 = vmatprep.subr.bf16.mxu1 %v1135_v33  ;;  %v159_v9 = vcombine.high %v157_v8, %v157_v8  ;;  %v1110_v15 = vcombine.low %v2214_v4, %v2213_v5  ;;  %v1133_v33 = vcombine.low %v1766_v50, %v1771_v51  ;;  %v1396_v37 = vld [vmem:[%s2165_s5 + $0x10] sm:$0xff] (%p103_p0)   ;;  %v706_v50 = vsub.s32 (%p103_p0), 2, %v1941_v13  ;;  %v1404_v51 = vld [vmem:[%s2165_s5] sm:$0xff] (%p103_p0)  }
  0x31   : > { %1207 = vmatprep.subr.bf16.mxu0 %v1119_v1  ;;  %416 = vmatprep.mubr.bf16.mxu0 %v157_v8  ;;  %v1117_v1 = vcombine.low %v1606_v18, %v1611_v19  ;;  %v1109_v8 = vcombine.low %v2216_v2, %v2215_v3  ;;  %v143_v5 = vrot.slane %v128_v48, %v1946_v14  ;;  %v2223_v2 = vld [vmem:[#allocation23_spill] sm:$0xff]  ;;  %v2225_v48 = vld [vmem:[#allocation32_spill] sm:$0xff]  ;;  %v1382_v18 = vld [vmem:[%s2165_s5 + $0x68] sm:$0xff] (%p103_p0)  }
  0x32   : > { %456 = vmatprep.mubr.bf16.mxu1 %v159_v9  ;;  %v2220_v9 = vld [vmem:[#allocation6_spill] sm:$0xff]  ;;  %v1124_v3 = vcombine.low %v2223_v2, %v2222_v6  ;;  %v121_v2 = vcombine.high %v1943_v26, %v1943_v26  ;;  %v1352_v26 = vld [vmem:[%s1924_s12 + $0x64] ss:$16 sps:$4 sm:$0xff]   ;;  %v703_v54 = vrot.slane (%p103_p0), %v694_v53, %v702_v42  ;;  %v711_v55 = vrot.slane (%p103_p0), %v694_v53, %v710_v44 }
  0x33   : > { %1230 = vmatpush3.bf16.msra.mxu1 %v1127_v32  ;;  %v1383_v19 = vld [vmem:[%s2165_s5 + $0xe8] sm:$0xff] (%p103_p0)   ;;  %v699_v56 = vrot.slane (%p103_p0), %v694_v53, %v698_v46  ;;  %v707_v13 = vrot.slane (%p103_p0), %v694_v53, %v706_v50 }
  0x34   : > { %1208 = vmatpush3.bf16.msra.mxu0 %v1111_v30  ;;  %1231 = vmatprep.subr.bf16.mxu1 %v1134_v49  ;;  %v2217_v30 = vld [vmem:[#allocation19_spill] sm:$0xff]  ;;  %v2219_v49 = vld [vmem:[#allocation25_spill] sm:$0xff] }
  0x35   : > { %1209 = vmatprep.subr.bf16.mxu0 %v1118_v12  ;;  %v1116_v32 = vcombine.low %v2217_v30, %v1601_v17  ;;  %v2218_v12 = vld [vmem:[#allocation26_spill] sm:$0xff] }
  0x36   : > { %v1132_v4 = vcombine.low %v2219_v49, %v2218_v12  ;;  %v2230_v12 = vld [vmem:[#allocation27_spill] sm:$0xff] }
  0x37   : > { %1232 = vmatpush3.bf16.msra.mxu1 %v1126_v31  ;;  %v1381_v17 = vld [vmem:[%s2165_s5 + $0xb0] sm:$0xff] (%p103_p0)  }
  0x38   : > { %1210 = vmatpush3.bf16.msra.mxu0 %v1110_v15  ;;  %1233 = vmatprep.subr.bf16.mxu1 %v1133_v33  ;;  %v2221_v15 = vld [vmem:[#allocation5_spill] sm:$0xff] }
  0x39   : > { %1211 = vmatprep.subr.bf16.mxu0 %v1117_v1  ;;  %v1108_v31 = vcombine.low %v2221_v15, %v2220_v9  ;;  %v158_v1 = vcombine.high %v143_v5, %v143_v5  ;;  %v2224_v33 = vld [vmem:[#allocation33_spill] sm:$0xff]  ;;  %v1355_v15 = vld [vmem:[%s1924_s12 + $0x6c] ss:$16 sps:$4 sm:$0xff]  }
  0x3a   : > { %v1143_v30 = vcombine.low %v2224_v33, %v1871_v0  ;;  %v1358_v33 = vld [vmem:[%s1924_s12 + $0x44] ss:$16 sps:$4 sm:$0xff]  }
  0x3b   : > { %1234 = vmatpush3.bf16.msra.mxu1 %v1125_v16  ;;  %v1378_v0 = vld [vmem:[%s2165_s5 + $0x70] sm:$0xff] (%p103_p0)  }
  0x3c   : > { %1212 = vmatpush3.bf16.msra.mxu0 %v1109_v8  ;;  %1235 = vmatprep.subr.bf16.mxu1 %v1132_v4  ;;  %v2226_v8 = vld [vmem:[#allocation31_spill] sm:$0xff]  ;;  %v2228_v4 = vld [vmem:[#allocation29_spill] sm:$0xff] }
  0x3d   : > { %1213 = vmatprep.subr.bf16.mxu0 %v1116_v32  ;;  %v1142_v16 = vcombine.low %v2226_v8, %v2225_v48  ;;  %v2229_v32 = vld [vmem:[#allocation28_spill] sm:$0xff]  ;;  %v1364_v48 = vld [vmem:[%s1924_s12 + $0x24] ss:$16 sps:$4 sm:$0xff]  }
  0x3e   : > { %v1140_v49 = vcombine.low %v2230_v12, %v2229_v32  ;;  %v1367_v8 = vld [vmem:[%s1924_s12 + $0x2c] ss:$16 sps:$4 sm:$0xff]   ;;  %v1471_v32 = vmov 0  }
  0x3f   : > { %1236 = vmatpush3.bf16.msra.mxu1 %v1124_v3  ;;  %v2227_v3 = vld [vmem:[#allocation30_spill] sm:$0xff] }
  0x40   : > { %1214 = vmatpush3.bf16.msra.mxu0 %v1108_v31  ;;  %v1141_v6 = vcombine.low %v2228_v4, %v2227_v3  ;;  %v1350_v31 = vld [vmem:[%s1924_s12 + $0x60] ss:$16 sps:$4 sm:$0xff]   ;;  %616 = vmatprep.subr.bf16.mxu1 %v1352_v26  ;;  %v1370_v3 = vld [vmem:[%s1924_s12 + $0x4] ss:$16 sps:$4 sm:$0xff]   ;;  %v1373_v4 = vld [vmem:[%s1924_s12 + $0xc] ss:$16 sps:$4 sm:$0xff]  }
  0x41   : > { %1292 = vmatprep.subr.bf16.mxu0 %v1469_v7 }
  0x42   : > { %457 = vmatmul.mubr.bf16.vlgmr.msra.gmra.mxu1 %v158_v1  ;;  %v1353_v1 = vld [vmem:[%s1924_s12 + $0x68] ss:$16 sps:$4 sm:$0xff]  }
  0x43   : > { %417 = vmatmul.mubr.bf16.vlgmr.msra.gmra.mxu0 %v143_v5  ;;  %v135_v5 = vrot.slane %v121_v2, %v1946_v14  ;;  %617 = vmatpush1.bf16.msra.mxu1 %v1350_v31  ;;  %v1365_v2 = vld [vmem:[%s1924_s12 + $0x28] ss:$16 sps:$4 sm:$0xff]  }
  0x44   : > { %1293 = vmatpush3.bf16.msra.mxu0 %v1143_v30  ;;  %1300 = vmatprep.mubr.msk.bf16.mxu0 %vm1470_vm0, %v1469_v7  ;;  %v1361_v30 = vld [vmem:[%s1924_s12 + $0x4c] ss:$16 sps:$4 sm:$0xff]  }
  0x45   : > { %1294 = vmatprep.subr.bf16.mxu0 %v1469_v7  ;;  %v150_v9 = vrot.slane %v135_v5, %v1946_v14  ;;  %v1359_v14 = vld [vmem:[%s1924_s12 + $0x48] ss:$16 sps:$4 sm:$0xff]   ;;  %618 = vmatprep.subr.bf16.mxu1 %v1358_v33 }
  0x46   : > { %v1371_v5 = vld [vmem:[%s1924_s12 + $0x8] ss:$16 sps:$4 sm:$0xff]   ;;  %640 = vmatprep.mubr.bf16.mxu1 %v1471_v32 }
  0x48   : > { %1295 = vmatpush3.bf16.msra.mxu0 %v1142_v16  ;;  %v1362_v16 = vld [vmem:[%s1924_s12 + $0x20] ss:$16 sps:$4 sm:$0xff]  }
  0x49   : > { %1296 = vmatprep.subr.bf16.mxu0 %v1469_v7 }
  0x4c   : > { %1297 = vmatpush3.bf16.msra.mxu0 %v1141_v6  ;;  %v1368_v6 = vld [vmem:[%s1924_s12] ss:$16 sps:$4 sm:$0xff]  }
  0x4d   : > { %1298 = vmatprep.subr.bf16.mxu0 %v1469_v7  ;;  %v1356_v7 = vld [vmem:[%s1924_s12 + $0x40] ss:$16 sps:$4 sm:$0xff]  }
  0x4e   : > { %619 = vmatpush1.bf16.msra.mxu1 %v1356_v7  ;;  %v2231_v7 = vld [vmem:[#allocation34_spill] sm:$0xff] }
  0x4f   : > { %620 = vmatprep.subr.bf16.mxu1 %v1364_v48 }
  0x50   : > { %1299 = vmatpush3.bf16.msra.mxu0 %v1140_v49 }
  0x51   : > { %657 = vmatprep.subr.bf16.mxu0 %v1355_v15 }
  0x52   : > { %621 = vmatpush1.bf16.msra.mxu1 %v1362_v16 }
  0x53   : > { %1301 = vmatmul.mubr.msk.bf16.vlgmr.msra.gmra.mxu0 %vm380_vm1, %v150_v9  ;;  %622 = vmatprep.subr.bf16.mxu1 %v1370_v3 }
  0x54   : > { %658 = vmatpush1.bf16.msra.mxu0 %v1353_v1  ;;  %681 = vmatprep.mubr.bf16.mxu0 %v1471_v32 }
  0x55   : > { %659 = vmatprep.subr.bf16.mxu0 %v1361_v30 }
  0x56   : > { %623 = vmatpush1.bf16.msra.mxu1 %v1368_v6 }
  0x58   : > { %660 = vmatpush1.bf16.msra.mxu0 %v1359_v14 }
  0x59   : > { %661 = vmatprep.subr.bf16.mxu0 %v1367_v8 }
  0x5c   : > { %662 = vmatpush1.bf16.msra.mxu0 %v1365_v2 }
  0x5d   : > { %663 = vmatprep.subr.bf16.mxu0 %v1373_v4 }
  0x60   : > { %664 = vmatpush1.bf16.msra.mxu0 %v1371_v5 }
 0x102   : > { %v1237_v49 = vpop.f32.mrf.mxu1 }
 0x103   : > { %v1215_v12 = vpop.f32.mrf.mxu0 }
 0x104   : > { %v1238_v26 = vpop.f32.mrf.mxu1 }
 0x105   : > { %v1216_v9 = vpop.f32.mrf.mxu0  ;;  %v1239_v48 = vadd.f32 %v1238_v26, %v1237_v49 }
 0x106   : > { %v1240_v31 = vpop.f32.mrf.mxu1  ;;  %v1217_v30 = vadd.f32 %v1216_v9, %v1215_v12  ;;  %v2234_v9 = vld [vmem:[#allocation36_spill] sm:$0xff] }
 0x107   : > { %v1218_v15 = vpop.f32.mrf.mxu0 }
 0x108   : > { %v1241_v33 = vpop.f32.mrf.mxu1  ;;  %v419_v14 = vadd.f32 %v1217_v30, %v2231_v7  ;;  %v2236_v7 = vld [vmem:[#allocation37_spill] sm:$0xff] }
 0x109   : > { %v1219_v1 = vpop.f32.mrf.mxu0 }
 0x10a   : > { %v459_v8 = vadd.f32 %v1239_v48, %v419_v14  ;;  %v2232_v1 = vld [vmem:[#allocation38_spill] sm:$0xff]  ;;  %v2238_v48 = vld [vmem:[#allocation35_spill] sm:$0xff] }
 0x113   : > { %v498_v16 = vpop.f32.mrf.mxu0 }
 0x114   : > { %v499_v2 = vadd.f32 %v498_v16, %v459_v8 }
 0x115   : > { %v1302_v3 = vpop.f32.mrf.mxu0 }
 0x116   : > { %v504_v4 = vmax.f32 %v499_v2, 0.0 }
 0x117   : > { %v501_v6 = vpop.f32.mrf.mxu0 }
 0x118   : > { %v505_v5 = vpack.c.bf16 %v504_v4, %v504_v4 }
 0x119   : > { %v1303_v32 = vpop.f32.mrf.mxu0 }
 0x11a   : > { %1163 = vmatmul.mubr.msk.bf16.vlgmr.msra.gmra.mxu1 %vm380_vm1, %v505_v5  ;;  %1164 = vmatmul.mubr.msk.bf16.vlgmr.msra.gmra.mxu0 %vm380_vm1, %v505_v5  ;;  %v1375_v5 = vld [vmem:[%s2165_s5 + $0xf8] sm:$0xff] (%p103_p0)  }
 0x11b   :  { %1270 = vmatprep.subr.bf16.mxu1 (%p103_p0), %v1375_v5 }
 0x1da   : > { %v642_v15 = vpop.f32.mrf.mxu1  ;;  %v683_v31 = vpop.f32.mrf.mxu0 }
 0x1db   : > { %v2021_v16 = vadd.f32 %v2232_v1, %v642_v15   ;;  %v2024_v49 = vadd.f32 %v2234_v9, %v683_v31   ;;  %v1376_v15 = vld [vmem:[%s2165_s5 + $0x38] sm:$0xff] (%p103_p0)  }
 0x1dc   : > { %v644_v33 = vpop.f32.mrf.mxu1  ;;  %v685_v30 = vpop.f32.mrf.mxu0  ;;  %105 = sbr.rel (!%p103_p0) target bundleno = 32 (0x20), region = 57  ;;  %v1377_v31 = vld [vmem:[%s2165_s5 + $0xb8] sm:$0xff] (%p103_p0)  }
 0x1dd   : > { %v2233_v12 = vmov %v2021_v16  ;;  %v2235_v26 = vmov %v2024_v49  ;;  %v2027_v32 = vadd.f32 %v2236_v7, %v644_v33   ;;  %v2030_v48 = vadd.f32 %v2238_v48, %v685_v30   ;;  %1271 = vmatpush3.bf16.msra.mxu1 (%p103_p0), %v1377_v31 }
 0x1de   : > { %v646_v2 = vpop.f32.mrf.mxu1  ;;  %v687_v3 = vpop.f32.mrf.mxu0  ;;  %v2241_v49 = vmov %v2235_v26  ;;  %v2243_v16 = vmov %v2233_v12  ;;  %1272 = vmatprep.subr.bf16.mxu1 (%p103_p0), %v1379_v10  ;;  %v716_v59 = vadd.f32 (%p103_p0), %v699_v56, %v2233_v12  ;;  %v718_v60 = vadd.f32 (%p103_p0), %v707_v13, %v2235_v26  ;;  %v1165_v12 = vld [vmem:[%s2166_s6] ss:$0 sm:$0xff] (%p103_p0) }
 0x1df   : > { %v2237_v14 = vmov %v2027_v32  ;;  %v2239_v8 = vmov %v2030_v48  ;;  %v1374_v16 = vld [vmem:[%s2165_s5 + $0x78] sm:$0xff] (%p103_p0)  }
 0x1e0   : > { %v647_v4 = vpop.f32.mrf.mxu1  ;;  %v688_v6 = vpop.f32.mrf.mxu0  ;;  %v2240_v48 = vmov %v2239_v8  ;;  %v2242_v32 = vmov %v2237_v14  ;;  %1248 = vmatprep.subr.bf16.mxu0 (%p103_p0), %v1374_v16  ;;  %v717_v57 = vadd.f32 (%p103_p0), %v703_v54, %v2237_v14  ;;  %v719_v58 = vadd.f32 (%p103_p0), %v711_v55, %v2239_v8 }
 0x1e1   :  { %1249 = vmatpush3.bf16.msra.mxu0 %v1376_v15  ;;  %1273 = vmatpush3.bf16.msra.mxu1 %v1381_v17  ;;  %v720_v63 = vmax.f32 %v716_v59, 0.0  ;;  %v722_v49 = vmax.f32 %v718_v60, 0.0 }
 0x1e2   :  { %1250 = vmatprep.subr.bf16.mxu0 %v1378_v0  ;;  %1274 = vmatprep.subr.bf16.mxu1 %v1383_v19  ;;  %v721_v61 = vmax.f32 %v717_v57, 0.0  ;;  %v723_v62 = vmax.f32 %v719_v58, 0.0 }
 0x1e3   :  { %v724_v9 = vpack.c.bf16 %v720_v63, %v720_v63  ;;  %v726_v33 = vpack.c.bf16 %v722_v49, %v722_v49 }
 0x1e4   :  { %v725_v32 = vpack.c.bf16 %v721_v61, %v721_v61  ;;  %v727_v1 = vpack.c.bf16 %v723_v62, %v723_v62 }
 0x1e5   :  { %1251 = vmatpush3.bf16.msra.mxu0 %v1380_v11  ;;  %1275 = vmatpush3.bf16.msra.mxu1 %v1385_v21 }
 0x1e6   :  { %1252 = vmatprep.subr.bf16.mxu0 %v1382_v18  ;;  %1276 = vmatprep.subr.bf16.mxu1 %v1387_v23 }
 0x1e7   :  { %1023 = vmatprep.mubr.bf16.mxu0 %v725_v32  ;;  %1063 = vmatprep.mubr.bf16.mxu1 %v727_v1 }
 0x1e9   :  { %1253 = vmatpush3.bf16.msra.mxu0 %v1384_v20  ;;  %1277 = vmatpush3.bf16.msra.mxu1 %v1389_v25 }
 0x1ea   :  { %1254 = vmatprep.subr.bf16.mxu0 %v1386_v22  ;;  %1278 = vmatprep.subr.bf16.mxu1 %v1391_v28 }
 0x1ed   :  { %1255 = vmatpush3.bf16.msra.mxu0 %v1388_v24  ;;  %1279 = vmatpush3.bf16.msra.mxu1 %v1393_v34 }
 0x1ee   :  { %1256 = vmatprep.subr.bf16.mxu0 %v1390_v27  ;;  %1280 = vmatprep.subr.bf16.mxu1 %v1395_v36 }
 0x1f1   :  { %1257 = vmatpush3.bf16.msra.mxu0 %v1392_v29  ;;  %1281 = vmatpush3.bf16.msra.mxu1 %v1397_v38 }
 0x1f2   :  { %1258 = vmatprep.subr.bf16.mxu0 %v1394_v35  ;;  %1282 = vmatprep.subr.bf16.mxu1 %v1399_v40 }
 0x1f5   :  { %1259 = vmatpush3.bf16.msra.mxu0 %v1396_v37  ;;  %1283 = vmatpush3.bf16.msra.mxu1 %v1401_v43 }
 0x1f6   :  { %1260 = vmatprep.subr.bf16.mxu0 %v1398_v39  ;;  %1284 = vmatprep.subr.bf16.mxu1 %v1403_v47 }
 0x1f9   :  { %1261 = vmatpush3.bf16.msra.mxu0 %v1400_v41  ;;  %1285 = vmatpush3.bf16.msra.mxu1 %v1405_v52 }
 0x1fa   :  { %1262 = vmatprep.subr.bf16.mxu0 %v1402_v45 }
 0x1fc   :  { %1064 = vmatmul.mubr.bf16.vlgmr.msra.gmra.mxu1 %v726_v33 }
 0x1fd   :  { %1263 = vmatpush3.bf16.msra.mxu0 %v1404_v51 }
 0x200   :  { %1024 = vmatmul.mubr.bf16.vlgmr.msra.gmra.mxu0 %v724_v9 }
 0x2bc   :  { %v1286_v7 = vpop.f32.mrf.mxu1 }
 0x2be   :  { %v1287_v26 = vpop.f32.mrf.mxu1 }
 0x2bf   :  { %v1288_v4 = vadd.f32 %v1287_v26, %v1286_v7 }
 0x2c0   :  { %v1264_v30 = vpop.f32.mrf.mxu0  ;;  %v1289_v2 = vpop.f32.mrf.mxu1 }
 0x2c2   :  { %v1265_v14 = vpop.f32.mrf.mxu0  ;;  %v1290_v16 = vpop.f32.mrf.mxu1 }
 0x2c3   :  { %v1266_v48 = vadd.f32 %v1265_v14, %v1264_v30 }
 0x2c4   :  { %v1267_v8 = vpop.f32.mrf.mxu0 }
 0x2c5   :  { %v1026_v3 = vadd.f32 %v1266_v48, %v1165_v12 }
 0x2c6   :  { %v1268_v6 = vpop.f32.mrf.mxu0 }
 0x2c7   :  { %v1066_v5 = vadd.f32 %v1288_v4, %v1026_v3 }
 0x2c9   :  { %1071 = vst [vmem:[#allocation2] sm:$0x3] %v1066_v5 }
 0x2ca   :  { %1417 = shalt.err (!%p1414_p5)
}
 0x2cb   :  { %1081 = dma.vmem_to_hbm [thread:$0]  %s1079_s27, 32, %s2167_s7, [#allocation3]  }
 0x2cc   :  { %1446 = dma.done.wait [#allocation3], 32  }
 0x2cd   :  { %1447 = vsyncadd [#allocation3], 4294967264 }
 0x2ce   :  { %1085 = vsyncpa [#allocation3], 1 }

</bundles_post_ra>
